<compile_context>
chip_gen: v7x
topology: tpu7x:2x2x1
jax: 0.10.0
libtpu: 0.0.40
codegen_flags: <defaults>
</compile_context>

<pallas_src>
import functools

import jax
import jax.numpy as jnp
from jax import lax
from jax.experimental import pallas as pl
from jax.experimental.pallas import tpu as pltpu


# ------------------------ fused multi-layer LSTM kernel ------------------------
def _fused_lstm_kernel(x_ref, h0_ref, c0_ref, wih_ref, whh_ref, b_ref,
                       out_ref, hT_ref, cT_ref,
                       slab_ref, gx_ref, h_sc, c_sc):
    S, B, H = x_ref.shape
    L = h0_ref.shape[0]

    # Layer-0 input slab -> VMEM scratch (stays resident across all layers).
    slab_ref[...] = x_ref[...]

    for layer in range(L):                      # static python loop (L is known)
        # ---- input projection for ALL timesteps: one big MXU matmul ----
        x_flat = slab_ref[...].reshape(S * B, H).astype(jnp.bfloat16)
        gx_ref[...] = (jnp.dot(x_flat, wih_ref[layer],
                               preferred_element_type=jnp.float32)
                       + b_ref[layer])          # (S*B, 4H) f32

        h_sc[...] = h0_ref[layer]
        c_sc[...] = c0_ref[layer]
        last = (layer == L - 1)                 # static

        def step(t, carry):
            row = pl.multiple_of(t * B, B)      # aligned row offset into gates_x
            gates = (gx_ref[pl.ds(row, B), :]
                     + jnp.dot(h_sc[...].astype(jnp.bfloat16), whh_ref[layer],
                               preferred_element_type=jnp.float32))
            # Gate order i, f, g, o; H is a multiple of 128 -> lane-dense slices.
            i_g = jax.nn.sigmoid(gates[:, 0 * H:1 * H])
            f_g = jax.nn.sigmoid(gates[:, 1 * H:2 * H])
            g_g = jnp.tanh(gates[:, 2 * H:3 * H])
            o_g = jax.nn.sigmoid(gates[:, 3 * H:4 * H])
            c_new = f_g * c_sc[...] + i_g * g_g
            h_new = o_g * jnp.tanh(c_new)
            h_sc[...] = h_new
            c_sc[...] = c_new
            if last:
                out_ref[t] = h_new              # final layer -> HBM output slab
            else:
                slab_ref[t] = h_new             # feed next layer (VMEM only)
            return carry

        lax.fori_loop(0, S, step, 0, unroll=True)

        hT_ref[layer] = h_sc[...]
        cT_ref[layer] = c_sc[...]


def fused_lstm(x, h0, c0, w_ih, w_hh, bias, *, vmem_limit=48 * 1024 * 1024):
    """x: (S,B,H) f32; h0/c0: (L,B,H) f32; w_ih/w_hh: (L,H,4H) bf16; bias: (L,1,4H) f32."""
    S, B, H = x.shape
    L = h0.shape[0]
    out_shape = (
        jax.ShapeDtypeStruct((S, B, H), jnp.float32),   # per-step outputs (top layer)
        jax.ShapeDtypeStruct((L, B, H), jnp.float32),   # final h per layer
        jax.ShapeDtypeStruct((L, B, H), jnp.float32),   # final c per layer
    )
    return pl.pallas_call(
        _fused_lstm_kernel,
        out_shape=out_shape,
        grid=(1,),
        in_specs=[
            pl.BlockSpec((S, B, H), lambda i: (0, 0, 0)),        # embedded tokens
            pl.BlockSpec((L, B, H), lambda i: (0, 0, 0)),        # h0 (all layers)
            pl.BlockSpec((L, B, H), lambda i: (0, 0, 0)),        # c0 (all layers)
            pl.BlockSpec((L, H, 4 * H), lambda i: (0, 0, 0)),    # W_ih (bf16)
            pl.BlockSpec((L, H, 4 * H), lambda i: (0, 0, 0)),    # W_hh (bf16)
            pl.BlockSpec((L, 1, 4 * H), lambda i: (0, 0, 0)),    # bias (f32)
        ],
        out_specs=(
            pl.BlockSpec((S, B, H), lambda i: (0, 0, 0)),
            pl.BlockSpec((L, B, H), lambda i: (0, 0, 0)),
            pl.BlockSpec((L, B, H), lambda i: (0, 0, 0)),
        ),
        scratch_shapes=[
            pltpu.VMEM((S, B, H), jnp.float32),        # activation slab between layers
            pltpu.VMEM((S * B, 4 * H), jnp.float32),   # gates_x for current layer
            pltpu.VMEM((B, H), jnp.float32),           # h state
            pltpu.VMEM((B, H), jnp.float32),           # c state
        ],
        compiler_params=pltpu.CompilerParams(
            dimension_semantics=("arbitrary",),
            vmem_limit_bytes=vmem_limit),
    )(x, h0, c0, w_ih, w_hh, bias)


# --------------------------------- decoder ---------------------------------
def _decoder_kernel(x_ref, w_ref, b_ref, o_ref):
    o_ref[...] = (jnp.dot(x_ref[...].astype(jnp.bfloat16), w_ref[...],
                          preferred_element_type=jnp.float32)
                  + b_ref[...]).astype(o_ref.dtype)


def decoder(x, w, b, *, tm=256, tn=1024):
    """x: (N,H) f32; w: (H,V) bf16; b: (1,V) f32 -> (N,V) f32, tiled over (N,V)."""
    N, H = x.shape
    V = w.shape[1]
    tm = min(tm, N)
    tn = min(tn, V)
    if N % tm:
        tm = N   # TODO(synk): pad N to a tile multiple for ragged shapes.
    if V % tn:
        tn = V
    return pl.pallas_call(
        _decoder_kernel,
        out_shape=jax.ShapeDtypeStruct((N, V), jnp.float32),
        grid=(N // tm, V // tn),
        in_specs=[
            pl.BlockSpec((tm, H), lambda i, j: (i, 0)),
            pl.BlockSpec((H, tn), lambda i, j: (0, j)),
            pl.BlockSpec((1, tn), lambda i, j: (0, j)),
        ],
        out_specs=pl.BlockSpec((tm, tn), lambda i, j: (i, j)),
        compiler_params=pltpu.CompilerParams(
            dimension_semantics=("parallel", "parallel"),
            vmem_limit_bytes=48 * 1024 * 1024),
    )(x, w, b)


# ------------------------------- RNNLM wrapper -------------------------------
def init_params(key, ntoken, nhid, nlayers):
    initrange = 0.1
    keys = jax.random.split(key, 3 + 3 * nlayers)
    bound = 1.0 / float(jnp.sqrt(nhid))  # PyTorch LSTM / Linear default bound
    w_ih, w_hh, bias = [], [], []
    for l in range(nlayers):
        k_ih, k_hh, k_b = keys[3 + 3 * l], keys[4 + 3 * l], keys[5 + 3 * l]
        w_ih.append(jax.random.uniform(k_ih, (nhid, 4 * nhid), jnp.float32,
                                       -bound, bound))
        w_hh.append(jax.random.uniform(k_hh, (nhid, 4 * nhid), jnp.float32,
                                       -bound, bound))
        # b_ih + b_hh folded into one bias row (init distribution differs from the
        # sum of two uniforms in PyTorch; forward math is identical).
        bias.append(jax.random.uniform(k_b, (1, 4 * nhid), jnp.float32,
                                       -bound, bound))
    return {
        "encoder": jax.random.uniform(keys[0], (ntoken, nhid), jnp.float32,
                                      -initrange, initrange),
        # Matmul weights stored bf16 (halves DMA/VMEM; f32 accumulation in-kernel).
        "w_ih": jnp.stack(w_ih).astype(jnp.bfloat16),
        "w_hh": jnp.stack(w_hh).astype(jnp.bfloat16),
        "bias": jnp.stack(bias),
        "decoder_w": jax.random.uniform(keys[1], (nhid, ntoken), jnp.float32,
                                        -initrange, initrange).astype(jnp.bfloat16),
        "decoder_b": jax.random.uniform(keys[2], (1, ntoken), jnp.float32,
                                        -bound, bound),
    }


def init_hidden(nlayers, bsz, nhid):
    return (jnp.zeros((nlayers, bsz, nhid), jnp.float32),
            jnp.zeros((nlayers, bsz, nhid), jnp.float32))


@jax.jit
def rnnlm_forward(params, tokens, hidden):
    """tokens: (S, B) int32 -> (decoded (S*B, ntoken), (hT, cT) each (L, B, H))."""
    h0, c0 = hidden
    # Dropout == identity (eval mode). Embedding gather is plain-JAX glue.
    emb = params["encoder"][tokens]                         # (S, B, H) f32
    out, hT, cT = fused_lstm(emb, h0, c0,
                             params["w_ih"], params["w_hh"], params["bias"])
    S, B, H = out.shape
    decoded = decoder(out.reshape(S * B, H),
                      params["decoder_w"], params["decoder_b"])
    return decoded, (hT, cT)


# ------------------------------------ main ------------------------------------
if __name__ == "__main__":
    # nhid chosen as a multiple of 128 (lane-dense gates/stores).
    ntoken, nhid, nlayers = 256, 128, 2
    seq_len, batch = 8, 8

    key = jax.random.PRNGKey(0)
    k_param, k_tok = jax.random.split(key)

    params = init_params(k_param, ntoken, nhid, nlayers)
    tokens = jax.random.randint(k_tok, (seq_len, batch), 0, ntoken, jnp.int32)
    hidden = init_hidden(nlayers, batch, nhid)

    decoded, (hT, cT) = rnnlm_forward(params, tokens, hidden)
    decoded = jax.block_until_ready(decoded)
    jax.block_until_ready(hT)
    jax.block_until_ready(cT)

    assert decoded.shape == (seq_len * batch, ntoken)
    assert hT.shape == (nlayers, batch, nhid)
    assert cT.shape == (nlayers, batch, nhid)
    assert bool(jnp.all(jnp.isfinite(decoded)))
    print("KERNEL_OK")
</pallas_src>

<mosaic_0001>
module attributes {stable_mosaic.version = 11 : i64} {
  func.func @_decoder_kernel(%arg0: i32, %arg1: i32, %arg2: memref<64x128xf32, #tpu.memory_space<vmem>>, %arg3: memref<128x256xbf16, #tpu.memory_space<vmem>>, %arg4: memref<1x256xf32, #tpu.memory_space<vmem>>, %arg5: memref<64x256xf32, #tpu.memory_space<vmem>>) attributes {dimension_semantics = [#tpu.dimension_semantics<parallel>, #tpu.dimension_semantics<parallel>], iteration_bounds = array<i64: 1, 1>, scalar_prefetch = 0 : i64, scratch_operands = 0 : i64, tpu.core_type = #tpu.core_type<tc>, window_params = [{transform_indices = @transform_0, window_bounds = array<i64: 64, 128>}, {transform_indices = @transform_1, window_bounds = array<i64: 128, 256>}, {transform_indices = @transform_2, window_bounds = array<i64: 1, 256>}, {transform_indices = @transform_3, window_bounds = array<i64: 64, 256>}]} {
    %c0 = arith.constant 0 : index
    %c0_0 = arith.constant 0 : index
    %0 = vector.load %arg2[%c0, %c0_0] : memref<64x128xf32, #tpu.memory_space<vmem>>, vector<64x128xf32>
    %1 = arith.truncf %0 : vector<64x128xf32> to vector<64x128xbf16>
    %c0_1 = arith.constant 0 : index
    %c0_2 = arith.constant 0 : index
    %2 = vector.load %arg3[%c0_1, %c0_2] : memref<128x256xbf16, #tpu.memory_space<vmem>>, vector<128x256xbf16>
    %cst = arith.constant dense<0.000000e+00> : vector<64x256xf32>
    %3 = tpu.matmul %1, %2, %cst {dimension_numbers = #tpu.dot_dimension_numbers<[1], [0], [0], [1], [0, 0, 1, 1], [], []>} : vector<64x128xbf16>, vector<128x256xbf16>, vector<64x256xf32> -> vector<64x256xf32>
    %c0_3 = arith.constant 0 : index
    %c0_4 = arith.constant 0 : index
    %4 = vector.load %arg4[%c0_3, %c0_4] : memref<1x256xf32, #tpu.memory_space<vmem>>, vector<1x256xf32>
    %5 = vector.broadcast %4 : vector<1x256xf32> to vector<64x256xf32>
    %6 = arith.addf %3, %5 : vector<64x256xf32>
    %c0_5 = arith.constant 0 : index
    %c0_6 = arith.constant 0 : index
    %7 = vector.load %arg5[%c0_5, %c0_6] : memref<64x256xf32, #tpu.memory_space<vmem>>, vector<64x256xf32>
    tpu.vector_store %arg5[%c0_5, %c0_6], %6 {strides = array<i32>} : memref<64x256xf32, #tpu.memory_space<vmem>>, vector<64x256xf32>,
    return
  }
  func.func @transform_0(%arg0: i32, %arg1: i32) -> (i32, i32) {
    %c0_i32 = arith.constant 0 : i32
    %c0_i32_0 = arith.constant 0 : i32
    return %arg0, %c0_i32 : i32, i32
  }
  func.func @transform_1(%arg0: i32, %arg1: i32) -> (i32, i32) {
    %c0_i32 = arith.constant 0 : i32
    %c0_i32_0 = arith.constant 0 : i32
    return %c0_i32, %arg1 : i32, i32
  }
  func.func @transform_2(%arg0: i32, %arg1: i32) -> (i32, i32) {
    %c0_i32 = arith.constant 0 : i32
    %c0_i32_0 = arith.constant 0 : i32
    return %c0_i32, %arg1 : i32, i32
  }
  func.func @transform_3(%arg0: i32, %arg1: i32) -> (i32, i32) {
    %c0_i32 = arith.constant 0 : i32
    return %arg0, %arg1 : i32, i32
  }
}

module attributes {stable_mosaic.version = 11 : i64} {
  func.func @_fused_lstm_kernel(%arg0: i32, %arg1: memref<8x8x128xf32, #tpu.memory_space<vmem>>, %arg2: memref<2x8x128xf32, #tpu.memory_space<vmem>>, %arg3: memref<2x8x128xf32, #tpu.memory_space<vmem>>, %arg4: memref<2x128x512xbf16, #tpu.memory_space<vmem>>, %arg5: memref<2x128x512xbf16, #tpu.memory_space<vmem>>, %arg6: memref<2x1x512xf32, #tpu.memory_space<vmem>>, %arg7: memref<8x8x128xf32, #tpu.memory_space<vmem>>, %arg8: memref<2x8x128xf32, #tpu.memory_space<vmem>>, %arg9: memref<2x8x128xf32, #tpu.memory_space<vmem>>, %arg10: memref<8x8x128xf32, #tpu.memory_space<vmem>>, %arg11: memref<64x512xf32, #tpu.memory_space<vmem>>, %arg12: memref<8x128xf32, #tpu.memory_space<vmem>>, %arg13: memref<8x128xf32, #tpu.memory_space<vmem>>) attributes {dimension_semantics = [#tpu.dimension_semantics<arbitrary>], iteration_bounds = array<i64: 1>, scalar_prefetch = 0 : i64, scratch_operands = 4 : i64, tpu.core_type = #tpu.core_type<tc>, window_params = [{pipeline_mode = #tpu.pipeline_mode<synchronous>, transform_indices = @transform_0, window_bounds = array<i64: 8, 8, 128>}, {pipeline_mode = #tpu.pipeline_mode<synchronous>, transform_indices = @transform_1, window_bounds = array<i64: 2, 8, 128>}, {pipeline_mode = #tpu.pipeline_mode<synchronous>, transform_indices = @transform_2, window_bounds = array<i64: 2, 8, 128>}, {pipeline_mode = #tpu.pipeline_mode<synchronous>, transform_indices = @transform_3, window_bounds = array<i64: 2, 128, 512>}, {pipeline_mode = #tpu.pipeline_mode<synchronous>, transform_indices = @transform_4, window_bounds = array<i64: 2, 128, 512>}, {pipeline_mode = #tpu.pipeline_mode<synchronous>, transform_indices = @transform_5, window_bounds = array<i64: 2, 1, 512>}, {pipeline_mode = #tpu.pipeline_mode<synchronous>, transform_indices = @transform_6, window_bounds = array<i64: 8, 8, 128>}, {pipeline_mode = #tpu.pipeline_mode<synchronous>, transform_indices = @transform_7, window_bounds = array<i64: 2, 8, 128>}, {pipeline_mode = #tpu.pipeline_mode<synchronous>, transform_indices = @transform_8, window_bounds = array<i64: 2, 8, 128>}]} {
    %c0 = arith.constant 0 : index
    %c0_0 = arith.constant 0 : index
    %c0_1 = arith.constant 0 : index
    %0 = vector.load %arg1[%c0, %c0_0, %c0_1] : memref<8x8x128xf32, #tpu.memory_space<vmem>>, vector<8x8x128xf32>
    %c0_2 = arith.constant 0 : index
    %c0_3 = arith.constant 0 : index
    %c0_4 = arith.constant 0 : index
    %1 = vector.load %arg10[%c0_2, %c0_3, %c0_4] : memref<8x8x128xf32, #tpu.memory_space<vmem>>, vector<8x8x128xf32>
    tpu.vector_store %arg10[%c0_2, %c0_3, %c0_4], %0 {strides = array<i32>} : memref<8x8x128xf32, #tpu.memory_space<vmem>>, vector<8x8x128xf32>,
    %c0_5 = arith.constant 0 : index
    %c0_6 = arith.constant 0 : index
    %c0_7 = arith.constant 0 : index
    %2 = vector.load %arg10[%c0_5, %c0_6, %c0_7] : memref<8x8x128xf32, #tpu.memory_space<vmem>>, vector<8x8x128xf32>
    %3 = vector.shape_cast %2 : vector<8x8x128xf32> to vector<64x128xf32>
    %4 = arith.truncf %3 : vector<64x128xf32> to vector<64x128xbf16>
    %c0_8 = arith.constant 0 : index
    %c0_9 = arith.constant 0 : index
    %c0_10 = arith.constant 0 : index
    %5 = vector.load %arg4[%c0_8, %c0_9, %c0_10] : memref<2x128x512xbf16, #tpu.memory_space<vmem>>, vector<1x128x512xbf16>
    %6 = vector.shape_cast %5 : vector<1x128x512xbf16> to vector<128x512xbf16>
    %cst = arith.constant dense<0.000000e+00> : vector<64x512xf32>
    %7 = tpu.matmul %4, %6, %cst {dimension_numbers = #tpu.dot_dimension_numbers<[1], [0], [0], [1], [0, 0, 1, 1], [], []>} : vector<64x128xbf16>, vector<128x512xbf16>, vector<64x512xf32> -> vector<64x512xf32>
    %c0_11 = arith.constant 0 : index
    %c0_12 = arith.constant 0 : index
    %c0_13 = arith.constant 0 : index
    %8 = vector.load %arg6[%c0_11, %c0_12, %c0_13] : memref<2x1x512xf32, #tpu.memory_space<vmem>>, vector<1x1x512xf32>
    %9 = vector.shape_cast %8 : vector<1x1x512xf32> to vector<1x512xf32>
    %10 = vector.broadcast %9 : vector<1x512xf32> to vector<64x512xf32>
    %11 = arith.addf %7, %10 : vector<64x512xf32>
    %c0_14 = arith.constant 0 : index
    %c0_15 = arith.constant 0 : index
    %12 = vector.load %arg11[%c0_14, %c0_15] : memref<64x512xf32, #tpu.memory_space<vmem>>, vector<64x512xf32>
    tpu.vector_store %arg11[%c0_14, %c0_15], %11 {strides = array<i32>} : memref<64x512xf32, #tpu.memory_space<vmem>>, vector<64x512xf32>,
    %c0_16 = arith.constant 0 : index
    %c0_17 = arith.constant 0 : index
    %c0_18 = arith.constant 0 : index
    %13 = vector.load %arg2[%c0_16, %c0_17, %c0_18] : memref<2x8x128xf32, #tpu.memory_space<vmem>>, vector<1x8x128xf32>
    %14 = vector.shape_cast %13 : vector<1x8x128xf32> to vector<8x128xf32>
    %c0_19 = arith.constant 0 : index
    %c0_20 = arith.constant 0 : index
    %15 = vector.load %arg12[%c0_19, %c0_20] : memref<8x128xf32, #tpu.memory_space<vmem>>, vector<8x128xf32>
    tpu.vector_store %arg12[%c0_19, %c0_20], %14 {strides = array<i32>} : memref<8x128xf32, #tpu.memory_space<vmem>>, vector<8x128xf32>,
    %c0_21 = arith.constant 0 : index
    %c0_22 = arith.constant 0 : index
    %c0_23 = arith.constant 0 : index
    %16 = vector.load %arg3[%c0_21, %c0_22, %c0_23] : memref<2x8x128xf32, #tpu.memory_space<vmem>>, vector<1x8x128xf32>
    %17 = vector.shape_cast %16 : vector<1x8x128xf32> to vector<8x128xf32>
    %c0_24 = arith.constant 0 : index
    %c0_25 = arith.constant 0 : index
    %18 = vector.load %arg13[%c0_24, %c0_25] : memref<8x128xf32, #tpu.memory_space<vmem>>, vector<8x128xf32>
    tpu.vector_store %arg13[%c0_24, %c0_25], %17 {strides = array<i32>} : memref<8x128xf32, #tpu.memory_space<vmem>>, vector<8x128xf32>,
    %c0_i32 = arith.constant 0 : i32
    %c8_i32 = arith.constant 8 : i32
    %19 = arith.muli %c0_i32, %c8_i32 : i32
    %20 = tpu.assume_multiple %19, 8 : i32
    %21 = arith.index_cast %20 : i32 to index
    %c0_26 = arith.constant 0 : index
    %22 = vector.load %arg11[%21, %c0_26] : memref<64x512xf32, #tpu.memory_space<vmem>>, vector<8x512xf32>
    %c0_27 = arith.constant 0 : index
    %c0_28 = arith.constant 0 : index
    %23 = vector.load %arg12[%c0_27, %c0_28] : memref<8x128xf32, #tpu.memory_space<vmem>>, vector<8x128xf32>
    %24 = arith.truncf %23 : vector<8x128xf32> to vector<8x128xbf16>
    %c0_29 = arith.constant 0 : index
    %c0_30 = arith.constant 0 : index
    %c0_31 = arith.constant 0 : index
    %25 = vector.load %arg5[%c0_29, %c0_30, %c0_31] : memref<2x128x512xbf16, #tpu.memory_space<vmem>>, vector<1x128x512xbf16>
    %26 = vector.shape_cast %25 : vector<1x128x512xbf16> to vector<128x512xbf16>
    %cst_32 = arith.constant dense<0.000000e+00> : vector<8x512xf32>
    %27 = tpu.matmul %24, %26, %cst_32 {dimension_numbers = #tpu.dot_dimension_numbers<[1], [0], [0], [1], [0, 0, 1, 1], [], []>} : vector<8x128xbf16>, vector<128x512xbf16>, vector<8x512xf32> -> vector<8x512xf32>
    %28 = arith.addf %22, %27 : vector<8x512xf32>
    %29 = vector.extract_strided_slice %28 {offsets = [0, 0], sizes = [8, 128], strides = [1, 1]} : vector<8x512xf32> to vector<8x128xf32>
    %30 = arith.negf %29 : vector<8x128xf32>
    %31 = math.exp %30 : vector<8x128xf32>
    %cst_33 = arith.constant 1.000000e+00 : f32
    %32 = vector.broadcast %cst_33 : f32 to vector<8x128xf32>
    %33 = arith.addf %32, %31 : vector<8x128xf32>
    %34 = arith.divf %32, %33 : vector<8x128xf32>
    %35 = vector.extract_strided_slice %28 {offsets = [0, 128], sizes = [8, 128], strides = [1, 1]} : vector<8x512xf32> to vector<8x128xf32>
    %36 = arith.negf %35 : vector<8x128xf32>
    %37 = math.exp %36 : vector<8x128xf32>
    %cst_34 = arith.constant 1.000000e+00 : f32
    %38 = vector.broadcast %cst_34 : f32 to vector<8x128xf32>
    %39 = arith.addf %38, %37 : vector<8x128xf32>
    %40 = arith.divf %38, %39 : vector<8x128xf32>
    %41 = vector.extract_strided_slice %28 {offsets = [0, 256], sizes = [8, 128], strides = [1, 1]} : vector<8x512xf32> to vector<8x128xf32>
    %42 = math.tanh %41 : vector<8x128xf32>
    %43 = vector.extract_strided_slice %28 {offsets = [0, 384], sizes = [8, 128], strides = [1, 1]} : vector<8x512xf32> to vector<8x128xf32>
    %44 = arith.negf %43 : vector<8x128xf32>
    %45 = math.exp %44 : vector<8x128xf32>
    %cst_35 = arith.constant 1.000000e+00 : f32
    %46 = vector.broadcast %cst_35 : f32 to vector<8x128xf32>
    %47 = arith.addf %46, %45 : vector<8x128xf32>
    %48 = arith.divf %46, %47 : vector<8x128xf32>
    %c0_36 = arith.constant 0 : index
    %c0_37 = arith.constant 0 : index
    %49 = vector.load %arg13[%c0_36, %c0_37] : memref<8x128xf32, #tpu.memory_space<vmem>>, vector<8x128xf32>
    %50 = arith.mulf %40, %49 : vector<8x128xf32>
    %51 = arith.mulf %34, %42 : vector<8x128xf32>
    %52 = arith.addf %50, %51 : vector<8x128xf32>
    %53 = math.tanh %52 : vector<8x128xf32>
    %54 = arith.mulf %48, %53 : vector<8x128xf32>
    %c0_38 = arith.constant 0 : index
    %c0_39 = arith.constant 0 : index
    %55 = vector.load %arg12[%c0_38, %c0_39] : memref<8x128xf32, #tpu.memory_space<vmem>>, vector<8x128xf32>
    tpu.vector_store %arg12[%c0_38, %c0_39], %54 {strides = array<i32>} : memref<8x128xf32, #tpu.memory_space<vmem>>, vector<8x128xf32>,
    %c0_40 = arith.constant 0 : index
    %c0_41 = arith.constant 0 : index
    %56 = vector.load %arg13[%c0_40, %c0_41] : memref<8x128xf32, #tpu.memory_space<vmem>>, vector<8x128xf32>
    tpu.vector_store %arg13[%c0_40, %c0_41], %52 {strides = array<i32>} : memref<8x128xf32, #tpu.memory_space<vmem>>, vector<8x128xf32>,
    %57 = arith.index_cast %c0_i32 : i32 to index
    %c0_42 = arith.constant 0 : index
    %c0_43 = arith.constant 0 : index
    %58 = vector.load %arg10[%57, %c0_42, %c0_43] : memref<8x8x128xf32, #tpu.memory_space<vmem>>, vector<1x8x128xf32>
    %59 = vector.shape_cast %58 : vector<1x8x128xf32> to vector<8x128xf32>
    %60 = vector.shape_cast %54 : vector<8x128xf32> to vector<1x8x128xf32>
    tpu.vector_store %arg10[%57, %c0_42, %c0_43], %60 {strides = array<i32>} : memref<8x8x128xf32, #tpu.memory_space<vmem>>, vector<1x8x128xf32>,
    %c1_i32 = arith.constant 1 : i32
    %c8_i32_44 = arith.constant 8 : i32
    %61 = arith.muli %c1_i32, %c8_i32_44 : i32
    %62 = tpu.assume_multiple %61, 8 : i32
    %63 = arith.index_cast %62 : i32 to index
    %c0_45 = arith.constant 0 : index
    %64 = vector.load %arg11[%63, %c0_45] : memref<64x512xf32, #tpu.memory_space<vmem>>, vector<8x512xf32>
    %c0_46 = arith.constant 0 : index
    %c0_47 = arith.constant 0 : index
    %65 = vector.load %arg12[%c0_46, %c0_47] : memref<8x128xf32, #tpu.memory_space<vmem>>, vector<8x128xf32>
    %66 = arith.truncf %65 : vector<8x128xf32> to vector<8x128xbf16>
    %c0_48 = arith.constant 0 : index
    %c0_49 = arith.constant 0 : index
    %c0_50 = arith.constant 0 : index
    %67 = vector.load %arg5[%c0_48, %c0_49, %c0_50] : memref<2x128x512xbf16, #tpu.memory_space<vmem>>, vector<1x128x512xbf16>
    %68 = vector.shape_cast %67 : vector<1x128x512xbf16> to vector<128x512xbf16>
    %cst_51 = arith.constant dense<0.000000e+00> : vector<8x512xf32>
    %69 = tpu.matmul %66, %68, %cst_51 {dimension_numbers = #tpu.dot_dimension_numbers<[1], [0], [0], [1], [0, 0, 1, 1], [], []>} : vector<8x128xbf16>, vector<128x512xbf16>, vector<8x512xf32> -> vector<8x512xf32>
    %70 = arith.addf %64, %69 : vector<8x512xf32>
    %71 = vector.extract_strided_slice %70 {offsets = [0, 0], sizes = [8, 128], strides = [1, 1]} : vector<8x512xf32> to vector<8x128xf32>
    %72 = arith.negf %71 : vector<8x128xf32>
    %73 = math.exp %72 : vector<8x128xf32>
    %cst_52 = arith.constant 1.000000e+00 : f32
    %74 = vector.broadcast %cst_52 : f32 to vector<8x128xf32>
    %75 = arith.addf %74, %73 : vector<8x128xf32>
    %76 = arith.divf %74, %75 : vector<8x128xf32>
    %77 = vector.extract_strided_slice %70 {offsets = [0, 128], sizes = [8, 128], strides = [1, 1]} : vector<8x512xf32> to vector<8x128xf32>
    %78 = arith.negf %77 : vector<8x128xf32>
    %79 = math.exp %78 : vector<8x128xf32>
    %cst_53 = arith.constant 1.000000e+00 : f32
    %80 = vector.broadcast %cst_53 : f32 to vector<8x128xf32>
    %81 = arith.addf %80, %79 : vector<8x128xf32>
    %82 = arith.divf %80, %81 : vector<8x128xf32>
    %83 = vector.extract_strided_slice %70 {offsets = [0, 256], sizes = [8, 128], strides = [1, 1]} : vector<8x512xf32> to vector<8x128xf32>
    %84 = math.tanh %83 : vector<8x128xf32>
    %85 = vector.extract_strided_slice %70 {offsets = [0, 384], sizes = [8, 128], strides = [1, 1]} : vector<8x512xf32> to vector<8x128xf32>
    %86 = arith.negf %85 : vector<8x128xf32>
    %87 = math.exp %86 : vector<8x128xf32>
    %cst_54 = arith.constant 1.000000e+00 : f32
    %88 = vector.broadcast %cst_54 : f32 to vector<8x128xf32>
    %89 = arith.addf %88, %87 : vector<8x128xf32>
    %90 = arith.divf %88, %89 : vector<8x128xf32>
    %c0_55 = arith.constant 0 : index
    %c0_56 = arith.constant 0 : index
    %91 = vector.load %arg13[%c0_55, %c0_56] : memref<8x128xf32, #tpu.memory_space<vmem>>, vector<8x128xf32>
    %92 = arith.mulf %82, %91 : vector<8x128xf32>
    %93 = arith.mulf %76, %84 : vector<8x128xf32>
    %94 = arith.addf %92, %93 : vector<8x128xf32>
    %95 = math.tanh %94 : vector<8x128xf32>
    %96 = arith.mulf %90, %95 : vector<8x128xf32>
    %c0_57 = arith.constant 0 : index
    %c0_58 = arith.constant 0 : index
    %97 = vector.load %arg12[%c0_57, %c0_58] : memref<8x128xf32, #tpu.memory_space<vmem>>, vector<8x128xf32>
    tpu.vector_store %arg12[%c0_57, %c0_58], %96 {strides = array<i32>} : memref<8x128xf32, #tpu.memory_space<vmem>>, vector<8x128xf32>,
    %c0_59 = arith.constant 0 : index
    %c0_60 = arith.constant 0 : index
    %98 = vector.load %arg13[%c0_59, %c0_60] : memref<8x128xf32, #tpu.memory_space<vmem>>, vector<8x128xf32>
    tpu.vector_store %arg13[%c0_59, %c0_60], %94 {strides = array<i32>} : memref<8x128xf32, #tpu.memory_space<vmem>>, vector<8x128xf32>,
    %99 = arith.index_cast %c1_i32 : i32 to index
    %c0_61 = arith.constant 0 : index
    %c0_62 = arith.constant 0 : index
    %100 = vector.load %arg10[%99, %c0_61, %c0_62] : memref<8x8x128xf32, #tpu.memory_space<vmem>>, vector<1x8x128xf32>
    %101 = vector.shape_cast %100 : vector<1x8x128xf32> to vector<8x128xf32>
    %102 = vector.shape_cast %96 : vector<8x128xf32> to vector<1x8x128xf32>
    tpu.vector_store %arg10[%99, %c0_61, %c0_62], %102 {strides = array<i32>} : memref<8x8x128xf32, #tpu.memory_space<vmem>>, vector<1x8x128xf32>,
    %c2_i32 = arith.constant 2 : i32
    %c8_i32_63 = arith.constant 8 : i32
    %103 = arith.muli %c2_i32, %c8_i32_63 : i32
    %104 = tpu.assume_multiple %103, 8 : i32
    %105 = arith.index_cast %104 : i32 to index
    %c0_64 = arith.constant 0 : index
    %106 = vector.load %arg11[%105, %c0_64] : memref<64x512xf32, #tpu.memory_space<vmem>>, vector<8x512xf32>
    %c0_65 = arith.constant 0 : index
    %c0_66 = arith.constant 0 : index
    %107 = vector.load %arg12[%c0_65, %c0_66] : memref<8x128xf32, #tpu.memory_space<vmem>>, vector<8x128xf32>
    %108 = arith.truncf %107 : vector<8x128xf32> to vector<8x128xbf16>
    %c0_67 = arith.constant 0 : index
    %c0_68 = arith.constant 0 : index
    %c0_69 = arith.constant 0 : index
    %109 = vector.load %arg5[%c0_67, %c0_68, %c0_69] : memref<2x128x512xbf16, #tpu.memory_space<vmem>>, vector<1x128x512xbf16>
    %110 = vector.shape_cast %109 : vector<1x128x512xbf16> to vector<128x512xbf16>
    %cst_70 = arith.constant dense<0.000000e+00> : vector<8x512xf32>
    %111 = tpu.matmul %108, %110, %cst_70 {dimension_numbers = #tpu.dot_dimension_numbers<[1], [0], [0], [1], [0, 0, 1, 1], [], []>} : vector<8x128xbf16>, vector<128x512xbf16>, vector<8x512xf32> -> vector<8x512xf32>
    %112 = arith.addf %106, %111 : vector<8x512xf32>
    %113 = vector.extract_strided_slice %112 {offsets = [0, 0], sizes = [8, 128], strides = [1, 1]} : vector<8x512xf32> to vector<8x128xf32>
    %114 = arith.negf %113 : vector<8x128xf32>
    %115 = math.exp %114 : vector<8x128xf32>
    %cst_71 = arith.constant 1.000000e+00 : f32
    %116 = vector.broadcast %cst_71 : f32 to vector<8x128xf32>
    %117 = arith.addf %116, %115 : vector<8x128xf32>
    %118 = arith.divf %116, %117 : vector<8x128xf32>
    %119 = vector.extract_strided_slice %112 {offsets = [0, 128], sizes = [8, 128], strides = [1, 1]} : vector<8x512xf32> to vector<8x128xf32>
    %120 = arith.negf %119 : vector<8x128xf32>
    %121 = math.exp %120 : vector<8x128xf32>
    %cst_72 = arith.constant 1.000000e+00 : f32
    %122 = vector.broadcast %cst_72 : f32 to vector<8x128xf32>
    %123 = arith.addf %122, %121 : vector<8x128xf32>
    %124 = arith.divf %122, %123 : vector<8x128xf32>
    %125 = vector.extract_strided_slice %112 {offsets = [0, 256], sizes = [8, 128], strides = [1, 1]} : vector<8x512xf32> to vector<8x128xf32>
    %126 = math.tanh %125 : vector<8x128xf32>
    %127 = vector.extract_strided_slice %112 {offsets = [0, 384], sizes = [8, 128], strides = [1, 1]} : vector<8x512xf32> to vector<8x128xf32>
    %128 = arith.negf %127 : vector<8x128xf32>
    %129 = math.exp %128 : vector<8x128xf32>
    %cst_73 = arith.constant 1.000000e+00 : f32
    %130 = vector.broadcast %cst_73 : f32 to vector<8x128xf32>
    %131 = arith.addf %130, %129 : vector<8x128xf32>
    %132 = arith.divf %130, %131 : vector<8x128xf32>
    %c0_74 = arith.constant 0 : index
    %c0_75 = arith.constant 0 : index
    %133 = vector.load %arg13[%c0_74, %c0_75] : memref<8x128xf32, #tpu.memory_space<vmem>>, vector<8x128xf32>
    %134 = arith.mulf %124, %133 : vector<8x128xf32>
    %135 = arith.mulf %118, %126 : vector<8x128xf32>
    %136 = arith.addf %134, %135 : vector<8x128xf32>
    %137 = math.tanh %136 : vector<8x128xf32>
    %138 = arith.mulf %132, %137 : vector<8x128xf32>
    %c0_76 = arith.constant 0 : index
    %c0_77 = arith.constant 0 : index
    %139 = vector.load %arg12[%c0_76, %c0_77] : memref<8x128xf32, #tpu.memory_space<vmem>>, vector<8x128xf32>
    tpu.vector_store %arg12[%c0_76, %c0_77], %138 {strides = array<i32>} : memref<8x128xf32, #tpu.memory_space<vmem>>, vector<8x128xf32>,
    %c0_78 = arith.constant 0 : index
    %c0_79 = arith.constant 0 : index
    %140 = vector.load %arg13[%c0_78, %c0_79] : memref<8x128xf32, #tpu.memory_space<vmem>>, vector<8x128xf32>
    tpu.vector_store %arg13[%c0_78, %c0_79], %136 {strides = array<i32>} : memref<8x128xf32, #tpu.memory_space<vmem>>, vector<8x128xf32>,
    %141 = arith.index_cast %c2_i32 : i32 to index
    %c0_80 = arith.constant 0 : index
    %c0_81 = arith.constant 0 : index
    %142 = vector.load %arg10[%141, %c0_80, %c0_81] : memref<8x8x128xf32, #tpu.memory_space<vmem>>, vector<1x8x128xf32>
    %143 = vector.shape_cast %142 : vector<1x8x128xf32> to vector<8x128xf32>
    %144 = vector.shape_cast %138 : vector<8x128xf32> to vector<1x8x128xf32>
    tpu.vector_store %arg10[%141, %c0_80, %c0_81], %144 {strides = array<i32>} : memref<8x8x128xf32, #tpu.memory_space<vmem>>, vector<1x8x128xf32>,
    %c3_i32 = arith.constant 3 : i32
    %c8_i32_82 = arith.constant 8 : i32
    %145 = arith.muli %c3_i32, %c8_i32_82 : i32
    %146 = tpu.assume_multiple %145, 8 : i32
    %147 = arith.index_cast %146 : i32 to index
    %c0_83 = arith.constant 0 : index
    %148 = vector.load %arg11[%147, %c0_83] : memref<64x512xf32, #tpu.memory_space<vmem>>, vector<8x512xf32>
    %c0_84 = arith.constant 0 : index
    %c0_85 = arith.constant 0 : index
    %149 = vector.load %arg12[%c0_84, %c0_85] : memref<8x128xf32, #tpu.memory_space<vmem>>, vector<8x128xf32>
    %150 = arith.truncf %149 : vector<8x128xf32> to vector<8x128xbf16>
    %c0_86 = arith.constant 0 : index
    %c0_87 = arith.constant 0 : index
    %c0_88 = arith.constant 0 : index
    %151 = vector.load %arg5[%c0_86, %c0_87, %c0_88] : memref<2x128x512xbf16, #tpu.memory_space<vmem>>, vector<1x128x512xbf16>
    %152 = vector.shape_cast %151 : vector<1x128x512xbf16> to vector<128x512xbf16>
    %cst_89 = arith.constant dense<0.000000e+00> : vector<8x512xf32>
    %153 = tpu.matmul %150, %152, %cst_89 {dimension_numbers = #tpu.dot_dimension_numbers<[1], [0], [0], [1], [0, 0, 1, 1], [], []>} : vector<8x128xbf16>, vector<128x512xbf16>, vector<8x512xf32> -> vector<8x512xf32>
    %154 = arith.addf %148, %153 : vector<8x512xf32>
    %155 = vector.extract_strided_slice %154 {offsets = [0, 0], sizes = [8, 128], strides = [1, 1]} : vector<8x512xf32> to vector<8x128xf32>
    %156 = arith.negf %155 : vector<8x128xf32>
    %157 = math.exp %156 : vector<8x128xf32>
    %cst_90 = arith.constant 1.000000e+00 : f32
    %158 = vector.broadcast %cst_90 : f32 to vector<8x128xf32>
    %159 = arith.addf %158, %157 : vector<8x128xf32>
    %160 = arith.divf %158, %159 : vector<8x128xf32>
    %161 = vector.extract_strided_slice %154 {offsets = [0, 128], sizes = [8, 128], strides = [1, 1]} : vector<8x512xf32> to vector<8x128xf32>
    %162 = arith.negf %161 : vector<8x128xf32>
    %163 = math.exp %162 : vector<8x128xf32>
    %cst_91 = arith.constant 1.000000e+00 : f32
    %164 = vector.broadcast %cst_91 : f32 to vector<8x128xf32>
    %165 = arith.addf %164, %163 : vector<8x128xf32>
    %166 = arith.divf %164, %165 : vector<8x128xf32>
    %167 = vector.extract_strided_slice %154 {offsets = [0, 256], sizes = [8, 128], strides = [1, 1]} : vector<8x512xf32> to vector<8x128xf32>
    %168 = math.tanh %167 : vector<8x128xf32>
    %169 = vector.extract_strided_slice %154 {offsets = [0, 384], sizes = [8, 128], strides = [1, 1]} : vector<8x512xf32> to vector<8x128xf32>
    %170 = arith.negf %169 : vector<8x128xf32>
    %171 = math.exp %170 : vector<8x128xf32>
    %cst_92 = arith.constant 1.000000e+00 : f32
    %172 = vector.broadcast %cst_92 : f32 to vector<8x128xf32>
    %173 = arith.addf %172, %171 : vector<8x128xf32>
    %174 = arith.divf %172, %173 : vector<8x128xf32>
    %c0_93 = arith.constant 0 : index
    %c0_94 = arith.constant 0 : index
    %175 = vector.load %arg13[%c0_93, %c0_94] : memref<8x128xf32, #tpu.memory_space<vmem>>, vector<8x128xf32>
    %176 = arith.mulf %166, %175 : vector<8x128xf32>
    %177 = arith.mulf %160, %168 : vector<8x128xf32>
    %178 = arith.addf %176, %177 : vector<8x128xf32>
    %179 = math.tanh %178 : vector<8x128xf32>
    %180 = arith.mulf %174, %179 : vector<8x128xf32>
    %c0_95 = arith.constant 0 : index
    %c0_96 = arith.constant 0 : index
    %181 = vector.load %arg12[%c0_95, %c0_96] : memref<8x128xf32, #tpu.memory_space<vmem>>, vector<8x128xf32>
    tpu.vector_store %arg12[%c0_95, %c0_96], %180 {strides = array<i32>} : memref<8x128xf32, #tpu.memory_space<vmem>>, vector<8x128xf32>,
    %c0_97 = arith.constant 0 : index
    %c0_98 = arith.constant 0 : index
    %182 = vector.load %arg13[%c0_97, %c0_98] : memref<8x128xf32, #tpu.memory_space<vmem>>, vector<8x128xf32>
    tpu.vector_store %arg13[%c0_97, %c0_98], %178 {strides = array<i32>} : memref<8x128xf32, #tpu.memory_space<vmem>>, vector<8x128xf32>,
    %183 = arith.index_cast %c3_i32 : i32 to index
    %c0_99 = arith.constant 0 : index
    %c0_100 = arith.constant 0 : index
    %184 = vector.load %arg10[%183, %c0_99, %c0_100] : memref<8x8x128xf32, #tpu.memory_space<vmem>>, vector<1x8x128xf32>
    %185 = vector.shape_cast %184 : vector<1x8x128xf32> to vector<8x128xf32>
    %186 = vector.shape_cast %180 : vector<8x128xf32> to vector<1x8x128xf32>
    tpu.vector_store %arg10[%183, %c0_99, %c0_100], %186 {strides = array<i32>} : memref<8x8x128xf32, #tpu.memory_space<vmem>>, vector<1x8x128xf32>,
    %c4_i32 = arith.constant 4 : i32
    %c8_i32_101 = arith.constant 8 : i32
    %187 = arith.muli %c4_i32, %c8_i32_101 : i32
    %188 = tpu.assume_multiple %187, 8 : i32
    %189 = arith.index_cast %188 : i32 to index
    %c0_102 = arith.constant 0 : index
    %190 = vector.load %arg11[%189, %c0_102] : memref<64x512xf32, #tpu.memory_space<vmem>>, vector<8x512xf32>
    %c0_103 = arith.constant 0 : index
    %c0_104 = arith.constant 0 : index
    %191 = vector.load %arg12[%c0_103, %c0_104] : memref<8x128xf32, #tpu.memory_space<vmem>>, vector<8x128xf32>
    %192 = arith.truncf %191 : vector<8x128xf32> to vector<8x128xbf16>
    %c0_105 = arith.constant 0 : index
    %c0_106 = arith.constant 0 : index
    %c0_107 = arith.constant 0 : index
    %193 = vector.load %arg5[%c0_105, %c0_106, %c0_107] : memref<2x128x512xbf16, #tpu.memory_space<vmem>>, vector<1x128x512xbf16>
    %194 = vector.shape_cast %193 : vector<1x128x512xbf16> to vector<128x512xbf16>
    %cst_108 = arith.constant dense<0.000000e+00> : vector<8x512xf32>
    %195 = tpu.matmul %192, %194, %cst_108 {dimension_numbers = #tpu.dot_dimension_numbers<[1], [0], [0], [1], [0, 0, 1, 1], [], []>} : vector<8x128xbf16>, vector<128x512xbf16>, vector<8x512xf32> -> vector<8x512xf32>
    %196 = arith.addf %190, %195 : vector<8x512xf32>
    %197 = vector.extract_strided_slice %196 {offsets = [0, 0], sizes = [8, 128], strides = [1, 1]} : vector<8x512xf32> to vector<8x128xf32>
    %198 = arith.negf %197 : vector<8x128xf32>
    %199 = math.exp %198 : vector<8x128xf32>
    %cst_109 = arith.constant 1.000000e+00 : f32
    %200 = vector.broadcast %cst_109 : f32 to vector<8x128xf32>
    %201 = arith.addf %200, %199 : vector<8x128xf32>
    %202 = arith.divf %200, %201 : vector<8x128xf32>
    %203 = vector.extract_strided_slice %196 {offsets = [0, 128], sizes = [8, 128], strides = [1, 1]} : vector<8x512xf32> to vector<8x128xf32>
    %204 = arith.negf %203 : vector<8x128xf32>
    %205 = math.exp %204 : vector<8x128xf32>
    %cst_110 = arith.constant 1.000000e+00 : f32
    %206 = vector.broadcast %cst_110 : f32 to vector<8x128xf32>
    %207 = arith.addf %206, %205 : vector<8x128xf32>
    %208 = arith.divf %206, %207 : vector<8x128xf32>
    %209 = vector.extract_strided_slice %196 {offsets = [0, 256], sizes = [8, 128], strides = [1, 1]} : vector<8x512xf32> to vector<8x128xf32>
    %210 = math.tanh %209 : vector<8x128xf32>
    %211 = vector.extract_strided_slice %196 {offsets = [0, 384], sizes = [8, 128], strides = [1, 1]} : vector<8x512xf32> to vector<8x128xf32>
    %212 = arith.negf %211 : vector<8x128xf32>
    %213 = math.exp %212 : vector<8x128xf32>
    %cst_111 = arith.constant 1.000000e+00 : f32
    %214 = vector.broadcast %cst_111 : f32 to vector<8x128xf32>
    %215 = arith.addf %214, %213 : vector<8x128xf32>
    %216 = arith.divf %214, %215 : vector<8x128xf32>
    %c0_112 = arith.constant 0 : index
    %c0_113 = arith.constant 0 : index
    %217 = vector.load %arg13[%c0_112, %c0_113] : memref<8x128xf32, #tpu.memory_space<vmem>>, vector<8x128xf32>
    %218 = arith.mulf %208, %217 : vector<8x128xf32>
    %219 = arith.mulf %202, %210 : vector<8x128xf32>
    %220 = arith.addf %218, %219 : vector<8x128xf32>
    %221 = math.tanh %220 : vector<8x128xf32>
    %222 = arith.mulf %216, %221 : vector<8x128xf32>
    %c0_114 = arith.constant 0 : index
    %c0_115 = arith.constant 0 : index
    %223 = vector.load %arg12[%c0_114, %c0_115] : memref<8x128xf32, #tpu.memory_space<vmem>>, vector<8x128xf32>
    tpu.vector_store %arg12[%c0_114, %c0_115], %222 {strides = array<i32>} : memref<8x128xf32, #tpu.memory_space<vmem>>, vector<8x128xf32>,
    %c0_116 = arith.constant 0 : index
    %c0_117 = arith.constant 0 : index
    %224 = vector.load %arg13[%c0_116, %c0_117] : memref<8x128xf32, #tpu.memory_space<vmem>>, vector<8x128xf32>
    tpu.vector_store %arg13[%c0_116, %c0_117], %220 {strides = array<i32>} : memref<8x128xf32, #tpu.memory_space<vmem>>, vector<8x128xf32>,
    %225 = arith.index_cast %c4_i32 : i32 to index
    %c0_118 = arith.constant 0 : index
    %c0_119 = arith.constant 0 : index
    %226 = vector.load %arg10[%225, %c0_118, %c0_119] : memref<8x8x128xf32, #tpu.memory_space<vmem>>, vector<1x8x128xf32>
    %227 = vector.shape_cast %226 : vector<1x8x128xf32> to vector<8x128xf32>
    %228 = vector.shape_cast %222 : vector<8x128xf32> to vector<1x8x128xf32>
    tpu.vector_store %arg10[%225, %c0_118, %c0_119], %228 {strides = array<i32>} : memref<8x8x128xf32, #tpu.memory_space<vmem>>, vector<1x8x128xf32>,
    %c5_i32 = arith.constant 5 : i32
    %c8_i32_120 = arith.constant 8 : i32
    %229 = arith.muli %c5_i32, %c8_i32_120 : i32
    %230 = tpu.assume_multiple %229, 8 : i32
    %231 = arith.index_cast %230 : i32 to index
    %c0_121 = arith.constant 0 : index
    %232 = vector.load %arg11[%231, %c0_121] : memref<64x512xf32, #tpu.memory_space<vmem>>, vector<8x512xf32>
    %c0_122 = arith.constant 0 : index
    %c0_123 = arith.constant 0 : index
    %233 = vector.load %arg12[%c0_122, %c0_123] : memref<8x128xf32, #tpu.memory_space<vmem>>, vector<8x128xf32>
    %234 = arith.truncf %233 : vector<8x128xf32> to vector<8x128xbf16>
    %c0_124 = arith.constant 0 : index
    %c0_125 = arith.constant 0 : index
    %c0_126 = arith.constant 0 : index
    %235 = vector.load %arg5[%c0_124, %c0_125, %c0_126] : memref<2x128x512xbf16, #tpu.memory_space<vmem>>, vector<1x128x512xbf16>
    %236 = vector.shape_cast %235 : vector<1x128x512xbf16> to vector<128x512xbf16>
    %cst_127 = arith.constant dense<0.000000e+00> : vector<8x512xf32>
    %237 = tpu.matmul %234, %236, %cst_127 {dimension_numbers = #tpu.dot_dimension_numbers<[1], [0], [0], [1], [0, 0, 1, 1], [], []>} : vector<8x128xbf16>, vector<128x512xbf16>, vector<8x512xf32> -> vector<8x512xf32>
    %238 = arith.addf %232, %237 : vector<8x512xf32>
    %239 = vector.extract_strided_slice %238 {offsets = [0, 0], sizes = [8, 128], strides = [1, 1]} : vector<8x512xf32> to vector<8x128xf32>
    %240 = arith.negf %239 : vector<8x128xf32>
    %241 = math.exp %240 : vector<8x128xf32>
    %cst_128 = arith.constant 1.000000e+00 : f32
    %242 = vector.broadcast %cst_128 : f32 to vector<8x128xf32>
    %243 = arith.addf %242, %241 : vector<8x128xf32>
    %244 = arith.divf %242, %243 : vector<8x128xf32>
    %245 = vector.extract_strided_slice %238 {offsets = [0, 128], sizes = [8, 128], strides = [1, 1]} : vector<8x512xf32> to vector<8x128xf32>
    %246 = arith.negf %245 : vector<8x128xf32>
    %247 = math.exp %246 : vector<8x128xf32>
    %cst_129 = arith.constant 1.000000e+00 : f32
    %248 = vector.broadcast %cst_129 : f32 to vector<8x128xf32>
    %249 = arith.addf %248, %247 : vector<8x128xf32>
    %250 = arith.divf %248, %249 : vector<8x128xf32>
    %251 = vector.extract_strided_slice %238 {offsets = [0, 256], sizes = [8, 128], strides = [1, 1]} : vector<8x512xf32> to vector<8x128xf32>
    %252 = math.tanh %251 : vector<8x128xf32>
    %253 = vector.extract_strided_slice %238 {offsets = [0, 384], sizes = [8, 128], strides = [1, 1]} : vector<8x512xf32> to vector<8x128xf32>
    %254 = arith.negf %253 : vector<8x128xf32>
    %255 = math.exp %254 : vector<8x128xf32>
    %cst_130 = arith.constant 1.000000e+00 : f32
    %256 = vector.broadcast %cst_130 : f32 to vector<8x128xf32>
    %257 = arith.addf %256, %255 : vector<8x128xf32>
    %258 = arith.divf %256, %257 : vector<8x128xf32>
    %c0_131 = arith.constant 0 : index
    %c0_132 = arith.constant 0 : index
    %259 = vector.load %arg13[%c0_131, %c0_132] : memref<8x128xf32, #tpu.memory_space<vmem>>, vector<8x128xf32>
    %260 = arith.mulf %250, %259 : vector<8x128xf32>
    %261 = arith.mulf %244, %252 : vector<8x128xf32>
    %262 = arith.addf %260, %261 : vector<8x128xf32>
    %263 = math.tanh %262 : vector<8x128xf32>
    %264 = arith.mulf %258, %263 : vector<8x128xf32>
    %c0_133 = arith.constant 0 : index
    %c0_134 = arith.constant 0 : index
    %265 = vector.load %arg12[%c0_133, %c0_134] : memref<8x128xf32, #tpu.memory_space<vmem>>, vector<8x128xf32>
    tpu.vector_store %arg12[%c0_133, %c0_134], %264 {strides = array<i32>} : memref<8x128xf32, #tpu.memory_space<vmem>>, vector<8x128xf32>,
    %c0_135 = arith.constant 0 : index
    %c0_136 = arith.constant 0 : index
    %266 = vector.load %arg13[%c0_135, %c0_136] : memref<8x128xf32, #tpu.memory_space<vmem>>, vector<8x128xf32>
    tpu.vector_store %arg13[%c0_135, %c0_136], %262 {strides = array<i32>} : memref<8x128xf32, #tpu.memory_space<vmem>>, vector<8x128xf32>,
    %267 = arith.index_cast %c5_i32 : i32 to index
    %c0_137 = arith.constant 0 : index
    %c0_138 = arith.constant 0 : index
    %268 = vector.load %arg10[%267, %c0_137, %c0_138] : memref<8x8x128xf32, #tpu.memory_space<vmem>>, vector<1x8x128xf32>
    %269 = vector.shape_cast %268 : vector<1x8x128xf32> to vector<8x128xf32>
    %270 = vector.shape_cast %264 : vector<8x128xf32> to vector<1x8x128xf32>
    tpu.vector_store %arg10[%267, %c0_137, %c0_138], %270 {strides = array<i32>} : memref<8x8x128xf32, #tpu.memory_space<vmem>>, vector<1x8x128xf32>,
    %c6_i32 = arith.constant 6 : i32
    %c8_i32_139 = arith.constant 8 : i32
    %271 = arith.muli %c6_i32, %c8_i32_139 : i32
    %272 = tpu.assume_multiple %271, 8 : i32
    %273 = arith.index_cast %272 : i32 to index
    %c0_140 = arith.constant 0 : index
    %274 = vector.load %arg11[%273, %c0_140] : memref<64x512xf32, #tpu.memory_space<vmem>>, vector<8x512xf32>
    %c0_141 = arith.constant 0 : index
    %c0_142 = arith.constant 0 : index
    %275 = vector.load %arg12[%c0_141, %c0_142] : memref<8x128xf32, #tpu.memory_space<vmem>>, vector<8x128xf32>
    %276 = arith.truncf %275 : vector<8x128xf32> to vector<8x128xbf16>
    %c0_143 = arith.constant 0 : index
    %c0_144 = arith.constant 0 : index
    %c0_145 = arith.constant 0 : index
    %277 = vector.load %arg5[%c0_143, %c0_144, %c0_145] : memref<2x128x512xbf16, #tpu.memory_space<vmem>>, vector<1x128x512xbf16>
    %278 = vector.shape_cast %277 : vector<1x128x512xbf16> to vector<128x512xbf16>
    %cst_146 = arith.constant dense<0.000000e+00> : vector<8x512xf32>
    %279 = tpu.matmul %276, %278, %cst_146 {dimension_numbers = #tpu.dot_dimension_numbers<[1], [0], [0], [1], [0, 0, 1, 1], [], []>} : vector<8x128xbf16>, vector<128x512xbf16>, vector<8x512xf32> -> vector<8x512xf32>
    %280 = arith.addf %274, %279 : vector<8x512xf32>
    %281 = vector.extract_strided_slice %280 {offsets = [0, 0], sizes = [8, 128], strides = [1, 1]} : vector<8x512xf32> to vector<8x128xf32>
    %282 = arith.negf %281 : vector<8x128xf32>
    %283 = math.exp %282 : vector<8x128xf32>
    %cst_147 = arith.constant 1.000000e+00 : f32
    %284 = vector.broadcast %cst_147 : f32 to vector<8x128xf32>
    %285 = arith.addf %284, %283 : vector<8x128xf32>
    %286 = arith.divf %284, %285 : vector<8x128xf32>
    %287 = vector.extract_strided_slice %280 {offsets = [0, 128], sizes = [8, 128], strides = [1, 1]} : vector<8x512xf32> to vector<8x128xf32>
    %288 = arith.negf %287 : vector<8x128xf32>
    %289 = math.exp %288 : vector<8x128xf32>
    %cst_148 = arith.constant 1.000000e+00 : f32
    %290 = vector.broadcast %cst_148 : f32 to vector<8x128xf32>
    %291 = arith.addf %290, %289 : vector<8x128xf32>
    %292 = arith.divf %290, %291 : vector<8x128xf32>
    %293 = vector.extract_strided_slice %280 {offsets = [0, 256], sizes = [8, 128], strides = [1, 1]} : vector<8x512xf32> to vector<8x128xf32>
    %294 = math.tanh %293 : vector<8x128xf32>
    %295 = vector.extract_strided_slice %280 {offsets = [0, 384], sizes = [8, 128], strides = [1, 1]} : vector<8x512xf32> to vector<8x128xf32>
    %296 = arith.negf %295 : vector<8x128xf32>
    %297 = math.exp %296 : vector<8x128xf32>
    %cst_149 = arith.constant 1.000000e+00 : f32
    %298 = vector.broadcast %cst_149 : f32 to vector<8x128xf32>
    %299 = arith.addf %298, %297 : vector<8x128xf32>
    %300 = arith.divf %298, %299 : vector<8x128xf32>
    %c0_150 = arith.constant 0 : index
    %c0_151 = arith.constant 0 : index
    %301 = vector.load %arg13[%c0_150, %c0_151] : memref<8x128xf32, #tpu.memory_space<vmem>>, vector<8x128xf32>
    %302 = arith.mulf %292, %301 : vector<8x128xf32>
    %303 = arith.mulf %286, %294 : vector<8x128xf32>
    %304 = arith.addf %302, %303 : vector<8x128xf32>
    %305 = math.tanh %304 : vector<8x128xf32>
    %306 = arith.mulf %300, %305 : vector<8x128xf32>
    %c0_152 = arith.constant 0 : index
    %c0_153 = arith.constant 0 : index
    %307 = vector.load %arg12[%c0_152, %c0_153] : memref<8x128xf32, #tpu.memory_space<vmem>>, vector<8x128xf32>
    tpu.vector_store %arg12[%c0_152, %c0_153], %306 {strides = array<i32>} : memref<8x128xf32, #tpu.memory_space<vmem>>, vector<8x128xf32>,
    %c0_154 = arith.constant 0 : index
    %c0_155 = arith.constant 0 : index
    %308 = vector.load %arg13[%c0_154, %c0_155] : memref<8x128xf32, #tpu.memory_space<vmem>>, vector<8x128xf32>
    tpu.vector_store %arg13[%c0_154, %c0_155], %304 {strides = array<i32>} : memref<8x128xf32, #tpu.memory_space<vmem>>, vector<8x128xf32>,
    %309 = arith.index_cast %c6_i32 : i32 to index
    %c0_156 = arith.constant 0 : index
    %c0_157 = arith.constant 0 : index
    %310 = vector.load %arg10[%309, %c0_156, %c0_157] : memref<8x8x128xf32, #tpu.memory_space<vmem>>, vector<1x8x128xf32>
    %311 = vector.shape_cast %310 : vector<1x8x128xf32> to vector<8x128xf32>
    %312 = vector.shape_cast %306 : vector<8x128xf32> to vector<1x8x128xf32>
    tpu.vector_store %arg10[%309, %c0_156, %c0_157], %312 {strides = array<i32>} : memref<8x8x128xf32, #tpu.memory_space<vmem>>, vector<1x8x128xf32>,
    %c7_i32 = arith.constant 7 : i32
    %c8_i32_158 = arith.constant 8 : i32
    %313 = arith.muli %c7_i32, %c8_i32_158 : i32
    %314 = tpu.assume_multiple %313, 8 : i32
    %315 = arith.index_cast %314 : i32 to index
    %c0_159 = arith.constant 0 : index
    %316 = vector.load %arg11[%315, %c0_159] : memref<64x512xf32, #tpu.memory_space<vmem>>, vector<8x512xf32>
    %c0_160 = arith.constant 0 : index
    %c0_161 = arith.constant 0 : index
    %317 = vector.load %arg12[%c0_160, %c0_161] : memref<8x128xf32, #tpu.memory_space<vmem>>, vector<8x128xf32>
    %318 = arith.truncf %317 : vector<8x128xf32> to vector<8x128xbf16>
    %c0_162 = arith.constant 0 : index
    %c0_163 = arith.constant 0 : index
    %c0_164 = arith.constant 0 : index
    %319 = vector.load %arg5[%c0_162, %c0_163, %c0_164] : memref<2x128x512xbf16, #tpu.memory_space<vmem>>, vector<1x128x512xbf16>
    %320 = vector.shape_cast %319 : vector<1x128x512xbf16> to vector<128x512xbf16>
    %cst_165 = arith.constant dense<0.000000e+00> : vector<8x512xf32>
    %321 = tpu.matmul %318, %320, %cst_165 {dimension_numbers = #tpu.dot_dimension_numbers<[1], [0], [0], [1], [0, 0, 1, 1], [], []>} : vector<8x128xbf16>, vector<128x512xbf16>, vector<8x512xf32> -> vector<8x512xf32>
    %322 = arith.addf %316, %321 : vector<8x512xf32>
    %323 = vector.extract_strided_slice %322 {offsets = [0, 0], sizes = [8, 128], strides = [1, 1]} : vector<8x512xf32> to vector<8x128xf32>
    %324 = arith.negf %323 : vector<8x128xf32>
    %325 = math.exp %324 : vector<8x128xf32>
    %cst_166 = arith.constant 1.000000e+00 : f32
    %326 = vector.broadcast %cst_166 : f32 to vector<8x128xf32>
    %327 = arith.addf %326, %325 : vector<8x128xf32>
    %328 = arith.divf %326, %327 : vector<8x128xf32>
    %329 = vector.extract_strided_slice %322 {offsets = [0, 128], sizes = [8, 128], strides = [1, 1]} : vector<8x512xf32> to vector<8x128xf32>
    %330 = arith.negf %329 : vector<8x128xf32>
    %331 = math.exp %330 : vector<8x128xf32>
    %cst_167 = arith.constant 1.000000e+00 : f32
    %332 = vector.broadcast %cst_167 : f32 to vector<8x128xf32>
    %333 = arith.addf %332, %331 : vector<8x128xf32>
    %334 = arith.divf %332, %333 : vector<8x128xf32>
    %335 = vector.extract_strided_slice %322 {offsets = [0, 256], sizes = [8, 128], strides = [1, 1]} : vector<8x512xf32> to vector<8x128xf32>
    %336 = math.tanh %335 : vector<8x128xf32>
    %337 = vector.extract_strided_slice %322 {offsets = [0, 384], sizes = [8, 128], strides = [1, 1]} : vector<8x512xf32> to vector<8x128xf32>
    %338 = arith.negf %337 : vector<8x128xf32>
    %339 = math.exp %338 : vector<8x128xf32>
    %cst_168 = arith.constant 1.000000e+00 : f32
    %340 = vector.broadcast %cst_168 : f32 to vector<8x128xf32>
    %341 = arith.addf %340, %339 : vector<8x128xf32>
    %342 = arith.divf %340, %341 : vector<8x128xf32>
    %c0_169 = arith.constant 0 : index
    %c0_170 = arith.constant 0 : index
    %343 = vector.load %arg13[%c0_169, %c0_170] : memref<8x128xf32, #tpu.memory_space<vmem>>, vector<8x128xf32>
    %344 = arith.mulf %334, %343 : vector<8x128xf32>
    %345 = arith.mulf %328, %336 : vector<8x128xf32>
    %346 = arith.addf %344, %345 : vector<8x128xf32>
    %347 = math.tanh %346 : vector<8x128xf32>
    %348 = arith.mulf %342, %347 : vector<8x128xf32>
    %c0_171 = arith.constant 0 : index
    %c0_172 = arith.constant 0 : index
    %349 = vector.load %arg12[%c0_171, %c0_172] : memref<8x128xf32, #tpu.memory_space<vmem>>, vector<8x128xf32>
    tpu.vector_store %arg12[%c0_171, %c0_172], %348 {strides = array<i32>} : memref<8x128xf32, #tpu.memory_space<vmem>>, vector<8x128xf32>,
    %c0_173 = arith.constant 0 : index
    %c0_174 = arith.constant 0 : index
    %350 = vector.load %arg13[%c0_173, %c0_174] : memref<8x128xf32, #tpu.memory_space<vmem>>, vector<8x128xf32>
    tpu.vector_store %arg13[%c0_173, %c0_174], %346 {strides = array<i32>} : memref<8x128xf32, #tpu.memory_space<vmem>>, vector<8x128xf32>,
    %351 = arith.index_cast %c7_i32 : i32 to index
    %c0_175 = arith.constant 0 : index
    %c0_176 = arith.constant 0 : index
    %352 = vector.load %arg10[%351, %c0_175, %c0_176] : memref<8x8x128xf32, #tpu.memory_space<vmem>>, vector<1x8x128xf32>
    %353 = vector.shape_cast %352 : vector<1x8x128xf32> to vector<8x128xf32>
    %354 = vector.shape_cast %348 : vector<8x128xf32> to vector<1x8x128xf32>
    tpu.vector_store %arg10[%351, %c0_175, %c0_176], %354 {strides = array<i32>} : memref<8x8x128xf32, #tpu.memory_space<vmem>>, vector<1x8x128xf32>,
    %c8_i32_177 = arith.constant 8 : i32
    %c0_178 = arith.constant 0 : index
    %c0_179 = arith.constant 0 : index
    %355 = vector.load %arg12[%c0_178, %c0_179] : memref<8x128xf32, #tpu.memory_space<vmem>>, vector<8x128xf32>
    %c0_180 = arith.constant 0 : index
    %c0_181 = arith.constant 0 : index
    %c0_182 = arith.constant 0 : index
    %356 = vector.load %arg8[%c0_180, %c0_181, %c0_182] : memref<2x8x128xf32, #tpu.memory_space<vmem>>, vector<1x8x128xf32>
    %357 = vector.shape_cast %356 : vector<1x8x128xf32> to vector<8x128xf32>
    %358 = vector.shape_cast %355 : vector<8x128xf32> to vector<1x8x128xf32>
    tpu.vector_store %arg8[%c0_180, %c0_181, %c0_182], %358 {strides = array<i32>} : memref<2x8x128xf32, #tpu.memory_space<vmem>>, vector<1x8x128xf32>,
    %c0_183 = arith.constant 0 : index
    %c0_184 = arith.constant 0 : index
    %359 = vector.load %arg13[%c0_183, %c0_184] : memref<8x128xf32, #tpu.memory_space<vmem>>, vector<8x128xf32>
    %c0_185 = arith.constant 0 : index
    %c0_186 = arith.constant 0 : index
    %c0_187 = arith.constant 0 : index
    %360 = vector.load %arg9[%c0_185, %c0_186, %c0_187] : memref<2x8x128xf32, #tpu.memory_space<vmem>>, vector<1x8x128xf32>
    %361 = vector.shape_cast %360 : vector<1x8x128xf32> to vector<8x128xf32>
    %362 = vector.shape_cast %359 : vector<8x128xf32> to vector<1x8x128xf32>
    tpu.vector_store %arg9[%c0_185, %c0_186, %c0_187], %362 {strides = array<i32>} : memref<2x8x128xf32, #tpu.memory_space<vmem>>, vector<1x8x128xf32>,
    %c0_188 = arith.constant 0 : index
    %c0_189 = arith.constant 0 : index
    %c0_190 = arith.constant 0 : index
    %363 = vector.load %arg10[%c0_188, %c0_189, %c0_190] : memref<8x8x128xf32, #tpu.memory_space<vmem>>, vector<8x8x128xf32>
    %364 = vector.shape_cast %363 : vector<8x8x128xf32> to vector<64x128xf32>
    %365 = arith.truncf %364 : vector<64x128xf32> to vector<64x128xbf16>
    %c1 = arith.constant 1 : index
    %c0_191 = arith.constant 0 : index
    %c0_192 = arith.constant 0 : index
    %366 = vector.load %arg4[%c1, %c0_191, %c0_192] : memref<2x128x512xbf16, #tpu.memory_space<vmem>>, vector<1x128x512xbf16>
    %367 = vector.shape_cast %366 : vector<1x128x512xbf16> to vector<128x512xbf16>
    %cst_193 = arith.constant dense<0.000000e+00> : vector<64x512xf32>
    %368 = tpu.matmul %365, %367, %cst_193 {dimension_numbers = #tpu.dot_dimension_numbers<[1], [0], [0], [1], [0, 0, 1, 1], [], []>} : vector<64x128xbf16>, vector<128x512xbf16>, vector<64x512xf32> -> vector<64x512xf32>
    %c1_194 = arith.constant 1 : index
    %c0_195 = arith.constant 0 : index
    %c0_196 = arith.constant 0 : index
    %369 = vector.load %arg6[%c1_194, %c0_195, %c0_196] : memref<2x1x512xf32, #tpu.memory_space<vmem>>, vector<1x1x512xf32>
    %370 = vector.shape_cast %369 : vector<1x1x512xf32> to vector<1x512xf32>
    %371 = vector.broadcast %370 : vector<1x512xf32> to vector<64x512xf32>
    %372 = arith.addf %368, %371 : vector<64x512xf32>
    %c0_197 = arith.constant 0 : index
    %c0_198 = arith.constant 0 : index
    %373 = vector.load %arg11[%c0_197, %c0_198] : memref<64x512xf32, #tpu.memory_space<vmem>>, vector<64x512xf32>
    tpu.vector_store %arg11[%c0_197, %c0_198], %372 {strides = array<i32>} : memref<64x512xf32, #tpu.memory_space<vmem>>, vector<64x512xf32>,
    %c1_199 = arith.constant 1 : index
    %c0_200 = arith.constant 0 : index
    %c0_201 = arith.constant 0 : index
    %374 = vector.load %arg2[%c1_199, %c0_200, %c0_201] : memref<2x8x128xf32, #tpu.memory_space<vmem>>, vector<1x8x128xf32>
    %375 = vector.shape_cast %374 : vector<1x8x128xf32> to vector<8x128xf32>
    %c0_202 = arith.constant 0 : index
    %c0_203 = arith.constant 0 : index
    %376 = vector.load %arg12[%c0_202, %c0_203] : memref<8x128xf32, #tpu.memory_space<vmem>>, vector<8x128xf32>
    tpu.vector_store %arg12[%c0_202, %c0_203], %375 {strides = array<i32>} : memref<8x128xf32, #tpu.memory_space<vmem>>, vector<8x128xf32>,
    %c1_204 = arith.constant 1 : index
    %c0_205 = arith.constant 0 : index
    %c0_206 = arith.constant 0 : index
    %377 = vector.load %arg3[%c1_204, %c0_205, %c0_206] : memref<2x8x128xf32, #tpu.memory_space<vmem>>, vector<1x8x128xf32>
    %378 = vector.shape_cast %377 : vector<1x8x128xf32> to vector<8x128xf32>
    %c0_207 = arith.constant 0 : index
    %c0_208 = arith.constant 0 : index
    %379 = vector.load %arg13[%c0_207, %c0_208] : memref<8x128xf32, #tpu.memory_space<vmem>>, vector<8x128xf32>
    tpu.vector_store %arg13[%c0_207, %c0_208], %378 {strides = array<i32>} : memref<8x128xf32, #tpu.memory_space<vmem>>, vector<8x128xf32>,
    %c0_i32_209 = arith.constant 0 : i32
    %c8_i32_210 = arith.constant 8 : i32
    %380 = arith.muli %c0_i32_209, %c8_i32_210 : i32
    %381 = tpu.assume_multiple %380, 8 : i32
    %382 = arith.index_cast %381 : i32 to index
    %c0_211 = arith.constant 0 : index
    %383 = vector.load %arg11[%382, %c0_211] : memref<64x512xf32, #tpu.memory_space<vmem>>, vector<8x512xf32>
    %c0_212 = arith.constant 0 : index
    %c0_213 = arith.constant 0 : index
    %384 = vector.load %arg12[%c0_212, %c0_213] : memref<8x128xf32, #tpu.memory_space<vmem>>, vector<8x128xf32>
    %385 = arith.truncf %384 : vector<8x128xf32> to vector<8x128xbf16>
    %c1_214 = arith.constant 1 : index
    %c0_215 = arith.constant 0 : index
    %c0_216 = arith.constant 0 : index
    %386 = vector.load %arg5[%c1_214, %c0_215, %c0_216] : memref<2x128x512xbf16, #tpu.memory_space<vmem>>, vector<1x128x512xbf16>
    %387 = vector.shape_cast %386 : vector<1x128x512xbf16> to vector<128x512xbf16>
    %cst_217 = arith.constant dense<0.000000e+00> : vector<8x512xf32>
    %388 = tpu.matmul %385, %387, %cst_217 {dimension_numbers = #tpu.dot_dimension_numbers<[1], [0], [0], [1], [0, 0, 1, 1], [], []>} : vector<8x128xbf16>, vector<128x512xbf16>, vector<8x512xf32> -> vector<8x512xf32>
    %389 = arith.addf %383, %388 : vector<8x512xf32>
    %390 = vector.extract_strided_slice %389 {offsets = [0, 0], sizes = [8, 128], strides = [1, 1]} : vector<8x512xf32> to vector<8x128xf32>
    %391 = arith.negf %390 : vector<8x128xf32>
    %392 = math.exp %391 : vector<8x128xf32>
    %cst_218 = arith.constant 1.000000e+00 : f32
    %393 = vector.broadcast %cst_218 : f32 to vector<8x128xf32>
    %394 = arith.addf %393, %392 : vector<8x128xf32>
    %395 = arith.divf %393, %394 : vector<8x128xf32>
    %396 = vector.extract_strided_slice %389 {offsets = [0, 128], sizes = [8, 128], strides = [1, 1]} : vector<8x512xf32> to vector<8x128xf32>
    %397 = arith.negf %396 : vector<8x128xf32>
    %398 = math.exp %397 : vector<8x128xf32>
    %cst_219 = arith.constant 1.000000e+00 : f32
    %399 = vector.broadcast %cst_219 : f32 to vector<8x128xf32>
    %400 = arith.addf %399, %398 : vector<8x128xf32>
    %401 = arith.divf %399, %400 : vector<8x128xf32>
    %402 = vector.extract_strided_slice %389 {offsets = [0, 256], sizes = [8, 128], strides = [1, 1]} : vector<8x512xf32> to vector<8x128xf32>
    %403 = math.tanh %402 : vector<8x128xf32>
    %404 = vector.extract_strided_slice %389 {offsets = [0, 384], sizes = [8, 128], strides = [1, 1]} : vector<8x512xf32> to vector<8x128xf32>
    %405 = arith.negf %404 : vector<8x128xf32>
    %406 = math.exp %405 : vector<8x128xf32>
    %cst_220 = arith.constant 1.000000e+00 : f32
    %407 = vector.broadcast %cst_220 : f32 to vector<8x128xf32>
    %408 = arith.addf %407, %406 : vector<8x128xf32>
    %409 = arith.divf %407, %408 : vector<8x128xf32>
    %c0_221 = arith.constant 0 : index
    %c0_222 = arith.constant 0 : index
    %410 = vector.load %arg13[%c0_221, %c0_222] : memref<8x128xf32, #tpu.memory_space<vmem>>, vector<8x128xf32>
    %411 = arith.mulf %401, %410 : vector<8x128xf32>
    %412 = arith.mulf %395, %403 : vector<8x128xf32>
    %413 = arith.addf %411, %412 : vector<8x128xf32>
    %414 = math.tanh %413 : vector<8x128xf32>
    %415 = arith.mulf %409, %414 : vector<8x128xf32>
    %c0_223 = arith.constant 0 : index
    %c0_224 = arith.constant 0 : index
    %416 = vector.load %arg12[%c0_223, %c0_224] : memref<8x128xf32, #tpu.memory_space<vmem>>, vector<8x128xf32>
    tpu.vector_store %arg12[%c0_223, %c0_224], %415 {strides = array<i32>} : memref<8x128xf32, #tpu.memory_space<vmem>>, vector<8x128xf32>,
    %c0_225 = arith.constant 0 : index
    %c0_226 = arith.constant 0 : index
    %417 = vector.load %arg13[%c0_225, %c0_226] : memref<8x128xf32, #tpu.memory_space<vmem>>, vector<8x128xf32>
    tpu.vector_store %arg13[%c0_225, %c0_226], %413 {strides = array<i32>} : memref<8x128xf32, #tpu.memory_space<vmem>>, vector<8x128xf32>,
    %418 = arith.index_cast %c0_i32_209 : i32 to index
    %c0_227 = arith.constant 0 : index
    %c0_228 = arith.constant 0 : index
    %419 = vector.load %arg7[%418, %c0_227, %c0_228] : memref<8x8x128xf32, #tpu.memory_space<vmem>>, vector<1x8x128xf32>
    %420 = vector.shape_cast %419 : vector<1x8x128xf32> to vector<8x128xf32>
    %421 = vector.shape_cast %415 : vector<8x128xf32> to vector<1x8x128xf32>
    tpu.vector_store %arg7[%418, %c0_227, %c0_228], %421 {strides = array<i32>} : memref<8x8x128xf32, #tpu.memory_space<vmem>>, vector<1x8x128xf32>,
    %c1_i32_229 = arith.constant 1 : i32
    %c8_i32_230 = arith.constant 8 : i32
    %422 = arith.muli %c1_i32_229, %c8_i32_230 : i32
    %423 = tpu.assume_multiple %422, 8 : i32
    %424 = arith.index_cast %423 : i32 to index
    %c0_231 = arith.constant 0 : index
    %425 = vector.load %arg11[%424, %c0_231] : memref<64x512xf32, #tpu.memory_space<vmem>>, vector<8x512xf32>
    %c0_232 = arith.constant 0 : index
    %c0_233 = arith.constant 0 : index
    %426 = vector.load %arg12[%c0_232, %c0_233] : memref<8x128xf32, #tpu.memory_space<vmem>>, vector<8x128xf32>
    %427 = arith.truncf %426 : vector<8x128xf32> to vector<8x128xbf16>
    %c1_234 = arith.constant 1 : index
    %c0_235 = arith.constant 0 : index
    %c0_236 = arith.constant 0 : index
    %428 = vector.load %arg5[%c1_234, %c0_235, %c0_236] : memref<2x128x512xbf16, #tpu.memory_space<vmem>>, vector<1x128x512xbf16>
    %429 = vector.shape_cast %428 : vector<1x128x512xbf16> to vector<128x512xbf16>
    %cst_237 = arith.constant dense<0.000000e+00> : vector<8x512xf32>
    %430 = tpu.matmul %427, %429, %cst_237 {dimension_numbers = #tpu.dot_dimension_numbers<[1], [0], [0], [1], [0, 0, 1, 1], [], []>} : vector<8x128xbf16>, vector<128x512xbf16>, vector<8x512xf32> -> vector<8x512xf32>
    %431 = arith.addf %425, %430 : vector<8x512xf32>
    %432 = vector.extract_strided_slice %431 {offsets = [0, 0], sizes = [8, 128], strides = [1, 1]} : vector<8x512xf32> to vector<8x128xf32>
    %433 = arith.negf %432 : vector<8x128xf32>
    %434 = math.exp %433 : vector<8x128xf32>
    %cst_238 = arith.constant 1.000000e+00 : f32
    %435 = vector.broadcast %cst_238 : f32 to vector<8x128xf32>
    %436 = arith.addf %435, %434 : vector<8x128xf32>
    %437 = arith.divf %435, %436 : vector<8x128xf32>
    %438 = vector.extract_strided_slice %431 {offsets = [0, 128], sizes = [8, 128], strides = [1, 1]} : vector<8x512xf32> to vector<8x128xf32>
    %439 = arith.negf %438 : vector<8x128xf32>
    %440 = math.exp %439 : vector<8x128xf32>
    %cst_239 = arith.constant 1.000000e+00 : f32
    %441 = vector.broadcast %cst_239 : f32 to vector<8x128xf32>
    %442 = arith.addf %441, %440 : vector<8x128xf32>
    %443 = arith.divf %441, %442 : vector<8x128xf32>
    %444 = vector.extract_strided_slice %431 {offsets = [0, 256], sizes = [8, 128], strides = [1, 1]} : vector<8x512xf32> to vector<8x128xf32>
    %445 = math.tanh %444 : vector<8x128xf32>
    %446 = vector.extract_strided_slice %431 {offsets = [0, 384], sizes = [8, 128], strides = [1, 1]} : vector<8x512xf32> to vector<8x128xf32>
    %447 = arith.negf %446 : vector<8x128xf32>
    %448 = math.exp %447 : vector<8x128xf32>
    %cst_240 = arith.constant 1.000000e+00 : f32
    %449 = vector.broadcast %cst_240 : f32 to vector<8x128xf32>
    %450 = arith.addf %449, %448 : vector<8x128xf32>
    %451 = arith.divf %449, %450 : vector<8x128xf32>
    %c0_241 = arith.constant 0 : index
    %c0_242 = arith.constant 0 : index
    %452 = vector.load %arg13[%c0_241, %c0_242] : memref<8x128xf32, #tpu.memory_space<vmem>>, vector<8x128xf32>
    %453 = arith.mulf %443, %452 : vector<8x128xf32>
    %454 = arith.mulf %437, %445 : vector<8x128xf32>
    %455 = arith.addf %453, %454 : vector<8x128xf32>
    %456 = math.tanh %455 : vector<8x128xf32>
    %457 = arith.mulf %451, %456 : vector<8x128xf32>
    %c0_243 = arith.constant 0 : index
    %c0_244 = arith.constant 0 : index
    %458 = vector.load %arg12[%c0_243, %c0_244] : memref<8x128xf32, #tpu.memory_space<vmem>>, vector<8x128xf32>
    tpu.vector_store %arg12[%c0_243, %c0_244], %457 {strides = array<i32>} : memref<8x128xf32, #tpu.memory_space<vmem>>, vector<8x128xf32>,
    %c0_245 = arith.constant 0 : index
    %c0_246 = arith.constant 0 : index
    %459 = vector.load %arg13[%c0_245, %c0_246] : memref<8x128xf32, #tpu.memory_space<vmem>>, vector<8x128xf32>
    tpu.vector_store %arg13[%c0_245, %c0_246], %455 {strides = array<i32>} : memref<8x128xf32, #tpu.memory_space<vmem>>, vector<8x128xf32>,
    %460 = arith.index_cast %c1_i32_229 : i32 to index
    %c0_247 = arith.constant 0 : index
    %c0_248 = arith.constant 0 : index
    %461 = vector.load %arg7[%460, %c0_247, %c0_248] : memref<8x8x128xf32, #tpu.memory_space<vmem>>, vector<1x8x128xf32>
    %462 = vector.shape_cast %461 : vector<1x8x128xf32> to vector<8x128xf32>
    %463 = vector.shape_cast %457 : vector<8x128xf32> to vector<1x8x128xf32>
    tpu.vector_store %arg7[%460, %c0_247, %c0_248], %463 {strides = array<i32>} : memref<8x8x128xf32, #tpu.memory_space<vmem>>, vector<1x8x128xf32>,
    %c2_i32_249 = arith.constant 2 : i32
    %c8_i32_250 = arith.constant 8 : i32
    %464 = arith.muli %c2_i32_249, %c8_i32_250 : i32
    %465 = tpu.assume_multiple %464, 8 : i32
    %466 = arith.index_cast %465 : i32 to index
    %c0_251 = arith.constant 0 : index
    %467 = vector.load %arg11[%466, %c0_251] : memref<64x512xf32, #tpu.memory_space<vmem>>, vector<8x512xf32>
    %c0_252 = arith.constant 0 : index
    %c0_253 = arith.constant 0 : index
    %468 = vector.load %arg12[%c0_252, %c0_253] : memref<8x128xf32, #tpu.memory_space<vmem>>, vector<8x128xf32>
    %469 = arith.truncf %468 : vector<8x128xf32> to vector<8x128xbf16>
    %c1_254 = arith.constant 1 : index
    %c0_255 = arith.constant 0 : index
    %c0_256 = arith.constant 0 : index
    %470 = vector.load %arg5[%c1_254, %c0_255, %c0_256] : memref<2x128x512xbf16, #tpu.memory_space<vmem>>, vector<1x128x512xbf16>
    %471 = vector.shape_cast %470 : vector<1x128x512xbf16> to vector<128x512xbf16>
    %cst_257 = arith.constant dense<0.000000e+00> : vector<8x512xf32>
    %472 = tpu.matmul %469, %471, %cst_257 {dimension_numbers = #tpu.dot_dimension_numbers<[1], [0], [0], [1], [0, 0, 1, 1], [], []>} : vector<8x128xbf16>, vector<128x512xbf16>, vector<8x512xf32> -> vector<8x512xf32>
    %473 = arith.addf %467, %472 : vector<8x512xf32>
    %474 = vector.extract_strided_slice %473 {offsets = [0, 0], sizes = [8, 128], strides = [1, 1]} : vector<8x512xf32> to vector<8x128xf32>
    %475 = arith.negf %474 : vector<8x128xf32>
    %476 = math.exp %475 : vector<8x128xf32>
    %cst_258 = arith.constant 1.000000e+00 : f32
    %477 = vector.broadcast %cst_258 : f32 to vector<8x128xf32>
    %478 = arith.addf %477, %476 : vector<8x128xf32>
    %479 = arith.divf %477, %478 : vector<8x128xf32>
    %480 = vector.extract_strided_slice %473 {offsets = [0, 128], sizes = [8, 128], strides = [1, 1]} : vector<8x512xf32> to vector<8x128xf32>
    %481 = arith.negf %480 : vector<8x128xf32>
    %482 = math.exp %481 : vector<8x128xf32>
    %cst_259 = arith.constant 1.000000e+00 : f32
    %483 = vector.broadcast %cst_259 : f32 to vector<8x128xf32>
    %484 = arith.addf %483, %482 : vector<8x128xf32>
    %485 = arith.divf %483, %484 : vector<8x128xf32>
    %486 = vector.extract_strided_slice %473 {offsets = [0, 256], sizes = [8, 128], strides = [1, 1]} : vector<8x512xf32> to vector<8x128xf32>
    %487 = math.tanh %486 : vector<8x128xf32>
    %488 = vector.extract_strided_slice %473 {offsets = [0, 384], sizes = [8, 128], strides = [1, 1]} : vector<8x512xf32> to vector<8x128xf32>
    %489 = arith.negf %488 : vector<8x128xf32>
    %490 = math.exp %489 : vector<8x128xf32>
    %cst_260 = arith.constant 1.000000e+00 : f32
    %491 = vector.broadcast %cst_260 : f32 to vector<8x128xf32>
    %492 = arith.addf %491, %490 : vector<8x128xf32>
    %493 = arith.divf %491, %492 : vector<8x128xf32>
    %c0_261 = arith.constant 0 : index
    %c0_262 = arith.constant 0 : index
    %494 = vector.load %arg13[%c0_261, %c0_262] : memref<8x128xf32, #tpu.memory_space<vmem>>, vector<8x128xf32>
    %495 = arith.mulf %485, %494 : vector<8x128xf32>
    %496 = arith.mulf %479, %487 : vector<8x128xf32>
    %497 = arith.addf %495, %496 : vector<8x128xf32>
    %498 = math.tanh %497 : vector<8x128xf32>
    %499 = arith.mulf %493, %498 : vector<8x128xf32>
    %c0_263 = arith.constant 0 : index
    %c0_264 = arith.constant 0 : index
    %500 = vector.load %arg12[%c0_263, %c0_264] : memref<8x128xf32, #tpu.memory_space<vmem>>, vector<8x128xf32>
    tpu.vector_store %arg12[%c0_263, %c0_264], %499 {strides = array<i32>} : memref<8x128xf32, #tpu.memory_space<vmem>>, vector<8x128xf32>,
    %c0_265 = arith.constant 0 : index
    %c0_266 = arith.constant 0 : index
    %501 = vector.load %arg13[%c0_265, %c0_266] : memref<8x128xf32, #tpu.memory_space<vmem>>, vector<8x128xf32>
    tpu.vector_store %arg13[%c0_265, %c0_266], %497 {strides = array<i32>} : memref<8x128xf32, #tpu.memory_space<vmem>>, vector<8x128xf32>,
    %502 = arith.index_cast %c2_i32_249 : i32 to index
    %c0_267 = arith.constant 0 : index
    %c0_268 = arith.constant 0 : index
    %503 = vector.load %arg7[%502, %c0_267, %c0_268] : memref<8x8x128xf32, #tpu.memory_space<vmem>>, vector<1x8x128xf32>
    %504 = vector.shape_cast %503 : vector<1x8x128xf32> to vector<8x128xf32>
    %505 = vector.shape_cast %499 : vector<8x128xf32> to vector<1x8x128xf32>
    tpu.vector_store %arg7[%502, %c0_267, %c0_268], %505 {strides = array<i32>} : memref<8x8x128xf32, #tpu.memory_space<vmem>>, vector<1x8x128xf32>,
    %c3_i32_269 = arith.constant 3 : i32
    %c8_i32_270 = arith.constant 8 : i32
    %506 = arith.muli %c3_i32_269, %c8_i32_270 : i32
    %507 = tpu.assume_multiple %506, 8 : i32
    %508 = arith.index_cast %507 : i32 to index
    %c0_271 = arith.constant 0 : index
    %509 = vector.load %arg11[%508, %c0_271] : memref<64x512xf32, #tpu.memory_space<vmem>>, vector<8x512xf32>
    %c0_272 = arith.constant 0 : index
    %c0_273 = arith.constant 0 : index
    %510 = vector.load %arg12[%c0_272, %c0_273] : memref<8x128xf32, #tpu.memory_space<vmem>>, vector<8x128xf32>
    %511 = arith.truncf %510 : vector<8x128xf32> to vector<8x128xbf16>
    %c1_274 = arith.constant 1 : index
    %c0_275 = arith.constant 0 : index
    %c0_276 = arith.constant 0 : index
    %512 = vector.load %arg5[%c1_274, %c0_275, %c0_276] : memref<2x128x512xbf16, #tpu.memory_space<vmem>>, vector<1x128x512xbf16>
    %513 = vector.shape_cast %512 : vector<1x128x512xbf16> to vector<128x512xbf16>
    %cst_277 = arith.constant dense<0.000000e+00> : vector<8x512xf32>
    %514 = tpu.matmul %511, %513, %cst_277 {dimension_numbers = #tpu.dot_dimension_numbers<[1], [0], [0], [1], [0, 0, 1, 1], [], []>} : vector<8x128xbf16>, vector<128x512xbf16>, vector<8x512xf32> -> vector<8x512xf32>
    %515 = arith.addf %509, %514 : vector<8x512xf32>
    %516 = vector.extract_strided_slice %515 {offsets = [0, 0], sizes = [8, 128], strides = [1, 1]} : vector<8x512xf32> to vector<8x128xf32>
    %517 = arith.negf %516 : vector<8x128xf32>
    %518 = math.exp %517 : vector<8x128xf32>
    %cst_278 = arith.constant 1.000000e+00 : f32
    %519 = vector.broadcast %cst_278 : f32 to vector<8x128xf32>
    %520 = arith.addf %519, %518 : vector<8x128xf32>
    %521 = arith.divf %519, %520 : vector<8x128xf32>
    %522 = vector.extract_strided_slice %515 {offsets = [0, 128], sizes = [8, 128], strides = [1, 1]} : vector<8x512xf32> to vector<8x128xf32>
    %523 = arith.negf %522 : vector<8x128xf32>
    %524 = math.exp %523 : vector<8x128xf32>
    %cst_279 = arith.constant 1.000000e+00 : f32
    %525 = vector.broadcast %cst_279 : f32 to vector<8x128xf32>
    %526 = arith.addf %525, %524 : vector<8x128xf32>
    %527 = arith.divf %525, %526 : vector<8x128xf32>
    %528 = vector.extract_strided_slice %515 {offsets = [0, 256], sizes = [8, 128], strides = [1, 1]} : vector<8x512xf32> to vector<8x128xf32>
    %529 = math.tanh %528 : vector<8x128xf32>
    %530 = vector.extract_strided_slice %515 {offsets = [0, 384], sizes = [8, 128], strides = [1, 1]} : vector<8x512xf32> to vector<8x128xf32>
    %531 = arith.negf %530 : vector<8x128xf32>
    %532 = math.exp %531 : vector<8x128xf32>
    %cst_280 = arith.constant 1.000000e+00 : f32
    %533 = vector.broadcast %cst_280 : f32 to vector<8x128xf32>
    %534 = arith.addf %533, %532 : vector<8x128xf32>
    %535 = arith.divf %533, %534 : vector<8x128xf32>
    %c0_281 = arith.constant 0 : index
    %c0_282 = arith.constant 0 : index
    %536 = vector.load %arg13[%c0_281, %c0_282] : memref<8x128xf32, #tpu.memory_space<vmem>>, vector<8x128xf32>
    %537 = arith.mulf %527, %536 : vector<8x128xf32>
    %538 = arith.mulf %521, %529 : vector<8x128xf32>
    %539 = arith.addf %537, %538 : vector<8x128xf32>
    %540 = math.tanh %539 : vector<8x128xf32>
    %541 = arith.mulf %535, %540 : vector<8x128xf32>
    %c0_283 = arith.constant 0 : index
    %c0_284 = arith.constant 0 : index
    %542 = vector.load %arg12[%c0_283, %c0_284] : memref<8x128xf32, #tpu.memory_space<vmem>>, vector<8x128xf32>
    tpu.vector_store %arg12[%c0_283, %c0_284], %541 {strides = array<i32>} : memref<8x128xf32, #tpu.memory_space<vmem>>, vector<8x128xf32>,
    %c0_285 = arith.constant 0 : index
    %c0_286 = arith.constant 0 : index
    %543 = vector.load %arg13[%c0_285, %c0_286] : memref<8x128xf32, #tpu.memory_space<vmem>>, vector<8x128xf32>
    tpu.vector_store %arg13[%c0_285, %c0_286], %539 {strides = array<i32>} : memref<8x128xf32, #tpu.memory_space<vmem>>, vector<8x128xf32>,
    %544 = arith.index_cast %c3_i32_269 : i32 to index
    %c0_287 = arith.constant 0 : index
    %c0_288 = arith.constant 0 : index
    %545 = vector.load %arg7[%544, %c0_287, %c0_288] : memref<8x8x128xf32, #tpu.memory_space<vmem>>, vector<1x8x128xf32>
    %546 = vector.shape_cast %545 : vector<1x8x128xf32> to vector<8x128xf32>
    %547 = vector.shape_cast %541 : vector<8x128xf32> to vector<1x8x128xf32>
    tpu.vector_store %arg7[%544, %c0_287, %c0_288], %547 {strides = array<i32>} : memref<8x8x128xf32, #tpu.memory_space<vmem>>, vector<1x8x128xf32>,
    %c4_i32_289 = arith.constant 4 : i32
    %c8_i32_290 = arith.constant 8 : i32
    %548 = arith.muli %c4_i32_289, %c8_i32_290 : i32
    %549 = tpu.assume_multiple %548, 8 : i32
    %550 = arith.index_cast %549 : i32 to index
    %c0_291 = arith.constant 0 : index
    %551 = vector.load %arg11[%550, %c0_291] : memref<64x512xf32, #tpu.memory_space<vmem>>, vector<8x512xf32>
    %c0_292 = arith.constant 0 : index
    %c0_293 = arith.constant 0 : index
    %552 = vector.load %arg12[%c0_292, %c0_293] : memref<8x128xf32, #tpu.memory_space<vmem>>, vector<8x128xf32>
    %553 = arith.truncf %552 : vector<8x128xf32> to vector<8x128xbf16>
    %c1_294 = arith.constant 1 : index
    %c0_295 = arith.constant 0 : index
    %c0_296 = arith.constant 0 : index
    %554 = vector.load %arg5[%c1_294, %c0_295, %c0_296] : memref<2x128x512xbf16, #tpu.memory_space<vmem>>, vector<1x128x512xbf16>
    %555 = vector.shape_cast %554 : vector<1x128x512xbf16> to vector<128x512xbf16>
    %cst_297 = arith.constant dense<0.000000e+00> : vector<8x512xf32>
    %556 = tpu.matmul %553, %555, %cst_297 {dimension_numbers = #tpu.dot_dimension_numbers<[1], [0], [0], [1], [0, 0, 1, 1], [], []>} : vector<8x128xbf16>, vector<128x512xbf16>, vector<8x512xf32> -> vector<8x512xf32>
    %557 = arith.addf %551, %556 : vector<8x512xf32>
    %558 = vector.extract_strided_slice %557 {offsets = [0, 0], sizes = [8, 128], strides = [1, 1]} : vector<8x512xf32> to vector<8x128xf32>
    %559 = arith.negf %558 : vector<8x128xf32>
    %560 = math.exp %559 : vector<8x128xf32>
    %cst_298 = arith.constant 1.000000e+00 : f32
    %561 = vector.broadcast %cst_298 : f32 to vector<8x128xf32>
    %562 = arith.addf %561, %560 : vector<8x128xf32>
    %563 = arith.divf %561, %562 : vector<8x128xf32>
    %564 = vector.extract_strided_slice %557 {offsets = [0, 128], sizes = [8, 128], strides = [1, 1]} : vector<8x512xf32> to vector<8x128xf32>
    %565 = arith.negf %564 : vector<8x128xf32>
    %566 = math.exp %565 : vector<8x128xf32>
    %cst_299 = arith.constant 1.000000e+00 : f32
    %567 = vector.broadcast %cst_299 : f32 to vector<8x128xf32>
    %568 = arith.addf %567, %566 : vector<8x128xf32>
    %569 = arith.divf %567, %568 : vector<8x128xf32>
    %570 = vector.extract_strided_slice %557 {offsets = [0, 256], sizes = [8, 128], strides = [1, 1]} : vector<8x512xf32> to vector<8x128xf32>
    %571 = math.tanh %570 : vector<8x128xf32>
    %572 = vector.extract_strided_slice %557 {offsets = [0, 384], sizes = [8, 128], strides = [1, 1]} : vector<8x512xf32> to vector<8x128xf32>
    %573 = arith.negf %572 : vector<8x128xf32>
    %574 = math.exp %573 : vector<8x128xf32>
    %cst_300 = arith.constant 1.000000e+00 : f32
    %575 = vector.broadcast %cst_300 : f32 to vector<8x128xf32>
    %576 = arith.addf %575, %574 : vector<8x128xf32>
    %577 = arith.divf %575, %576 : vector<8x128xf32>
    %c0_301 = arith.constant 0 : index
    %c0_302 = arith.constant 0 : index
    %578 = vector.load %arg13[%c0_301, %c0_302] : memref<8x128xf32, #tpu.memory_space<vmem>>, vector<8x128xf32>
    %579 = arith.mulf %569, %578 : vector<8x128xf32>
    %580 = arith.mulf %563, %571 : vector<8x128xf32>
    %581 = arith.addf %579, %580 : vector<8x128xf32>
    %582 = math.tanh %581 : vector<8x128xf32>
    %583 = arith.mulf %577, %582 : vector<8x128xf32>
    %c0_303 = arith.constant 0 : index
    %c0_304 = arith.constant 0 : index
    %584 = vector.load %arg12[%c0_303, %c0_304] : memref<8x128xf32, #tpu.memory_space<vmem>>, vector<8x128xf32>
    tpu.vector_store %arg12[%c0_303, %c0_304], %583 {strides = array<i32>} : memref<8x128xf32, #tpu.memory_space<vmem>>, vector<8x128xf32>,
    %c0_305 = arith.constant 0 : index
    %c0_306 = arith.constant 0 : index
    %585 = vector.load %arg13[%c0_305, %c0_306] : memref<8x128xf32, #tpu.memory_space<vmem>>, vector<8x128xf32>
    tpu.vector_store %arg13[%c0_305, %c0_306], %581 {strides = array<i32>} : memref<8x128xf32, #tpu.memory_space<vmem>>, vector<8x128xf32>,
    %586 = arith.index_cast %c4_i32_289 : i32 to index
    %c0_307 = arith.constant 0 : index
    %c0_308 = arith.constant 0 : index
    %587 = vector.load %arg7[%586, %c0_307, %c0_308] : memref<8x8x128xf32, #tpu.memory_space<vmem>>, vector<1x8x128xf32>
    %588 = vector.shape_cast %587 : vector<1x8x128xf32> to vector<8x128xf32>
    %589 = vector.shape_cast %583 : vector<8x128xf32> to vector<1x8x128xf32>
    tpu.vector_store %arg7[%586, %c0_307, %c0_308], %589 {strides = array<i32>} : memref<8x8x128xf32, #tpu.memory_space<vmem>>, vector<1x8x128xf32>,
    %c5_i32_309 = arith.constant 5 : i32
    %c8_i32_310 = arith.constant 8 : i32
    %590 = arith.muli %c5_i32_309, %c8_i32_310 : i32
    %591 = tpu.assume_multiple %590, 8 : i32
    %592 = arith.index_cast %591 : i32 to index
    %c0_311 = arith.constant 0 : index
    %593 = vector.load %arg11[%592, %c0_311] : memref<64x512xf32, #tpu.memory_space<vmem>>, vector<8x512xf32>
    %c0_312 = arith.constant 0 : index
    %c0_313 = arith.constant 0 : index
    %594 = vector.load %arg12[%c0_312, %c0_313] : memref<8x128xf32, #tpu.memory_space<vmem>>, vector<8x128xf32>
    %595 = arith.truncf %594 : vector<8x128xf32> to vector<8x128xbf16>
    %c1_314 = arith.constant 1 : index
    %c0_315 = arith.constant 0 : index
    %c0_316 = arith.constant 0 : index
    %596 = vector.load %arg5[%c1_314, %c0_315, %c0_316] : memref<2x128x512xbf16, #tpu.memory_space<vmem>>, vector<1x128x512xbf16>
    %597 = vector.shape_cast %596 : vector<1x128x512xbf16> to vector<128x512xbf16>
    %cst_317 = arith.constant dense<0.000000e+00> : vector<8x512xf32>
    %598 = tpu.matmul %595, %597, %cst_317 {dimension_numbers = #tpu.dot_dimension_numbers<[1], [0], [0], [1], [0, 0, 1, 1], [], []>} : vector<8x128xbf16>, vector<128x512xbf16>, vector<8x512xf32> -> vector<8x512xf32>
    %599 = arith.addf %593, %598 : vector<8x512xf32>
    %600 = vector.extract_strided_slice %599 {offsets = [0, 0], sizes = [8, 128], strides = [1, 1]} : vector<8x512xf32> to vector<8x128xf32>
    %601 = arith.negf %600 : vector<8x128xf32>
    %602 = math.exp %601 : vector<8x128xf32>
    %cst_318 = arith.constant 1.000000e+00 : f32
    %603 = vector.broadcast %cst_318 : f32 to vector<8x128xf32>
    %604 = arith.addf %603, %602 : vector<8x128xf32>
    %605 = arith.divf %603, %604 : vector<8x128xf32>
    %606 = vector.extract_strided_slice %599 {offsets = [0, 128], sizes = [8, 128], strides = [1, 1]} : vector<8x512xf32> to vector<8x128xf32>
    %607 = arith.negf %606 : vector<8x128xf32>
    %608 = math.exp %607 : vector<8x128xf32>
    %cst_319 = arith.constant 1.000000e+00 : f32
    %609 = vector.broadcast %cst_319 : f32 to vector<8x128xf32>
    %610 = arith.addf %609, %608 : vector<8x128xf32>
    %611 = arith.divf %609, %610 : vector<8x128xf32>
    %612 = vector.extract_strided_slice %599 {offsets = [0, 256], sizes = [8, 128], strides = [1, 1]} : vector<8x512xf32> to vector<8x128xf32>
    %613 = math.tanh %612 : vector<8x128xf32>
    %614 = vector.extract_strided_slice %599 {offsets = [0, 384], sizes = [8, 128], strides = [1, 1]} : vector<8x512xf32> to vector<8x128xf32>
    %615 = arith.negf %614 : vector<8x128xf32>
    %616 = math.exp %615 : vector<8x128xf32>
    %cst_320 = arith.constant 1.000000e+00 : f32
    %617 = vector.broadcast %cst_320 : f32 to vector<8x128xf32>
    %618 = arith.addf %617, %616 : vector<8x128xf32>
    %619 = arith.divf %617, %618 : vector<8x128xf32>
    %c0_321 = arith.constant 0 : index
    %c0_322 = arith.constant 0 : index
    %620 = vector.load %arg13[%c0_321, %c0_322] : memref<8x128xf32, #tpu.memory_space<vmem>>, vector<8x128xf32>
    %621 = arith.mulf %611, %620 : vector<8x128xf32>
    %622 = arith.mulf %605, %613 : vector<8x128xf32>
    %623 = arith.addf %621, %622 : vector<8x128xf32>
    %624 = math.tanh %623 : vector<8x128xf32>
    %625 = arith.mulf %619, %624 : vector<8x128xf32>
    %c0_323 = arith.constant 0 : index
    %c0_324 = arith.constant 0 : index
    %626 = vector.load %arg12[%c0_323, %c0_324] : memref<8x128xf32, #tpu.memory_space<vmem>>, vector<8x128xf32>
    tpu.vector_store %arg12[%c0_323, %c0_324], %625 {strides = array<i32>} : memref<8x128xf32, #tpu.memory_space<vmem>>, vector<8x128xf32>,
    %c0_325 = arith.constant 0 : index
    %c0_326 = arith.constant 0 : index
    %627 = vector.load %arg13[%c0_325, %c0_326] : memref<8x128xf32, #tpu.memory_space<vmem>>, vector<8x128xf32>
    tpu.vector_store %arg13[%c0_325, %c0_326], %623 {strides = array<i32>} : memref<8x128xf32, #tpu.memory_space<vmem>>, vector<8x128xf32>,
    %628 = arith.index_cast %c5_i32_309 : i32 to index
    %c0_327 = arith.constant 0 : index
    %c0_328 = arith.constant 0 : index
    %629 = vector.load %arg7[%628, %c0_327, %c0_328] : memref<8x8x128xf32, #tpu.memory_space<vmem>>, vector<1x8x128xf32>
    %630 = vector.shape_cast %629 : vector<1x8x128xf32> to vector<8x128xf32>
    %631 = vector.shape_cast %625 : vector<8x128xf32> to vector<1x8x128xf32>
    tpu.vector_store %arg7[%628, %c0_327, %c0_328], %631 {strides = array<i32>} : memref<8x8x128xf32, #tpu.memory_space<vmem>>, vector<1x8x128xf32>,
    %c6_i32_329 = arith.constant 6 : i32
    %c8_i32_330 = arith.constant 8 : i32
    %632 = arith.muli %c6_i32_329, %c8_i32_330 : i32
    %633 = tpu.assume_multiple %632, 8 : i32
    %634 = arith.index_cast %633 : i32 to index
    %c0_331 = arith.constant 0 : index
    %635 = vector.load %arg11[%634, %c0_331] : memref<64x512xf32, #tpu.memory_space<vmem>>, vector<8x512xf32>
    %c0_332 = arith.constant 0 : index
    %c0_333 = arith.constant 0 : index
    %636 = vector.load %arg12[%c0_332, %c0_333] : memref<8x128xf32, #tpu.memory_space<vmem>>, vector<8x128xf32>
    %637 = arith.truncf %636 : vector<8x128xf32> to vector<8x128xbf16>
    %c1_334 = arith.constant 1 : index
    %c0_335 = arith.constant 0 : index
    %c0_336 = arith.constant 0 : index
    %638 = vector.load %arg5[%c1_334, %c0_335, %c0_336] : memref<2x128x512xbf16, #tpu.memory_space<vmem>>, vector<1x128x512xbf16>
    %639 = vector.shape_cast %638 : vector<1x128x512xbf16> to vector<128x512xbf16>
    %cst_337 = arith.constant dense<0.000000e+00> : vector<8x512xf32>
    %640 = tpu.matmul %637, %639, %cst_337 {dimension_numbers = #tpu.dot_dimension_numbers<[1], [0], [0], [1], [0, 0, 1, 1], [], []>} : vector<8x128xbf16>, vector<128x512xbf16>, vector<8x512xf32> -> vector<8x512xf32>
    %641 = arith.addf %635, %640 : vector<8x512xf32>
    %642 = vector.extract_strided_slice %641 {offsets = [0, 0], sizes = [8, 128], strides = [1, 1]} : vector<8x512xf32> to vector<8x128xf32>
    %643 = arith.negf %642 : vector<8x128xf32>
    %644 = math.exp %643 : vector<8x128xf32>
    %cst_338 = arith.constant 1.000000e+00 : f32
    %645 = vector.broadcast %cst_338 : f32 to vector<8x128xf32>
    %646 = arith.addf %645, %644 : vector<8x128xf32>
    %647 = arith.divf %645, %646 : vector<8x128xf32>
    %648 = vector.extract_strided_slice %641 {offsets = [0, 128], sizes = [8, 128], strides = [1, 1]} : vector<8x512xf32> to vector<8x128xf32>
    %649 = arith.negf %648 : vector<8x128xf32>
    %650 = math.exp %649 : vector<8x128xf32>
    %cst_339 = arith.constant 1.000000e+00 : f32
    %651 = vector.broadcast %cst_339 : f32 to vector<8x128xf32>
    %652 = arith.addf %651, %650 : vector<8x128xf32>
    %653 = arith.divf %651, %652 : vector<8x128xf32>
    %654 = vector.extract_strided_slice %641 {offsets = [0, 256], sizes = [8, 128], strides = [1, 1]} : vector<8x512xf32> to vector<8x128xf32>
    %655 = math.tanh %654 : vector<8x128xf32>
    %656 = vector.extract_strided_slice %641 {offsets = [0, 384], sizes = [8, 128], strides = [1, 1]} : vector<8x512xf32> to vector<8x128xf32>
    %657 = arith.negf %656 : vector<8x128xf32>
    %658 = math.exp %657 : vector<8x128xf32>
    %cst_340 = arith.constant 1.000000e+00 : f32
    %659 = vector.broadcast %cst_340 : f32 to vector<8x128xf32>
    %660 = arith.addf %659, %658 : vector<8x128xf32>
    %661 = arith.divf %659, %660 : vector<8x128xf32>
    %c0_341 = arith.constant 0 : index
    %c0_342 = arith.constant 0 : index
    %662 = vector.load %arg13[%c0_341, %c0_342] : memref<8x128xf32, #tpu.memory_space<vmem>>, vector<8x128xf32>
    %663 = arith.mulf %653, %662 : vector<8x128xf32>
    %664 = arith.mulf %647, %655 : vector<8x128xf32>
    %665 = arith.addf %663, %664 : vector<8x128xf32>
    %666 = math.tanh %665 : vector<8x128xf32>
    %667 = arith.mulf %661, %666 : vector<8x128xf32>
    %c0_343 = arith.constant 0 : index
    %c0_344 = arith.constant 0 : index
    %668 = vector.load %arg12[%c0_343, %c0_344] : memref<8x128xf32, #tpu.memory_space<vmem>>, vector<8x128xf32>
    tpu.vector_store %arg12[%c0_343, %c0_344], %667 {strides = array<i32>} : memref<8x128xf32, #tpu.memory_space<vmem>>, vector<8x128xf32>,
    %c0_345 = arith.constant 0 : index
    %c0_346 = arith.constant 0 : index
    %669 = vector.load %arg13[%c0_345, %c0_346] : memref<8x128xf32, #tpu.memory_space<vmem>>, vector<8x128xf32>
    tpu.vector_store %arg13[%c0_345, %c0_346], %665 {strides = array<i32>} : memref<8x128xf32, #tpu.memory_space<vmem>>, vector<8x128xf32>,
    %670 = arith.index_cast %c6_i32_329 : i32 to index
    %c0_347 = arith.constant 0 : index
    %c0_348 = arith.constant 0 : index
    %671 = vector.load %arg7[%670, %c0_347, %c0_348] : memref<8x8x128xf32, #tpu.memory_space<vmem>>, vector<1x8x128xf32>
    %672 = vector.shape_cast %671 : vector<1x8x128xf32> to vector<8x128xf32>
    %673 = vector.shape_cast %667 : vector<8x128xf32> to vector<1x8x128xf32>
    tpu.vector_store %arg7[%670, %c0_347, %c0_348], %673 {strides = array<i32>} : memref<8x8x128xf32, #tpu.memory_space<vmem>>, vector<1x8x128xf32>,
    %c7_i32_349 = arith.constant 7 : i32
    %c8_i32_350 = arith.constant 8 : i32
    %674 = arith.muli %c7_i32_349, %c8_i32_350 : i32
    %675 = tpu.assume_multiple %674, 8 : i32
    %676 = arith.index_cast %675 : i32 to index
    %c0_351 = arith.constant 0 : index
    %677 = vector.load %arg11[%676, %c0_351] : memref<64x512xf32, #tpu.memory_space<vmem>>, vector<8x512xf32>
    %c0_352 = arith.constant 0 : index
    %c0_353 = arith.constant 0 : index
    %678 = vector.load %arg12[%c0_352, %c0_353] : memref<8x128xf32, #tpu.memory_space<vmem>>, vector<8x128xf32>
    %679 = arith.truncf %678 : vector<8x128xf32> to vector<8x128xbf16>
    %c1_354 = arith.constant 1 : index
    %c0_355 = arith.constant 0 : index
    %c0_356 = arith.constant 0 : index
    %680 = vector.load %arg5[%c1_354, %c0_355, %c0_356] : memref<2x128x512xbf16, #tpu.memory_space<vmem>>, vector<1x128x512xbf16>
    %681 = vector.shape_cast %680 : vector<1x128x512xbf16> to vector<128x512xbf16>
    %cst_357 = arith.constant dense<0.000000e+00> : vector<8x512xf32>
    %682 = tpu.matmul %679, %681, %cst_357 {dimension_numbers = #tpu.dot_dimension_numbers<[1], [0], [0], [1], [0, 0, 1, 1], [], []>} : vector<8x128xbf16>, vector<128x512xbf16>, vector<8x512xf32> -> vector<8x512xf32>
    %683 = arith.addf %677, %682 : vector<8x512xf32>
    %684 = vector.extract_strided_slice %683 {offsets = [0, 0], sizes = [8, 128], strides = [1, 1]} : vector<8x512xf32> to vector<8x128xf32>
    %685 = arith.negf %684 : vector<8x128xf32>
    %686 = math.exp %685 : vector<8x128xf32>
    %cst_358 = arith.constant 1.000000e+00 : f32
    %687 = vector.broadcast %cst_358 : f32 to vector<8x128xf32>
    %688 = arith.addf %687, %686 : vector<8x128xf32>
    %689 = arith.divf %687, %688 : vector<8x128xf32>
    %690 = vector.extract_strided_slice %683 {offsets = [0, 128], sizes = [8, 128], strides = [1, 1]} : vector<8x512xf32> to vector<8x128xf32>
    %691 = arith.negf %690 : vector<8x128xf32>
    %692 = math.exp %691 : vector<8x128xf32>
    %cst_359 = arith.constant 1.000000e+00 : f32
    %693 = vector.broadcast %cst_359 : f32 to vector<8x128xf32>
    %694 = arith.addf %693, %692 : vector<8x128xf32>
    %695 = arith.divf %693, %694 : vector<8x128xf32>
    %696 = vector.extract_strided_slice %683 {offsets = [0, 256], sizes = [8, 128], strides = [1, 1]} : vector<8x512xf32> to vector<8x128xf32>
    %697 = math.tanh %696 : vector<8x128xf32>
    %698 = vector.extract_strided_slice %683 {offsets = [0, 384], sizes = [8, 128], strides = [1, 1]} : vector<8x512xf32> to vector<8x128xf32>
    %699 = arith.negf %698 : vector<8x128xf32>
    %700 = math.exp %699 : vector<8x128xf32>
    %cst_360 = arith.constant 1.000000e+00 : f32
    %701 = vector.broadcast %cst_360 : f32 to vector<8x128xf32>
    %702 = arith.addf %701, %700 : vector<8x128xf32>
    %703 = arith.divf %701, %702 : vector<8x128xf32>
    %c0_361 = arith.constant 0 : index
    %c0_362 = arith.constant 0 : index
    %704 = vector.load %arg13[%c0_361, %c0_362] : memref<8x128xf32, #tpu.memory_space<vmem>>, vector<8x128xf32>
    %705 = arith.mulf %695, %704 : vector<8x128xf32>
    %706 = arith.mulf %689, %697 : vector<8x128xf32>
    %707 = arith.addf %705, %706 : vector<8x128xf32>
    %708 = math.tanh %707 : vector<8x128xf32>
    %709 = arith.mulf %703, %708 : vector<8x128xf32>
    %c0_363 = arith.constant 0 : index
    %c0_364 = arith.constant 0 : index
    %710 = vector.load %arg12[%c0_363, %c0_364] : memref<8x128xf32, #tpu.memory_space<vmem>>, vector<8x128xf32>
    tpu.vector_store %arg12[%c0_363, %c0_364], %709 {strides = array<i32>} : memref<8x128xf32, #tpu.memory_space<vmem>>, vector<8x128xf32>,
    %c0_365 = arith.constant 0 : index
    %c0_366 = arith.constant 0 : index
    %711 = vector.load %arg13[%c0_365, %c0_366] : memref<8x128xf32, #tpu.memory_space<vmem>>, vector<8x128xf32>
    tpu.vector_store %arg13[%c0_365, %c0_366], %707 {strides = array<i32>} : memref<8x128xf32, #tpu.memory_space<vmem>>, vector<8x128xf32>,
    %712 = arith.index_cast %c7_i32_349 : i32 to index
    %c0_367 = arith.constant 0 : index
    %c0_368 = arith.constant 0 : index
    %713 = vector.load %arg7[%712, %c0_367, %c0_368] : memref<8x8x128xf32, #tpu.memory_space<vmem>>, vector<1x8x128xf32>
    %714 = vector.shape_cast %713 : vector<1x8x128xf32> to vector<8x128xf32>
    %715 = vector.shape_cast %709 : vector<8x128xf32> to vector<1x8x128xf32>
    tpu.vector_store %arg7[%712, %c0_367, %c0_368], %715 {strides = array<i32>} : memref<8x8x128xf32, #tpu.memory_space<vmem>>, vector<1x8x128xf32>,
    %c8_i32_369 = arith.constant 8 : i32
    %c0_370 = arith.constant 0 : index
    %c0_371 = arith.constant 0 : index
    %716 = vector.load %arg12[%c0_370, %c0_371] : memref<8x128xf32, #tpu.memory_space<vmem>>, vector<8x128xf32>
    %c1_372 = arith.constant 1 : index
    %c0_373 = arith.constant 0 : index
    %c0_374 = arith.constant 0 : index
    %717 = vector.load %arg8[%c1_372, %c0_373, %c0_374] : memref<2x8x128xf32, #tpu.memory_space<vmem>>, vector<1x8x128xf32>
    %718 = vector.shape_cast %717 : vector<1x8x128xf32> to vector<8x128xf32>
    %719 = vector.shape_cast %716 : vector<8x128xf32> to vector<1x8x128xf32>
    tpu.vector_store %arg8[%c1_372, %c0_373, %c0_374], %719 {strides = array<i32>} : memref<2x8x128xf32, #tpu.memory_space<vmem>>, vector<1x8x128xf32>,
    %c0_375 = arith.constant 0 : index
    %c0_376 = arith.constant 0 : index
    %720 = vector.load %arg13[%c0_375, %c0_376] : memref<8x128xf32, #tpu.memory_space<vmem>>, vector<8x128xf32>
    %c1_377 = arith.constant 1 : index
    %c0_378 = arith.constant 0 : index
    %c0_379 = arith.constant 0 : index
    %721 = vector.load %arg9[%c1_377, %c0_378, %c0_379] : memref<2x8x128xf32, #tpu.memory_space<vmem>>, vector<1x8x128xf32>
    %722 = vector.shape_cast %721 : vector<1x8x128xf32> to vector<8x128xf32>
    %723 = vector.shape_cast %720 : vector<8x128xf32> to vector<1x8x128xf32>
    tpu.vector_store %arg9[%c1_377, %c0_378, %c0_379], %723 {strides = array<i32>} : memref<2x8x128xf32, #tpu.memory_space<vmem>>, vector<1x8x128xf32>,
    return
  }
  func.func @transform_0(%arg0: i32) -> (i32, i32, i32) {
    %c0_i32 = arith.constant 0 : i32
    %c0_i32_0 = arith.constant 0 : i32
    %c0_i32_1 = arith.constant 0 : i32
    %c0_i32_2 = arith.constant 0 : i32
    return %c0_i32, %c0_i32_0, %c0_i32_1 : i32, i32, i32
  }
  func.func @transform_1(%arg0: i32) -> (i32, i32, i32) {
    %c0_i32 = arith.constant 0 : i32
    %c0_i32_0 = arith.constant 0 : i32
    %c0_i32_1 = arith.constant 0 : i32
    %c0_i32_2 = arith.constant 0 : i32
    return %c0_i32, %c0_i32_0, %c0_i32_1 : i32, i32, i32
  }
  func.func @transform_2(%arg0: i32) -> (i32, i32, i32) {
    %c0_i32 = arith.constant 0 : i32
    %c0_i32_0 = arith.constant 0 : i32
    %c0_i32_1 = arith.constant 0 : i32
    %c0_i32_2 = arith.constant 0 : i32
    return %c0_i32, %c0_i32_0, %c0_i32_1 : i32, i32, i32
  }
  func.func @transform_3(%arg0: i32) -> (i32, i32, i32) {
    %c0_i32 = arith.constant 0 : i32
    %c0_i32_0 = arith.constant 0 : i32
    %c0_i32_1 = arith.constant 0 : i32
    %c0_i32_2 = arith.constant 0 : i32
    return %c0_i32, %c0_i32_0, %c0_i32_1 : i32, i32, i32
  }
  func.func @transform_4(%arg0: i32) -> (i32, i32, i32) {
    %c0_i32 = arith.constant 0 : i32
    %c0_i32_0 = arith.constant 0 : i32
    %c0_i32_1 = arith.constant 0 : i32
    %c0_i32_2 = arith.constant 0 : i32
    return %c0_i32, %c0_i32_0, %c0_i32_1 : i32, i32, i32
  }
  func.func @transform_5(%arg0: i32) -> (i32, i32, i32) {
    %c0_i32 = arith.constant 0 : i32
    %c0_i32_0 = arith.constant 0 : i32
    %c0_i32_1 = arith.constant 0 : i32
    %c0_i32_2 = arith.constant 0 : i32
    return %c0_i32, %c0_i32_0, %c0_i32_1 : i32, i32, i32
  }
  func.func @transform_6(%arg0: i32) -> (i32, i32, i32) {
    %c0_i32 = arith.constant 0 : i32
    %c0_i32_0 = arith.constant 0 : i32
    %c0_i32_1 = arith.constant 0 : i32
    %c0_i32_2 = arith.constant 0 : i32
    return %c0_i32, %c0_i32_0, %c0_i32_1 : i32, i32, i32
  }
  func.func @transform_7(%arg0: i32) -> (i32, i32, i32) {
    %c0_i32 = arith.constant 0 : i32
    %c0_i32_0 = arith.constant 0 : i32
    %c0_i32_1 = arith.constant 0 : i32
    %c0_i32_2 = arith.constant 0 : i32
    return %c0_i32, %c0_i32_0, %c0_i32_1 : i32, i32, i32
  }
  func.func @transform_8(%arg0: i32) -> (i32, i32, i32) {
    %c0_i32 = arith.constant 0 : i32
    %c0_i32_0 = arith.constant 0 : i32
    %c0_i32_1 = arith.constant 0 : i32
    %c0_i32_2 = arith.constant 0 : i32
    return %c0_i32, %c0_i32_0, %c0_i32_1 : i32, i32, i32
  }
}

</mosaic_0001>

<bundles_post_ra>
// kernel: rnnlm_forward.3
= control target key start
LH: loop header
LB: loop body
LE: loop exit
PB: predicated region body
PF: predicated region fallthrough
CT: control target
= control target key end

     0   :  { %v325_v2 = vmov 0   ;;  %s436_s0 = inlined_call_operand.vmem [shape: f32[64,128], index: 0, kind: input, shape index: {}]   ;;  %s437_s1 = inlined_call_operand.vmem [shape: bf16[128,256], index: 1, kind: input, shape index: {}]   ;;  %s438_s2 = inlined_call_operand.vmem [shape: f32[1,256], index: 2, kind: input, shape index: {}]   ;;  %s439_s3 = inlined_call_operand.hbm [shape: f32[64,256], index: 3, kind: output, shape index: {}]  }
   0x1   :  { %v277_v0 = vld [vmem:[%s437_s1 + $0x4] ss:$8 sps:$4 sm:$0xff]   ;;  %v279_v1 = vld [vmem:[%s437_s1] ss:$8 sps:$4 sm:$0xff]   ;;  %168 = vmatprep.mubr.bf16.mxu0 %v325_v2  ;;  %188 = vmatprep.mubr.bf16.mxu1 %v325_v2  ;;  %v280_v3 = vld [vmem:[%s437_s1 + $0x14] ss:$8 sps:$4 sm:$0xff]  }
   0x2   :  { %136 = vmatprep.subr.bf16.mxu0 %v277_v0  ;;  %257 = vmatprep.subr.bf16.mxu1 %v277_v0  ;;  %v282_v4 = vld [vmem:[%s437_s1 + $0x10] ss:$8 sps:$4 sm:$0xff]   ;;  %v283_v5 = vld [vmem:[%s437_s1 + $0x24] ss:$8 sps:$4 sm:$0xff]   ;;  %v285_v6 = vld [vmem:[%s437_s1 + $0x20] ss:$8 sps:$4 sm:$0xff]  }
   0x3   :  { %137 = vmatpush1.bf16.msra.mxu0 %v279_v1  ;;  %265 = vmatpush1.bf16.msra.mxu1 %v279_v1  ;;  %v286_v7 = vld [vmem:[%s437_s1 + $0x34] ss:$8 sps:$4 sm:$0xff]   ;;  %v288_v8 = vld [vmem:[%s437_s1 + $0x30] ss:$8 sps:$4 sm:$0xff]   ;;  %v289_v9 = vld [vmem:[%s437_s1 + $0x44] ss:$8 sps:$4 sm:$0xff]  }
   0x4   :  { %138 = vmatprep.subr.bf16.mxu0 %v280_v3  ;;  %258 = vmatprep.subr.bf16.mxu1 %v280_v3 }
   0x7   :  { %139 = vmatpush1.bf16.msra.mxu0 %v282_v4  ;;  %266 = vmatpush1.bf16.msra.mxu1 %v282_v4 }
   0x8   :  { %140 = vmatprep.subr.bf16.mxu0 %v283_v5  ;;  %259 = vmatprep.subr.bf16.mxu1 %v283_v5 }
   0xb   :  { %141 = vmatpush1.bf16.msra.mxu0 %v285_v6  ;;  %267 = vmatpush1.bf16.msra.mxu1 %v285_v6 }
   0xc   :  { %142 = vmatprep.subr.bf16.mxu0 %v286_v7  ;;  %260 = vmatprep.subr.bf16.mxu1 %v286_v7 }
   0xd   :  { %8 = vsyncpa [#allocation3], 0  ;;  %v291_v10 = vld [vmem:[%s437_s1 + $0x40] ss:$8 sps:$4 sm:$0xff]   ;;  %v292_v11 = vld [vmem:[%s437_s1 + $0x54] ss:$8 sps:$4 sm:$0xff]   ;;  %v46_v29 = vlaneseq }
   0xe   :  { %v294_v12 = vld [vmem:[%s437_s1 + $0x50] ss:$8 sps:$4 sm:$0xff]   ;;  %v295_v13 = vld [vmem:[%s437_s1 + $0x64] ss:$8 sps:$4 sm:$0xff]   ;;  %v297_v14 = vld [vmem:[%s437_s1 + $0x60] ss:$8 sps:$4 sm:$0xff]  }
   0xf   :  { %143 = vmatpush1.bf16.msra.mxu0 %v288_v8  ;;  %268 = vmatpush1.bf16.msra.mxu1 %v288_v8  ;;  %v298_v15 = vld [vmem:[%s437_s1 + $0x74] ss:$8 sps:$4 sm:$0xff]   ;;  %v300_v16 = vld [vmem:[%s437_s1 + $0x70] ss:$8 sps:$4 sm:$0xff]   ;;  %v16_v17 = vld [vmem:[%s436_s0] sm:$0xff]  ;;  %v47_v30 = vshrl.u32 %v46_v29, 7 }
  0x10   :  { %144 = vmatprep.subr.bf16.mxu0 %v289_v9  ;;  %261 = vmatprep.subr.bf16.mxu1 %v289_v9  ;;  %v17_v18 = vld [vmem:[%s436_s0 + $0x8] sm:$0xff]  ;;  %v20_v19 = vld [vmem:[%s436_s0 + $0x20] sm:$0xff]  ;;  %v18_v23 = vld [vmem:[%s436_s0 + $0x10] sm:$0xff] }
  0x11   :  { %v21_v20 = vld [vmem:[%s436_s0 + $0x28] sm:$0xff]  ;;  %v24_v21 = vpack.c.bf16 %v17_v18, %v16_v17  ;;  %v19_v24 = vld [vmem:[%s436_s0 + $0x18] sm:$0xff]  ;;  %v22_v25 = vld [vmem:[%s436_s0 + $0x30] sm:$0xff]  ;;  %v48_v31 = vsub.s32 0, %v47_v30  ;;  %v52_v33 = vsub.s32 1, %v47_v30 }
  0x12   :  { %v26_v22 = vpack.c.bf16 %v21_v20, %v20_v19  ;;  %v23_v26 = vld [vmem:[%s436_s0 + $0x38] sm:$0xff]  ;;  %v25_v27 = vpack.c.bf16 %v19_v24, %v18_v23  ;;  %v44_v32 = vld [vmem:[%s438_s2] sm:$0x3]  ;;  %s326_s0 = smov [#allocation2]  }
  0x13   :  { %145 = vmatpush1.bf16.msra.mxu0 %v291_v10  ;;  %269 = vmatpush1.bf16.msra.mxu1 %v291_v10  ;;  %v27_v28 = vpack.c.bf16 %v23_v26, %v22_v25  ;;  %v49_v34 = vrot.slane %v44_v32, %v48_v31  ;;  %v53_v35 = vrot.slane %v44_v32, %v52_v33  ;;  %s230_s2 = sshll.u32 %s326_s0, 4  ;;  %s231_s2 = int_to_ptr.vmem [resolvable:$true] %s230_s2 }
  0x14   :  { %146 = vmatprep.subr.bf16.mxu0 %v292_v11  ;;  %262 = vmatprep.subr.bf16.mxu1 %v292_v11  ;;  %s301_s7 = scalar_lea.vmem %s231_s2, 2048  ;;  %p306_p1 = scmp.lt.s32.totalorder %s231_s2, %s231_s2 }
  0x15   :  { %p302_p0 = scmp.ne.s32.totalorder %s231_s2, %s301_s7  ;;  %p307_p2 = scmp.lt.s32.totalorder %s301_s7, %s301_s7 }
  0x17   :  { %147 = vmatpush1.bf16.msra.mxu0 %v294_v12  ;;  %270 = vmatpush1.bf16.msra.mxu1 %v294_v12  ;;  %p308_p3 = por %p307_p2, %p306_p1 }
  0x18   :  { %148 = vmatprep.subr.bf16.mxu0 %v295_v13  ;;  %263 = vmatprep.subr.bf16.mxu1 %v295_v13 }
  0x19   :  { %p309_p4 = pnand %p308_p3, %p302_p0 }
  0x1b   :  { %149 = vmatpush1.bf16.msra.mxu0 %v297_v14  ;;  %271 = vmatpush1.bf16.msra.mxu1 %v297_v14 }
  0x1c   :  { %150 = vmatprep.subr.bf16.mxu0 %v298_v15  ;;  %264 = vmatprep.subr.bf16.mxu1 %v298_v15 }
  0x1f   :  { %151 = vmatpush1.bf16.msra.mxu0 %v300_v16  ;;  %272 = vmatpush1.bf16.msra.mxu1 %v300_v16 }
  0x22   :  { %169 = vmatmul.mubr.bf16.vlgmr.msra.gmra.mrb[0].mxu0 %v24_v21  ;;  %189 = vmatmul.mubr.bf16.vlgmr.msra.gmra.mrb[0].mxu1 %v26_v22 }
  0x23   :  { %178 = vmatprep.mubr.bf16.mxu0 %v325_v2  ;;  %198 = vmatprep.mubr.bf16.mxu1 %v325_v2 }
  0x2a   :  { %179 = vmatmul.mubr.bf16.gmra.mrb[4].mxu0 %v25_v27  ;;  %199 = vmatmul.mubr.bf16.gmra.mrb[4].mxu1 %v27_v28 }
  0xf5   :  { %v170_v36 = vpop.f32.mrb[0].mxu0  ;;  %v190_v37 = vpop.f32.mrb[0].mxu1 }
  0xf6   :  { %v171_v38 = vadd.f32 %v170_v36, %v49_v34  ;;  %v191_v39 = vadd.f32 %v190_v37, %v49_v34  ;;  %v172_v40 = vpop.f32.mrb[1].mxu0  ;;  %v192_v41 = vpop.f32.mrb[1].mxu1 }
  0xf7   :  { %v173_v42 = vadd.f32 %v172_v40, %v53_v35  ;;  %v193_v43 = vadd.f32 %v192_v41, %v53_v35  ;;  %v174_v44 = vpop.f32.mrb[2].mxu0  ;;  %v194_v45 = vpop.f32.mrb[2].mxu1 }
  0xf8   :  { %209 = vst [vmem:[#allocation2] sm:$0xff] %v171_v38  ;;  %217 = vst [vmem:[#allocation2 + $0x40] sm:$0xff] %v191_v39  ;;  %v175_v46 = vadd.f32 %v174_v44, %v49_v34  ;;  %v195_v47 = vadd.f32 %v194_v45, %v49_v34  ;;  %v176_v48 = vpop.f32.mrb[3].mxu0  ;;  %v196_v49 = vpop.f32.mrb[3].mxu1 }
  0xf9   :  { %210 = vst [vmem:[#allocation2 + $0x8] sm:$0xff] %v173_v42  ;;  %218 = vst [vmem:[#allocation2 + $0x48] sm:$0xff] %v193_v43  ;;  %v177_v50 = vadd.f32 %v176_v48, %v53_v35  ;;  %v197_v51 = vadd.f32 %v196_v49, %v53_v35 }
  0xfa   :  { %211 = vst [vmem:[#allocation2 + $0x10] sm:$0xff] %v175_v46  ;;  %219 = vst [vmem:[#allocation2 + $0x50] sm:$0xff] %v195_v47 }
  0xfb   :  { %212 = vst [vmem:[#allocation2 + $0x18] sm:$0xff] %v177_v50  ;;  %220 = vst [vmem:[#allocation2 + $0x58] sm:$0xff] %v197_v51 }
  0xfd   :  { %v180_v52 = vpop.f32.mrb[4].mxu0  ;;  %v200_v53 = vpop.f32.mrb[4].mxu1 }
  0xfe   :  { %v181_v54 = vadd.f32 %v180_v52, %v49_v34  ;;  %v201_v55 = vadd.f32 %v200_v53, %v49_v34  ;;  %v182_v56 = vpop.f32.mrb[5].mxu0  ;;  %v202_v57 = vpop.f32.mrb[5].mxu1 }
  0xff   :  { %v183_v58 = vadd.f32 %v182_v56, %v53_v35  ;;  %v203_v59 = vadd.f32 %v202_v57, %v53_v35  ;;  %v184_v60 = vpop.f32.mrb[6].mxu0  ;;  %v204_v61 = vpop.f32.mrb[6].mxu1 }
 0x100   :  { %213 = vst [vmem:[#allocation2 + $0x20] sm:$0xff] %v181_v54  ;;  %221 = vst [vmem:[#allocation2 + $0x60] sm:$0xff] %v201_v55  ;;  %v185_v62 = vadd.f32 %v184_v60, %v49_v34  ;;  %v205_v63 = vadd.f32 %v204_v61, %v49_v34  ;;  %v186_v0 = vpop.f32.mrb[7].mxu0  ;;  %v206_v1 = vpop.f32.mrb[7].mxu1 }
 0x101   :  { %214 = vst [vmem:[#allocation2 + $0x28] sm:$0xff] %v183_v58  ;;  %222 = vst [vmem:[#allocation2 + $0x68] sm:$0xff] %v203_v59  ;;  %v187_v2 = vadd.f32 %v186_v0, %v53_v35  ;;  %v207_v3 = vadd.f32 %v206_v1, %v53_v35 }
 0x102   :  { %215 = vst [vmem:[#allocation2 + $0x30] sm:$0xff] %v185_v62  ;;  %223 = vst [vmem:[#allocation2 + $0x70] sm:$0xff] %v205_v63 }
 0x103   :  { %216 = vst [vmem:[#allocation2 + $0x38] sm:$0xff] %v187_v2  ;;  %224 = vst [vmem:[#allocation2 + $0x78] sm:$0xff] %v207_v3 }
 0x104   :  { %312 = shalt.err (!%p309_p4)
}
 0x105   :  { %s313_s10 = scalar_lea.hbm %s439_s3, 2048 }
 0x106   :  { %p314_p5 = scmp.ne.s32.totalorder %s439_s3, %s313_s10  ;;  %p317_p6 = scmp.lt.u32.totalorder %s313_s10, %s439_s3 }
 0x108   :  { %p319_p7 = pnand %p317_p6, %p314_p5 }
 0x10a   :  { %322 = shalt.err (!%p319_p7)
}
 0x10b   :  { %s327_s15 = smov 256   ;;  %s328_s16 = smov 16  }
 0x10c   :  { %236 = dma.vmem_to_hbm [thread:$0]  %s231_s2, 2048, %s439_s3, [#allocation3], %s327_s15, %s327_s15, %s328_s16  }
 0x10d   :  { %323 = dma.done.wait [#allocation3], 2048  }
 0x10e   :  { %324 = vsyncadd [#allocation3], 4294965248 }
 0x10f   :  { %240 = vsyncpa [#allocation3], 1 }

// kernel: rnnlm_forward.2
= control target key start
LH: loop header
LB: loop body
LE: loop exit
PB: predicated region body
PF: predicated region fallthrough
CT: control target
= control target key end

     0   :  { %14 = vsyncpa [#allocation7], 0  ;;  %s8772_s0 = inlined_call_operand.vmem [shape: f32[8,8,128], index: 0, kind: input, shape index: {}]   ;;  %s8773_s1 = inlined_call_operand.vmem [shape: f32[2,8,128], index: 1, kind: input, shape index: {}]   ;;  %s8774_s2 = inlined_call_operand.vmem [shape: f32[2,8,128], index: 2, kind: input, shape index: {}]   ;;  %s8775_s3 = inlined_call_operand.vmem [shape: bf16[2,128,512], index: 3, kind: input, shape index: {}]   ;;  %s8776_s4 = inlined_call_operand.hbm [shape: bf16[2,128,512], index: 4, kind: input, shape index: {}]   ;;  %s8777_s5 = inlined_call_operand.vmem [shape: f32[2,1,512], index: 5, kind: input, shape index: {}]   ;;  %s8778_s6 = inlined_call_operand.vmem [shape: f32[8,8,128], index: 6, kind: output, shape index: {0}]   ;;  %s8779_s7 = inlined_call_operand.hbm [shape: f32[2,8,128], index: 7, kind: output, shape index: {1}]   ;;  %s8780_s8 = inlined_call_operand.hbm [shape: f32[2,8,128], index: 8, kind: output, shape index: {2}]  }
   0x1   :  { %15 = vsyncpa [#allocation8], 0 }
   0x2   :  { %16 = vsyncpa [#allocation11], 0  ;;  %s7254_s27 = smov [#allocation6]   ;;  %s7182_s9 = scalar_lea.hbm %s8776_s4, 8192 }
   0x3   :  { %s30_s28 = sshll.u32 %s7254_s27, 4  ;;  %p7183_p0 = scmp.ne.s32.totalorder %s8776_s4, %s7182_s9  ;;  %s31_s28 = int_to_ptr.vmem [resolvable:$true] %s30_s28 }
   0x4   :  { %p7186_p1 = scmp.lt.u32.totalorder %s7182_s9, %s8776_s4 }
   0x6   :  { %p7188_p2 = pnand %p7186_p1, %p7183_p0 }
   0x8   :  { %7191 = shalt.err (!%p7188_p2)
}
   0x9   :  { %s7192_s14 = scalar_lea.vmem %s31_s28, 8192  ;;  %p7197_p4 = scmp.lt.s32.totalorder %s31_s28, %s31_s28 }
   0xa   :  { %p7193_p3 = scmp.ne.s32.totalorder %s31_s28, %s7192_s14  ;;  %p7198_p5 = scmp.lt.s32.totalorder %s7192_s14, %s7192_s14 }
   0xc   :  { %p7199_p6 = por %p7198_p5, %p7197_p4 }
   0xe   :  { %p7200_p7 = pnand %p7199_p6, %p7193_p3 }
  0x10   :  { %7203 = shalt.err (!%p7200_p7)
}
  0x11   :  { %s7255_s15 = smov 256   ;;  %s7256_s16 = smov 16  }
  0x12   :  { %36 = dma.hbm_to_vmem [thread:$0]  %s8776_s4, 8192, %s31_s28, [#allocation7], %s7255_s15, %s7255_s15, %s7256_s16  }
  0x13   :  { %7248 = dma.done.wait [#allocation7], 8192  }
  0x14   :  { %7249 = vsyncadd [#allocation7], 4294959104  ;;  %v8785_v0 = vmov 0   ;;  %v6638_v1 = vld [vmem:[%s8775_s3 + $0x4] ss:$16 sps:$4 sm:$0xff]   ;;  %v44_v34 = vld [vmem:[%s8772_s0 + $0x8] sm:$0xff] }
  0x15   :  { %317 = vmatprep.mubr.bf16.mxu0 %v8785_v0  ;;  %390 = vmatprep.mubr.bf16.mxu1 %v8785_v0  ;;  %v6640_v2 = vld [vmem:[%s8775_s3 + $0xc] ss:$16 sps:$4 sm:$0xff]   ;;  %v6642_v3 = vld [vmem:[%s8775_s3] ss:$16 sps:$4 sm:$0xff]   ;;  %v6643_v4 = vld [vmem:[%s8775_s3 + $0x8] ss:$16 sps:$4 sm:$0xff]  }
  0x16   :  { %285 = vmatprep.subr.bf16.mxu0 %v6638_v1  ;;  %358 = vmatprep.subr.bf16.mxu1 %v6640_v2  ;;  %v6644_v5 = vld [vmem:[%s8775_s3 + $0x24] ss:$16 sps:$4 sm:$0xff]   ;;  %v6646_v6 = vld [vmem:[%s8775_s3 + $0x2c] ss:$16 sps:$4 sm:$0xff]   ;;  %v6648_v7 = vld [vmem:[%s8775_s3 + $0x20] ss:$16 sps:$4 sm:$0xff]  }
  0x17   :  { %286 = vmatpush1.bf16.msra.mxu0 %v6642_v3  ;;  %359 = vmatpush1.bf16.msra.mxu1 %v6643_v4  ;;  %v6649_v8 = vld [vmem:[%s8775_s3 + $0x28] ss:$16 sps:$4 sm:$0xff]   ;;  %v6650_v9 = vld [vmem:[%s8775_s3 + $0x44] ss:$16 sps:$4 sm:$0xff]   ;;  %v6652_v10 = vld [vmem:[%s8775_s3 + $0x4c] ss:$16 sps:$4 sm:$0xff]  }
  0x18   :  { %287 = vmatprep.subr.bf16.mxu0 %v6644_v5  ;;  %360 = vmatprep.subr.bf16.mxu1 %v6646_v6  ;;  %v6654_v11 = vld [vmem:[%s8775_s3 + $0x40] ss:$16 sps:$4 sm:$0xff]   ;;  %v6655_v12 = vld [vmem:[%s8775_s3 + $0x48] ss:$16 sps:$4 sm:$0xff]   ;;  %v6656_v13 = vld [vmem:[%s8775_s3 + $0x64] ss:$16 sps:$4 sm:$0xff]  }
  0x19   :  { %v6658_v14 = vld [vmem:[%s8775_s3 + $0x6c] ss:$16 sps:$4 sm:$0xff]   ;;  %v6660_v15 = vld [vmem:[%s8775_s3 + $0x60] ss:$16 sps:$4 sm:$0xff]   ;;  %v6661_v16 = vld [vmem:[%s8775_s3 + $0x68] ss:$16 sps:$4 sm:$0xff]  }
  0x1a   :  { %v6662_v17 = vld [vmem:[%s8775_s3 + $0x84] ss:$16 sps:$4 sm:$0xff]   ;;  %v6664_v18 = vld [vmem:[%s8775_s3 + $0x8c] ss:$16 sps:$4 sm:$0xff]   ;;  %v6666_v19 = vld [vmem:[%s8775_s3 + $0x80] ss:$16 sps:$4 sm:$0xff]  }
  0x1b   :  { %288 = vmatpush1.bf16.msra.mxu0 %v6648_v7  ;;  %361 = vmatpush1.bf16.msra.mxu1 %v6649_v8  ;;  %v6667_v20 = vld [vmem:[%s8775_s3 + $0x88] ss:$16 sps:$4 sm:$0xff]   ;;  %v6668_v21 = vld [vmem:[%s8775_s3 + $0xa4] ss:$16 sps:$4 sm:$0xff]   ;;  %v6670_v22 = vld [vmem:[%s8775_s3 + $0xac] ss:$16 sps:$4 sm:$0xff]  }
  0x1c   :  { %289 = vmatprep.subr.bf16.mxu0 %v6650_v9  ;;  %362 = vmatprep.subr.bf16.mxu1 %v6652_v10  ;;  %v6672_v23 = vld [vmem:[%s8775_s3 + $0xa0] ss:$16 sps:$4 sm:$0xff]   ;;  %v6673_v24 = vld [vmem:[%s8775_s3 + $0xa8] ss:$16 sps:$4 sm:$0xff]   ;;  %v6674_v25 = vld [vmem:[%s8775_s3 + $0xc4] ss:$16 sps:$4 sm:$0xff]  }
  0x1d   :  { %v6676_v26 = vld [vmem:[%s8775_s3 + $0xcc] ss:$16 sps:$4 sm:$0xff]   ;;  %v6678_v27 = vld [vmem:[%s8775_s3 + $0xc0] ss:$16 sps:$4 sm:$0xff]   ;;  %v6679_v28 = vld [vmem:[%s8775_s3 + $0xc8] ss:$16 sps:$4 sm:$0xff]  }
  0x1e   :  { %v6680_v29 = vld [vmem:[%s8775_s3 + $0xe4] ss:$16 sps:$4 sm:$0xff]   ;;  %v6682_v30 = vld [vmem:[%s8775_s3 + $0xec] ss:$16 sps:$4 sm:$0xff]   ;;  %v6684_v31 = vld [vmem:[%s8775_s3 + $0xe0] ss:$16 sps:$4 sm:$0xff]  }
  0x1f   :  { %290 = vmatpush1.bf16.msra.mxu0 %v6654_v11  ;;  %363 = vmatpush1.bf16.msra.mxu1 %v6655_v12  ;;  %v6685_v32 = vld [vmem:[%s8775_s3 + $0xe8] ss:$16 sps:$4 sm:$0xff]   ;;  %v43_v33 = vld [vmem:[%s8772_s0] sm:$0xff]  ;;  %v7425_v36 = vld [vmem:[#allocation6 + $0xc] ss:$16 sps:$4 sm:$0xff]   ;;  %s7258_s20 = smov [#allocation10]  }
  0x20   :  { %291 = vmatprep.subr.bf16.mxu0 %v6656_v13  ;;  %364 = vmatprep.subr.bf16.mxu1 %v6658_v14  ;;  %v7423_v35 = vld [vmem:[#allocation6 + $0x4] ss:$16 sps:$4 sm:$0xff]   ;;  %v67_v37 = vpack.c.bf16 %v44_v34, %v43_v33  ;;  %v7427_v38 = vld [vmem:[#allocation6] ss:$16 sps:$4 sm:$0xff]   ;;  %v7429_v39 = vld [vmem:[#allocation6 + $0x8] ss:$16 sps:$4 sm:$0xff]  }
  0x21   :  { %v7433_v40 = vld [vmem:[#allocation6 + $0x24] ss:$16 sps:$4 sm:$0xff]   ;;  %v7435_v41 = vld [vmem:[#allocation6 + $0x2c] ss:$16 sps:$4 sm:$0xff]   ;;  %v7437_v42 = vld [vmem:[#allocation6 + $0x20] ss:$16 sps:$4 sm:$0xff]  }
  0x22   :  { %v7439_v43 = vld [vmem:[#allocation6 + $0x28] ss:$16 sps:$4 sm:$0xff]   ;;  %v45_v44 = vld [vmem:[%s8772_s0 + $0x10] sm:$0xff]  ;;  %v7453_v47 = vld [vmem:[#allocation6 + $0x4c] ss:$16 sps:$4 sm:$0xff]   ;;  %s5939_s21 = sshll.u32 %s7258_s20, 4  ;;  %s5940_s21 = int_to_ptr.vmem [resolvable:$true] %s5939_s21 }
  0x23   :  { %292 = vmatpush1.bf16.msra.mxu0 %v6660_v15  ;;  %365 = vmatpush1.bf16.msra.mxu1 %v6661_v16  ;;  %v46_v45 = vld [vmem:[%s8772_s0 + $0x18] sm:$0xff]  ;;  %v7451_v46 = vld [vmem:[#allocation6 + $0x44] ss:$16 sps:$4 sm:$0xff]   ;;  %v7457_v49 = vld [vmem:[#allocation6 + $0x40] ss:$16 sps:$4 sm:$0xff]   ;;  %v105_v16 = vlaneseq  ;;  %s7204_s22 = scalar_lea.vmem %s5940_s21, 256  ;;  %p7209_p9 = scmp.lt.s32.totalorder %s5940_s21, %s5940_s21 }
  0x24   :  { %293 = vmatprep.subr.bf16.mxu0 %v6662_v17  ;;  %366 = vmatprep.subr.bf16.mxu1 %v6664_v18  ;;  %v68_v48 = vpack.c.bf16 %v46_v45, %v45_v44  ;;  %v7459_v50 = vld [vmem:[#allocation6 + $0x48] ss:$16 sps:$4 sm:$0xff]   ;;  %v7463_v51 = vld [vmem:[#allocation6 + $0x64] ss:$16 sps:$4 sm:$0xff]   ;;  %v7467_v52 = vld [vmem:[#allocation6 + $0x6c] ss:$16 sps:$4 sm:$0xff]   ;;  %p7205_p8 = scmp.ne.s32.totalorder %s5940_s21, %s7204_s22  ;;  %p7210_p10 = scmp.lt.s32.totalorder %s7204_s22, %s7204_s22 }
  0x25   :  { %v7469_v53 = vld [vmem:[#allocation6 + $0x60] ss:$16 sps:$4 sm:$0xff]   ;;  %v7471_v54 = vld [vmem:[#allocation6 + $0x68] ss:$16 sps:$4 sm:$0xff]   ;;  %v7483_v57 = vld [vmem:[#allocation6 + $0x84] ss:$16 sps:$4 sm:$0xff]  }
  0x26   :  { %v47_v55 = vld [vmem:[%s8772_s0 + $0x20] sm:$0xff]  ;;  %v48_v56 = vld [vmem:[%s8772_s0 + $0x28] sm:$0xff]  ;;  %v49_v3 = vld [vmem:[%s8772_s0 + $0x30] sm:$0xff]  ;;  %v7584_v17 = vshrl.u32 %v105_v16, 7  ;;  %p7211_p11 = por %p7210_p10, %p7209_p9 }
  0x27   :  { %294 = vmatpush1.bf16.msra.mxu0 %v6666_v19  ;;  %367 = vmatpush1.bf16.msra.mxu1 %v6667_v20  ;;  %v7485_v58 = vld [vmem:[#allocation6 + $0x8c] ss:$16 sps:$4 sm:$0xff]   ;;  %v7489_v59 = vld [vmem:[#allocation6 + $0x80] ss:$16 sps:$4 sm:$0xff]   ;;  %v7491_v60 = vld [vmem:[#allocation6 + $0x88] ss:$16 sps:$4 sm:$0xff]   ;;  %v69_v61 = vpack.c.bf16 %v48_v56, %v47_v55 }
  0x28   :  { %295 = vmatprep.subr.bf16.mxu0 %v6668_v21  ;;  %368 = vmatprep.subr.bf16.mxu1 %v6670_v22  ;;  %v7493_v62 = vld [vmem:[#allocation6 + $0xa4] ss:$16 sps:$4 sm:$0xff]   ;;  %v7495_v63 = vld [vmem:[#allocation6 + $0xac] ss:$16 sps:$4 sm:$0xff]   ;;  %v7501_v1 = vld [vmem:[#allocation6 + $0xa0] ss:$16 sps:$4 sm:$0xff]   ;;  %p7212_p12 = pnand %p7211_p11, %p7205_p8 }
  0x29   :  { %v7503_v2 = vld [vmem:[#allocation6 + $0xa8] ss:$16 sps:$4 sm:$0xff]   ;;  %v7511_v5 = vld [vmem:[#allocation6 + $0xc4] ss:$16 sps:$4 sm:$0xff]   ;;  %v7513_v6 = vld [vmem:[#allocation6 + $0xcc] ss:$16 sps:$4 sm:$0xff]  }
  0x2a   :  { %v50_v4 = vld [vmem:[%s8772_s0 + $0x38] sm:$0xff]  ;;  %v7521_v7 = vld [vmem:[#allocation6 + $0xc0] ss:$16 sps:$4 sm:$0xff]   ;;  %v7525_v10 = vld [vmem:[#allocation6 + $0xe4] ss:$16 sps:$4 sm:$0xff]   ;;  %8789 = vst [vmem:[#allocation15_spill] sm:$0xff] %v7584_v17 }
  0x2b   :  { %296 = vmatpush1.bf16.msra.mxu0 %v6672_v23  ;;  %369 = vmatpush1.bf16.msra.mxu1 %v6673_v24  ;;  %v7523_v8 = vld [vmem:[#allocation6 + $0xc8] ss:$16 sps:$4 sm:$0xff]   ;;  %v70_v9 = vpack.c.bf16 %v50_v4, %v49_v3  ;;  %v7527_v11 = vld [vmem:[#allocation6 + $0xec] ss:$16 sps:$4 sm:$0xff]   ;;  %v7533_v12 = vld [vmem:[#allocation6 + $0xe0] ss:$16 sps:$4 sm:$0xff]  }
  0x2c   :  { %297 = vmatprep.subr.bf16.mxu0 %v6674_v25  ;;  %370 = vmatprep.subr.bf16.mxu1 %v6676_v26  ;;  %v7535_v13 = vld [vmem:[#allocation6 + $0xe8] ss:$16 sps:$4 sm:$0xff]   ;;  %v463_v14 = vld [vmem:[%s8773_s1] sm:$0xff]  ;;  %v8783_v18 = vsub.s32 2, %v7584_v17  ;;  %v8781_v19 = vsub.s32 3, %v7584_v17  ;;  %v8784_v20 = vsub.s32 0, %v7584_v17 }
  0x2d   :  { %v475_v15 = vpack.c.bf16 %v463_v14, %v463_v14  ;;  %v103_v21 = vld [vmem:[%s8777_s5] sm:$0xf]  ;;  %v8782_v22 = vsub.s32 1, %v7584_v17 }
  0x2e   :  { %v7595_v23 = vrot.slane %v103_v21, %v8783_v18  ;;  %v7603_v26 = vrot.slane %v103_v21, %v8781_v19 }
  0x2f   :  { %298 = vmatpush1.bf16.msra.mxu0 %v6678_v27  ;;  %371 = vmatpush1.bf16.msra.mxu1 %v6679_v28  ;;  %v108_v27 = vrot.slane %v103_v21, %v8784_v20 }
  0x30   :  { %299 = vmatprep.subr.bf16.mxu0 %v6680_v29  ;;  %372 = vmatprep.subr.bf16.mxu1 %v6682_v30  ;;  %v112_v30 = vrot.slane %v103_v21, %v8782_v22 }
  0x33   :  { %300 = vmatpush1.bf16.msra.mxu0 %v6684_v31  ;;  %373 = vmatpush1.bf16.msra.mxu1 %v6685_v32 }
  0x34   :  { %668 = vmatprep.subr.bf16.mxu0 %v7423_v35  ;;  %709 = vmatprep.subr.bf16.mxu1 %v7425_v36 }
  0x36   :  { %318 = vmatmul.mubr.bf16.vlgmr.msra.gmra.mrb[0].mxu0 %v67_v37  ;;  %391 = vmatmul.mubr.bf16.vlgmr.msra.gmra.mrb[0].mxu1 %v67_v37 }
  0x37   :  { %669 = vmatpush1.bf16.msra.mxu0 %v7427_v38  ;;  %710 = vmatpush1.bf16.msra.mxu1 %v7429_v39 }
  0x38   :  { %670 = vmatprep.subr.bf16.mxu0 %v7433_v40  ;;  %711 = vmatprep.subr.bf16.mxu1 %v7435_v41 }
  0x39   :  { %327 = vmatprep.mubr.bf16.mxu0 %v8785_v0  ;;  %400 = vmatprep.mubr.bf16.mxu1 %v8785_v0 }
  0x3b   :  { %671 = vmatpush1.bf16.msra.mxu0 %v7437_v42  ;;  %712 = vmatpush1.bf16.msra.mxu1 %v7439_v43 }
  0x3c   :  { %672 = vmatprep.subr.bf16.mxu0 %v7451_v46  ;;  %713 = vmatprep.subr.bf16.mxu1 %v7453_v47 }
  0x3e   :  { %328 = vmatmul.mubr.bf16.gmra.mrb[4].mxu0 %v68_v48  ;;  %401 = vmatmul.mubr.bf16.gmra.mrb[4].mxu1 %v68_v48 }
  0x3f   :  { %673 = vmatpush1.bf16.msra.mxu0 %v7457_v49  ;;  %714 = vmatpush1.bf16.msra.mxu1 %v7459_v50 }
  0x40   :  { %674 = vmatprep.subr.bf16.mxu0 %v7463_v51  ;;  %715 = vmatprep.subr.bf16.mxu1 %v7467_v52 }
  0x41   :  { %337 = vmatprep.mubr.bf16.mxu0 %v8785_v0  ;;  %410 = vmatprep.mubr.bf16.mxu1 %v8785_v0 }
  0x43   :  { %675 = vmatpush1.bf16.msra.mxu0 %v7469_v53  ;;  %716 = vmatpush1.bf16.msra.mxu1 %v7471_v54 }
  0x44   :  { %676 = vmatprep.subr.bf16.mxu0 %v7483_v57  ;;  %717 = vmatprep.subr.bf16.mxu1 %v7485_v58 }
  0x46   :  { %338 = vmatmul.mubr.bf16.gmra.mrb[8].mxu0 %v69_v61  ;;  %411 = vmatmul.mubr.bf16.gmra.mrb[8].mxu1 %v69_v61 }
  0x47   :  { %677 = vmatpush1.bf16.msra.mxu0 %v7489_v59  ;;  %718 = vmatpush1.bf16.msra.mxu1 %v7491_v60 }
  0x48   :  { %678 = vmatprep.subr.bf16.mxu0 %v7493_v62  ;;  %719 = vmatprep.subr.bf16.mxu1 %v7495_v63 }
  0x49   :  { %347 = vmatprep.mubr.bf16.mxu0 %v8785_v0  ;;  %420 = vmatprep.mubr.bf16.mxu1 %v8785_v0 }
  0x4b   :  { %679 = vmatpush1.bf16.msra.mxu0 %v7501_v1  ;;  %720 = vmatpush1.bf16.msra.mxu1 %v7503_v2 }
  0x4c   :  { %680 = vmatprep.subr.bf16.mxu0 %v7511_v5  ;;  %721 = vmatprep.subr.bf16.mxu1 %v7513_v6 }
  0x4e   :  { %348 = vmatmul.mubr.bf16.gmra.mrb[12].mxu0 %v70_v9  ;;  %421 = vmatmul.mubr.bf16.gmra.mrb[12].mxu1 %v70_v9 }
  0x4f   :  { %681 = vmatpush1.bf16.msra.mxu0 %v7521_v7  ;;  %722 = vmatpush1.bf16.msra.mxu1 %v7523_v8 }
  0x50   :  { %682 = vmatprep.subr.bf16.mxu0 %v7525_v10  ;;  %723 = vmatprep.subr.bf16.mxu1 %v7527_v11 }
  0x51   :  { %700 = vmatprep.mubr.bf16.mxu0 %v8785_v0  ;;  %741 = vmatprep.mubr.bf16.mxu1 %v8785_v0 }
  0x53   :  { %683 = vmatpush1.bf16.msra.mxu0 %v7533_v12  ;;  %724 = vmatpush1.bf16.msra.mxu1 %v7535_v13 }
  0x54   :  { %983 = vmatprep.subr.bf16.mxu0 %v7423_v35  ;;  %1024 = vmatprep.subr.bf16.mxu1 %v7425_v36 }
  0x56   :  { %701 = vmatmul.mubr.bf16.vlgmr.msra.gmra.mrb[16].mxu0 %v475_v15  ;;  %742 = vmatmul.mubr.bf16.vlgmr.msra.gmra.mrb[16].mxu1 %v475_v15 }
  0x57   :  { %984 = vmatpush1.bf16.msra.mxu0 %v7427_v38  ;;  %1025 = vmatpush1.bf16.msra.mxu1 %v7429_v39 }
  0x58   :  { %985 = vmatprep.subr.bf16.mxu0 %v7433_v40  ;;  %1026 = vmatprep.subr.bf16.mxu1 %v7435_v41 }
  0x59   :  { %1015 = vmatprep.mubr.bf16.mxu0 %v8785_v0  ;;  %1056 = vmatprep.mubr.bf16.mxu1 %v8785_v0 }
  0x5b   :  { %986 = vmatpush1.bf16.msra.mxu0 %v7437_v42  ;;  %1027 = vmatpush1.bf16.msra.mxu1 %v7439_v43 }
  0x5c   :  { %987 = vmatprep.subr.bf16.mxu0 %v7451_v46  ;;  %1028 = vmatprep.subr.bf16.mxu1 %v7453_v47 }
  0x5f   :  { %988 = vmatpush1.bf16.msra.mxu0 %v7457_v49  ;;  %1029 = vmatpush1.bf16.msra.mxu1 %v7459_v50 }
  0x60   :  { %989 = vmatprep.subr.bf16.mxu0 %v7463_v51  ;;  %1030 = vmatprep.subr.bf16.mxu1 %v7467_v52 }
  0x63   :  { %990 = vmatpush1.bf16.msra.mxu0 %v7469_v53  ;;  %1031 = vmatpush1.bf16.msra.mxu1 %v7471_v54 }
  0x64   :  { %991 = vmatprep.subr.bf16.mxu0 %v7483_v57  ;;  %1032 = vmatprep.subr.bf16.mxu1 %v7485_v58 }
  0x67   :  { %992 = vmatpush1.bf16.msra.mxu0 %v7489_v59  ;;  %1033 = vmatpush1.bf16.msra.mxu1 %v7491_v60 }
  0x68   :  { %993 = vmatprep.subr.bf16.mxu0 %v7493_v62  ;;  %1034 = vmatprep.subr.bf16.mxu1 %v7495_v63 }
  0x6b   :  { %994 = vmatpush1.bf16.msra.mxu0 %v7501_v1  ;;  %1035 = vmatpush1.bf16.msra.mxu1 %v7503_v2 }
  0x6c   :  { %995 = vmatprep.subr.bf16.mxu0 %v7511_v5  ;;  %1036 = vmatprep.subr.bf16.mxu1 %v7513_v6 }
  0x6f   :  { %996 = vmatpush1.bf16.msra.mxu0 %v7521_v7  ;;  %1037 = vmatpush1.bf16.msra.mxu1 %v7523_v8 }
  0x70   :  { %997 = vmatprep.subr.bf16.mxu0 %v7525_v10  ;;  %1038 = vmatprep.subr.bf16.mxu1 %v7527_v11 }
  0x73   :  { %998 = vmatpush1.bf16.msra.mxu0 %v7533_v12  ;;  %1039 = vmatpush1.bf16.msra.mxu1 %v7535_v13 }
  0x74   :  { %1299 = vmatprep.subr.bf16.mxu0 %v7423_v35  ;;  %1340 = vmatprep.subr.bf16.mxu1 %v7425_v36 }
 0x109   :  { %v7597_v24 = vpop.f32.mrb[0].mxu0  ;;  %v7599_v25 = vpop.f32.mrb[0].mxu1 }
 0x10a   :  { %v321_v28 = vpop.f32.mrb[1].mxu0  ;;  %v394_v29 = vpop.f32.mrb[1].mxu1 }
 0x10b   :  { %v323_v31 = vpop.f32.mrb[2].mxu0  ;;  %v396_v32 = vpop.f32.mrb[2].mxu1 }
 0x10c   :  { %v7609_v33 = vadd.f32 %v323_v31, %v108_v27  ;;  %v325_v34 = vpop.f32.mrb[3].mxu0  ;;  %v7612_v37 = vadd.f32 %v396_v32, %v7595_v23  ;;  %v398_v44 = vpop.f32.mrb[3].mxu1 }
 0x10d   :  { %v7614_v45 = vadd.f32 %v325_v34, %v112_v30  ;;  %v7617_v48 = vadd.f32 %v398_v44, %v7603_v26 }
 0x111   :  { %v329_v55 = vpop.f32.mrb[4].mxu0  ;;  %v402_v56 = vpop.f32.mrb[4].mxu1 }
 0x112   :  { %v7619_v61 = vadd.f32 %v329_v55, %v108_v27  ;;  %v331_v3 = vpop.f32.mrb[5].mxu0  ;;  %v7622_v4 = vadd.f32 %v402_v56, %v7595_v23  ;;  %v404_v9 = vpop.f32.mrb[5].mxu1 }
 0x113   :  { %v7624_v14 = vadd.f32 %v331_v3, %v112_v30  ;;  %v333_v15 = vpop.f32.mrb[6].mxu0  ;;  %v7627_v16 = vadd.f32 %v404_v9, %v7603_v26  ;;  %v406_v21 = vpop.f32.mrb[6].mxu1 }
 0x114   :  { %v7629_v31 = vadd.f32 %v333_v15, %v108_v27  ;;  %v335_v32 = vpop.f32.mrb[7].mxu0  ;;  %v7632_v34 = vadd.f32 %v406_v21, %v7595_v23  ;;  %v408_v44 = vpop.f32.mrb[7].mxu1 }
 0x115   :  { %8790 = vst [vmem:[#allocation16_spill] sm:$0xff] %v7627_v16  ;;  %v7634_v55 = vadd.f32 %v335_v32, %v112_v30  ;;  %v7637_v56 = vadd.f32 %v408_v44, %v7603_v26 }
 0x116   :  { %8791 = vst [vmem:[#allocation17_spill] sm:$0xff] %v7629_v31  ;;  %8792 = vst [vmem:[#allocation18_spill] sm:$0xff] %v7632_v34 }
 0x117   :  { %8793 = vst [vmem:[#allocation19_spill] sm:$0xff] %v7634_v55  ;;  %8794 = vst [vmem:[#allocation20_spill] sm:$0xff] %v7637_v56 }
 0x119   :  { %v339_v19 = vpop.f32.mrb[8].mxu0  ;;  %v412_v3 = vpop.f32.mrb[8].mxu1 }
 0x11a   :  { %v7639_v22 = vadd.f32 %v339_v19, %v108_v27  ;;  %v341_v18 = vpop.f32.mrb[9].mxu0  ;;  %v7642_v9 = vadd.f32 %v412_v3, %v7595_v23  ;;  %v414_v15 = vpop.f32.mrb[9].mxu1 }
 0x11b   :  { %v7644_v20 = vadd.f32 %v341_v18, %v112_v30  ;;  %v343_v0 = vpop.f32.mrb[10].mxu0  ;;  %v7647_v21 = vadd.f32 %v414_v15, %v7603_v26  ;;  %v416_v32 = vpop.f32.mrb[10].mxu1 }
 0x11c   :  { %8795 = vst [vmem:[#allocation21_spill] sm:$0xff] %v7639_v22  ;;  %8796 = vst [vmem:[#allocation22_spill] sm:$0xff] %v7642_v9  ;;  %v7649_v17 = vadd.f32 %v343_v0, %v108_v27  ;;  %v345_v44 = vpop.f32.mrb[11].mxu0  ;;  %v7652_v56 = vadd.f32 %v416_v32, %v7595_v23  ;;  %v418_v19 = vpop.f32.mrb[11].mxu1 }
 0x11d   :  { %8797 = vst [vmem:[#allocation23_spill] sm:$0xff] %v7644_v20  ;;  %8798 = vst [vmem:[#allocation24_spill] sm:$0xff] %v7647_v21  ;;  %v7654_v22 = vadd.f32 %v345_v44, %v112_v30  ;;  %v7657_v3 = vadd.f32 %v418_v19, %v7603_v26 }
 0x11e   :  { %8799 = vst [vmem:[#allocation25_spill] sm:$0xff] %v7649_v17  ;;  %8800 = vst [vmem:[#allocation26_spill] sm:$0xff] %v7652_v56 }
 0x11f   :  { %8801 = vst [vmem:[#allocation27_spill] sm:$0xff] %v7654_v22  ;;  %8802 = vst [vmem:[#allocation28_spill] sm:$0xff] %v7657_v3 }
 0x121   :  { %v349_v9 = vpop.f32.mrb[12].mxu0  ;;  %v422_v18 = vpop.f32.mrb[12].mxu1 }
 0x122   :  { %v7659_v20 = vadd.f32 %v349_v9, %v108_v27  ;;  %v351_v55 = vpop.f32.mrb[13].mxu0  ;;  %v7662_v15 = vadd.f32 %v422_v18, %v7595_v23  ;;  %v424_v0 = vpop.f32.mrb[13].mxu1 }
 0x123   :  { %v7664_v17 = vadd.f32 %v351_v55, %v112_v30  ;;  %v353_v21 = vpop.f32.mrb[14].mxu0  ;;  %v7667_v32 = vadd.f32 %v424_v0, %v7603_v26  ;;  %v426_v44 = vpop.f32.mrb[14].mxu1  ;;  %v320_v55 = vadd.f32 %v7597_v24, %v108_v27  ;;  %v322_v0 = vadd.f32 %v321_v28, %v112_v30 }
 0x124   :  { %8803 = vst [vmem:[#allocation29_spill] sm:$0xff] %v7659_v20  ;;  %8804 = vst [vmem:[#allocation30_spill] sm:$0xff] %v7662_v15  ;;  %v7669_v22 = vadd.f32 %v353_v21, %v108_v27  ;;  %v355_v19 = vpop.f32.mrb[15].mxu0  ;;  %v7672_v3 = vadd.f32 %v426_v44, %v7595_v23  ;;  %v428_v9 = vpop.f32.mrb[15].mxu1 }
 0x125   :  { %8805 = vst [vmem:[#allocation31_spill] sm:$0xff] %v7664_v17  ;;  %8806 = vst [vmem:[#allocation32_spill] sm:$0xff] %v7667_v32  ;;  %v7674_v20 = vadd.f32 %v355_v19, %v112_v30  ;;  %v7677_v18 = vadd.f32 %v428_v9, %v7603_v26  ;;  %v393_v17 = vadd.f32 %v7599_v25, %v7595_v23 }
 0x126   :  { %8807 = vst [vmem:[#allocation33_spill] sm:$0xff] %v7669_v22  ;;  %8808 = vst [vmem:[#allocation34_spill] sm:$0xff] %v7672_v3  ;;  %v395_v32 = vadd.f32 %v394_v29, %v7603_v26 }
 0x127   :  { %8809 = vst [vmem:[#allocation35_spill] sm:$0xff] %v7674_v20  ;;  %8810 = vst [vmem:[#allocation36_spill] sm:$0xff] %v7677_v18 }
 0x129   :  { %v702_v21 = vpop.f32.mrb[16].mxu0  ;;  %v743_v22 = vpop.f32.mrb[16].mxu1 }
 0x12a   :  { %v750_v15 = vadd.f32 %v702_v21, %v320_v55  ;;  %v752_v56 = vadd.f32 %v743_v22, %v393_v17  ;;  %v704_v44 = vpop.f32.mrb[17].mxu0  ;;  %v745_v3 = vpop.f32.mrb[17].mxu1  ;;  %v8811_v55 = vmov 0  }
 0x12b   :  { %v751_v34 = vadd.f32 %v704_v44, %v322_v0  ;;  %v753_v19 = vadd.f32 %v745_v3, %v395_v32  ;;  %v706_v20 = vpop.f32.mrb[18].mxu0  ;;  %v747_v31 = vpop.f32.mrb[18].mxu1 }
 0x12c   :  { %v6028_v9 = vmul.f32 -1.442695, %v750_v15  ;;  %v707_v18 = vpop.f32.mrb[19].mxu0  ;;  %v748_v16 = vpop.f32.mrb[19].mxu1  ;;  %v465_v20 = vld [vmem:[%s8774_s2] sm:$0xff] }
 0x12d   :  { %v6029_v24 = vmul.f32 -1.442695, %v751_v34  ;;  %v6030_v23 = vmul.f32 -1.442695, %v753_v19 }
 0x12e   :  { %6926 = vpow2.f32 %v6028_v9 }
 0x12f   :  { %6928 = vpow2.f32 %v6029_v24 }
 0x130   :  { %6930 = vpow2.f32 %v6030_v23 }
 0x131   :  { %6932 = vtanh.f32 %v752_v56 }
 0x138   :  { %v6927_v25 = vpop.eup %6926 }
 0x139   :  { %v6929_v27 = vpop.eup %6928  ;;  %v757_v26 = vadd.f32 1.0, %v6927_v25 }
 0x13a   :  { %v763_v28 = vadd.f32 1.0, %v6929_v27  ;;  %v6931_v17 = vpop.eup %6930 }
 0x13b   :  { %6934 = vrcp.f32 %v757_v26  ;;  %v6933_v22 = vpop.eup %6932  ;;  %v770_v31 = vadd.f32 1.0, %v6931_v17 }
 0x13c   :  { %6936 = vrcp.f32 %v763_v28 }
 0x13d   :  { %6938 = vrcp.f32 %v770_v31 }
 0x145   :  { %v6935_v29 = vpop.eup %6934 }
 0x146   :  { %v6937_v30 = vpop.eup %6936  ;;  %v775_v16 = vmul.f32 %v6935_v29, %v6933_v22 }
 0x147   :  { %v774_v34 = vmul.f32 %v6937_v30, %v465_v20  ;;  %v6939_v56 = vpop.eup %6938 }
 0x149   :  { %v7686_v3 = vadd.f32 %v775_v16, %v774_v34 }
 0x14b   :  { %6940 = vtanh.f32 %v7686_v3 }
 0x155   :  { %v6941_v15 = vpop.eup %6940 }
 0x156   :  { %v7689_v32 = vmul.f32 %v6941_v15, %v6939_v56 }
 0x158   :  { %v790_v18 = vpack.c.bf16 %v7689_v32, %v7689_v32 }
 0x15a   :  { %1016 = vmatmul.mubr.bf16.vlgmr.msra.gmra.mrb[20].mxu0 %v790_v18  ;;  %1057 = vmatmul.mubr.bf16.vlgmr.msra.gmra.mrb[20].mxu1 %v790_v18 }
 0x15b   :  { %1300 = vmatpush1.bf16.msra.mxu0 %v7427_v38  ;;  %1341 = vmatpush1.bf16.msra.mxu1 %v7429_v39 }
 0x15c   :  { %1301 = vmatprep.subr.bf16.mxu0 %v7433_v40  ;;  %1342 = vmatprep.subr.bf16.mxu1 %v7435_v41 }
 0x15d   :  { %1331 = vmatprep.mubr.bf16.mxu0 %v8811_v55  ;;  %1372 = vmatprep.mubr.bf16.mxu1 %v8811_v55 }
 0x15f   :  { %1302 = vmatpush1.bf16.msra.mxu0 %v7437_v42  ;;  %1343 = vmatpush1.bf16.msra.mxu1 %v7439_v43 }
 0x160   :  { %1303 = vmatprep.subr.bf16.mxu0 %v7451_v46  ;;  %1344 = vmatprep.subr.bf16.mxu1 %v7453_v47 }
 0x163   :  { %1304 = vmatpush1.bf16.msra.mxu0 %v7457_v49  ;;  %1345 = vmatpush1.bf16.msra.mxu1 %v7459_v50 }
 0x164   :  { %1305 = vmatprep.subr.bf16.mxu0 %v7463_v51  ;;  %1346 = vmatprep.subr.bf16.mxu1 %v7467_v52 }
 0x167   :  { %1306 = vmatpush1.bf16.msra.mxu0 %v7469_v53  ;;  %1347 = vmatpush1.bf16.msra.mxu1 %v7471_v54 }
 0x168   :  { %1307 = vmatprep.subr.bf16.mxu0 %v7483_v57  ;;  %1348 = vmatprep.subr.bf16.mxu1 %v7485_v58 }
 0x16b   :  { %1308 = vmatpush1.bf16.msra.mxu0 %v7489_v59  ;;  %1349 = vmatpush1.bf16.msra.mxu1 %v7491_v60 }
 0x16c   :  { %1309 = vmatprep.subr.bf16.mxu0 %v7493_v62  ;;  %1350 = vmatprep.subr.bf16.mxu1 %v7495_v63 }
 0x16f   :  { %1310 = vmatpush1.bf16.msra.mxu0 %v7501_v1  ;;  %1351 = vmatpush1.bf16.msra.mxu1 %v7503_v2 }
 0x170   :  { %1311 = vmatprep.subr.bf16.mxu0 %v7511_v5  ;;  %1352 = vmatprep.subr.bf16.mxu1 %v7513_v6 }
 0x173   :  { %1312 = vmatpush1.bf16.msra.mxu0 %v7521_v7  ;;  %1353 = vmatpush1.bf16.msra.mxu1 %v7523_v8 }
 0x174   :  { %1313 = vmatprep.subr.bf16.mxu0 %v7525_v10  ;;  %1354 = vmatprep.subr.bf16.mxu1 %v7527_v11 }
 0x177   :  { %1314 = vmatpush1.bf16.msra.mxu0 %v7533_v12  ;;  %1355 = vmatpush1.bf16.msra.mxu1 %v7535_v13 }
 0x178   :  { %1615 = vmatprep.subr.bf16.mxu0 %v7423_v35  ;;  %1656 = vmatprep.subr.bf16.mxu1 %v7425_v36 }
 0x22d   :  { %v1017_v0 = vpop.f32.mrb[20].mxu0  ;;  %v1058_v21 = vpop.f32.mrb[20].mxu1 }
 0x22e   :  { %v1065_v44 = vadd.f32 %v1017_v0, %v7609_v33  ;;  %v1067_v19 = vadd.f32 %v1058_v21, %v7612_v37  ;;  %v1019_v9 = vpop.f32.mrb[21].mxu0  ;;  %v1060_v24 = vpop.f32.mrb[21].mxu1 }
 0x22f   :  { %v1066_v23 = vadd.f32 %v1019_v9, %v7614_v45  ;;  %v1068_v25 = vadd.f32 %v1060_v24, %v7617_v48  ;;  %v1021_v27 = vpop.f32.mrb[22].mxu0  ;;  %v1062_v26 = vpop.f32.mrb[22].mxu1  ;;  %v7791_v9 = vld [vmem:[#allocation6 + $0x8] ss:$16 sps:$4 sm:$0xff]   ;;  %v7797_v24 = vld [vmem:[#allocation6 + $0x24] ss:$16 sps:$4 sm:$0xff]  }
 0x230   :  { %v6063_v28 = vmul.f32 -1.442695, %v1065_v44  ;;  %v1022_v17 = vpop.f32.mrb[23].mxu0  ;;  %v1063_v22 = vpop.f32.mrb[23].mxu1  ;;  %v7803_v27 = vld [vmem:[#allocation6 + $0x28] ss:$16 sps:$4 sm:$0xff]  }
 0x231   :  { %v6064_v35 = vmul.f32 -1.442695, %v1066_v23  ;;  %v6065_v36 = vmul.f32 -1.442695, %v1068_v25  ;;  %v7799_v23 = vld [vmem:[#allocation6 + $0x2c] ss:$16 sps:$4 sm:$0xff]  }
 0x232   :  { %6942 = vpow2.f32 %v6063_v28  ;;  %v7801_v25 = vld [vmem:[#allocation6 + $0x20] ss:$16 sps:$4 sm:$0xff]   ;;  %v7809_v26 = vld [vmem:[#allocation6 + $0x44] ss:$16 sps:$4 sm:$0xff]   ;;  %v7811_v28 = vld [vmem:[#allocation6 + $0x4c] ss:$16 sps:$4 sm:$0xff]  }
 0x233   :  { %6944 = vpow2.f32 %v6064_v35  ;;  %v7813_v17 = vld [vmem:[#allocation6 + $0x40] ss:$16 sps:$4 sm:$0xff]   ;;  %v7815_v22 = vld [vmem:[#allocation6 + $0x48] ss:$16 sps:$4 sm:$0xff]   ;;  %v7821_v35 = vld [vmem:[#allocation6 + $0x64] ss:$16 sps:$4 sm:$0xff]  }
 0x234   :  { %6946 = vpow2.f32 %v6065_v36  ;;  %v7823_v36 = vld [vmem:[#allocation6 + $0x6c] ss:$16 sps:$4 sm:$0xff]  }
 0x235   :  { %6948 = vtanh.f32 %v1067_v19  ;;  %v7789_v19 = vld [vmem:[#allocation6] ss:$16 sps:$4 sm:$0xff]  }
 0x23c   :  { %v6943_v20 = vpop.eup %6942 }
 0x23d   :  { %v6945_v29 = vpop.eup %6944  ;;  %v1072_v33 = vadd.f32 1.0, %v6943_v20  ;;  %v7825_v20 = vld [vmem:[#allocation6 + $0x60] ss:$16 sps:$4 sm:$0xff]  }
 0x23e   :  { %v1078_v37 = vadd.f32 1.0, %v6945_v29  ;;  %v6947_v45 = vpop.eup %6946  ;;  %v7827_v29 = vld [vmem:[#allocation6 + $0x68] ss:$16 sps:$4 sm:$0xff]  }
 0x23f   :  { %6950 = vrcp.f32 %v1072_v33  ;;  %v6949_v30 = vpop.eup %6948  ;;  %v1085_v34 = vadd.f32 1.0, %v6947_v45  ;;  %v7833_v33 = vld [vmem:[#allocation6 + $0x84] ss:$16 sps:$4 sm:$0xff]   ;;  %v7837_v45 = vld [vmem:[#allocation6 + $0x80] ss:$16 sps:$4 sm:$0xff]  }
 0x240   :  { %6952 = vrcp.f32 %v1078_v37  ;;  %v7835_v37 = vld [vmem:[#allocation6 + $0x8c] ss:$16 sps:$4 sm:$0xff]  }
 0x241   :  { %6954 = vrcp.f32 %v1085_v34  ;;  %v7851_v34 = vld [vmem:[#allocation6 + $0xac] ss:$16 sps:$4 sm:$0xff]  }
 0x249   :  { %v6951_v48 = vpop.eup %6950 }
 0x24a   :  { %v6953_v16 = vpop.eup %6952  ;;  %v1090_v31 = vmul.f32 %v6951_v48, %v6949_v30  ;;  %v7839_v30 = vld [vmem:[#allocation6 + $0x88] ss:$16 sps:$4 sm:$0xff]   ;;  %v7843_v48 = vld [vmem:[#allocation6 + $0xa4] ss:$16 sps:$4 sm:$0xff]  }
 0x24b   :  { %v1089_v56 = vmul.f32 %v6953_v16, %v7686_v3  ;;  %v6955_v18 = vpop.eup %6954  ;;  %v7787_v3 = vld [vmem:[#allocation6 + $0xc] ss:$16 sps:$4 sm:$0xff]   ;;  %v7847_v16 = vld [vmem:[#allocation6 + $0xa0] ss:$16 sps:$4 sm:$0xff]  }
 0x24d   :  { %v7732_v15 = vadd.f32 %v1090_v31, %v1089_v56  ;;  %v7849_v31 = vld [vmem:[#allocation6 + $0xa8] ss:$16 sps:$4 sm:$0xff]   ;;  %v7854_v56 = vld [vmem:[#allocation6 + $0xc4] ss:$16 sps:$4 sm:$0xff]  }
 0x24f   :  { %6956 = vtanh.f32 %v7732_v15 }
 0x259   :  { %v6957_v0 = vpop.eup %6956 }
 0x25a   :  { %v7735_v21 = vmul.f32 %v6957_v0, %v6955_v18  ;;  %v7861_v18 = vld [vmem:[#allocation6 + $0xc0] ss:$16 sps:$4 sm:$0xff]   ;;  %v7863_v0 = vld [vmem:[#allocation6 + $0xc8] ss:$16 sps:$4 sm:$0xff]  }
 0x25c   :  { %v1106_v44 = vpack.c.bf16 %v7735_v21, %v7735_v21 }
 0x25e   :  { %1332 = vmatmul.mubr.bf16.vlgmr.msra.gmra.mrb[24].mxu0 %v1106_v44  ;;  %1373 = vmatmul.mubr.bf16.vlgmr.msra.gmra.mrb[24].mxu1 %v1106_v44  ;;  %v7867_v44 = vld [vmem:[#allocation6 + $0xe4] ss:$16 sps:$4 sm:$0xff]  }
 0x25f   :  { %1616 = vmatpush1.bf16.msra.mxu0 %v7427_v38  ;;  %1657 = vmatpush1.bf16.msra.mxu1 %v7429_v39 }
 0x260   :  { %1617 = vmatprep.subr.bf16.mxu0 %v7433_v40  ;;  %1658 = vmatprep.subr.bf16.mxu1 %v7435_v41 }
 0x261   :  { %1647 = vmatprep.mubr.bf16.mxu0 %v8811_v55  ;;  %1688 = vmatprep.mubr.bf16.mxu1 %v8811_v55 }
 0x263   :  { %1618 = vmatpush1.bf16.msra.mxu0 %v7437_v42  ;;  %1659 = vmatpush1.bf16.msra.mxu1 %v7439_v43 }
 0x264   :  { %1619 = vmatprep.subr.bf16.mxu0 %v7451_v46  ;;  %1660 = vmatprep.subr.bf16.mxu1 %v7453_v47  ;;  %v8812_v47 = vld [vmem:[#allocation16_spill] sm:$0xff] }
 0x267   :  { %1620 = vmatpush1.bf16.msra.mxu0 %v7457_v49  ;;  %1661 = vmatpush1.bf16.msra.mxu1 %v7459_v50 }
 0x268   :  { %1621 = vmatprep.subr.bf16.mxu0 %v7463_v51  ;;  %1662 = vmatprep.subr.bf16.mxu1 %v7467_v52 }
 0x26b   :  { %1622 = vmatpush1.bf16.msra.mxu0 %v7469_v53  ;;  %1663 = vmatpush1.bf16.msra.mxu1 %v7471_v54 }
 0x26c   :  { %1623 = vmatprep.subr.bf16.mxu0 %v7483_v57  ;;  %1664 = vmatprep.subr.bf16.mxu1 %v7485_v58 }
 0x26f   :  { %1624 = vmatpush1.bf16.msra.mxu0 %v7489_v59  ;;  %1665 = vmatpush1.bf16.msra.mxu1 %v7491_v60 }
 0x270   :  { %1625 = vmatprep.subr.bf16.mxu0 %v7493_v62  ;;  %1666 = vmatprep.subr.bf16.mxu1 %v7495_v63 }
 0x273   :  { %1626 = vmatpush1.bf16.msra.mxu0 %v7501_v1  ;;  %1667 = vmatpush1.bf16.msra.mxu1 %v7503_v2 }
 0x274   :  { %1627 = vmatprep.subr.bf16.mxu0 %v7511_v5  ;;  %1668 = vmatprep.subr.bf16.mxu1 %v7513_v6 }
 0x277   :  { %1628 = vmatpush1.bf16.msra.mxu0 %v7521_v7  ;;  %1669 = vmatpush1.bf16.msra.mxu1 %v7523_v8 }
 0x278   :  { %1629 = vmatprep.subr.bf16.mxu0 %v7525_v10  ;;  %1670 = vmatprep.subr.bf16.mxu1 %v7527_v11 }
 0x27b   :  { %1630 = vmatpush1.bf16.msra.mxu0 %v7533_v12  ;;  %1671 = vmatpush1.bf16.msra.mxu1 %v7535_v13 }
 0x27c   :  { %1972 = vmatprep.subr.bf16.mxu1 %v7787_v3 }
 0x331   :  { %v1333_v38 = vpop.f32.mrb[24].mxu0  ;;  %v1374_v39 = vpop.f32.mrb[24].mxu1 }
 0x332   :  { %v1381_v40 = vadd.f32 %v1333_v38, %v7619_v61  ;;  %v1383_v41 = vadd.f32 %v1374_v39, %v7622_v4  ;;  %v1335_v42 = vpop.f32.mrb[25].mxu0  ;;  %v1376_v43 = vpop.f32.mrb[25].mxu1  ;;  %v7869_v38 = vld [vmem:[#allocation6 + $0xec] ss:$16 sps:$4 sm:$0xff]   ;;  %v7873_v39 = vld [vmem:[#allocation6 + $0xe0] ss:$16 sps:$4 sm:$0xff]  }
 0x333   :  { %v1382_v46 = vadd.f32 %v1335_v42, %v7624_v14  ;;  %v1384_v49 = vadd.f32 %v1376_v43, %v8812_v47  ;;  %v1337_v50 = vpop.f32.mrb[26].mxu0  ;;  %v1378_v51 = vpop.f32.mrb[26].mxu1  ;;  %v7785_v14 = vld [vmem:[#allocation6 + $0x4] ss:$16 sps:$4 sm:$0xff]   ;;  %v8814_v47 = vld [vmem:[#allocation18_spill] sm:$0xff] }
 0x334   :  { %v6098_v52 = vmul.f32 -1.442695, %v1381_v40  ;;  %v1338_v53 = vpop.f32.mrb[27].mxu0  ;;  %v1379_v54 = vpop.f32.mrb[27].mxu1  ;;  %1931 = vmatprep.subr.bf16.mxu0 %v7785_v14  ;;  %v7875_v40 = vld [vmem:[#allocation6 + $0xe8] ss:$16 sps:$4 sm:$0xff]  }
 0x335   :  { %v6099_v57 = vmul.f32 -1.442695, %v1382_v46  ;;  %v6100_v58 = vmul.f32 -1.442695, %v1384_v49  ;;  %v8813_v43 = vld [vmem:[#allocation17_spill] sm:$0xff]  ;;  %v8816_v54 = vld [vmem:[#allocation20_spill] sm:$0xff] }
 0x336   :  { %6958 = vpow2.f32 %v6098_v52  ;;  %v8815_v52 = vld [vmem:[#allocation19_spill] sm:$0xff] }
 0x337   :  { %6960 = vpow2.f32 %v6099_v57 }
 0x338   :  { %6962 = vpow2.f32 %v6100_v58 }
 0x339   :  { %6964 = vtanh.f32 %v1383_v41 }
 0x340   :  { %v6959_v59 = vpop.eup %6958 }
 0x341   :  { %v6961_v60 = vpop.eup %6960  ;;  %v1388_v62 = vadd.f32 1.0, %v6959_v59 }
 0x342   :  { %v1394_v63 = vadd.f32 1.0, %v6961_v60  ;;  %v6963_v1 = vpop.eup %6962 }
 0x343   :  { %6966 = vrcp.f32 %v1388_v62  ;;  %v6965_v2 = vpop.eup %6964  ;;  %v1401_v8 = vadd.f32 1.0, %v6963_v1 }
 0x344   :  { %6968 = vrcp.f32 %v1394_v63 }
 0x345   :  { %6970 = vrcp.f32 %v1401_v8 }
 0x34d   :  { %v6967_v5 = vpop.eup %6966 }
 0x34e   :  { %v6969_v6 = vpop.eup %6968  ;;  %v1406_v7 = vmul.f32 %v6967_v5, %v6965_v2 }
 0x34f   :  { %v1405_v10 = vmul.f32 %v6969_v6, %v7732_v15  ;;  %v6971_v12 = vpop.eup %6970  ;;  %v7856_v15 = vld [vmem:[#allocation6 + $0xcc] ss:$16 sps:$4 sm:$0xff]  }
 0x351   :  { %v7776_v11 = vadd.f32 %v1406_v7, %v1405_v10 }
 0x353   :  { %6972 = vtanh.f32 %v7776_v11 }
 0x35d   :  { %v6973_v13 = vpop.eup %6972 }
 0x35e   :  { %v7779_v61 = vmul.f32 %v6973_v13, %v6971_v12 }
 0x360   :  { %v1422_v4 = vpack.c.bf16 %v7779_v61, %v7779_v61 }
 0x362   :  { %1648 = vmatmul.mubr.bf16.vlgmr.msra.gmra.mrb[28].mxu0 %v1422_v4  ;;  %1689 = vmatmul.mubr.bf16.vlgmr.msra.gmra.mrb[28].mxu1 %v1422_v4 }
 0x363   :  { %1963 = vmatprep.mubr.bf16.mxu0 %v8811_v55  ;;  %2004 = vmatprep.mubr.bf16.mxu1 %v8811_v55 }
 0x364   :  { %1932 = vmatpush1.bf16.msra.mxu0 %v7789_v19  ;;  %1973 = vmatpush1.bf16.msra.mxu1 %v7791_v9 }
 0x365   :  { %1933 = vmatprep.subr.bf16.mxu0 %v7797_v24  ;;  %1974 = vmatprep.subr.bf16.mxu1 %v7799_v23 }
 0x368   :  { %1934 = vmatpush1.bf16.msra.mxu0 %v7801_v25  ;;  %1975 = vmatpush1.bf16.msra.mxu1 %v7803_v27 }
 0x369   :  { %1935 = vmatprep.subr.bf16.mxu0 %v7809_v26  ;;  %1976 = vmatprep.subr.bf16.mxu1 %v7811_v28 }
 0x36c   :  { %1936 = vmatpush1.bf16.msra.mxu0 %v7813_v17  ;;  %1977 = vmatpush1.bf16.msra.mxu1 %v7815_v22 }
 0x36d   :  { %1937 = vmatprep.subr.bf16.mxu0 %v7821_v35  ;;  %1978 = vmatprep.subr.bf16.mxu1 %v7823_v36 }
 0x370   :  { %1938 = vmatpush1.bf16.msra.mxu0 %v7825_v20  ;;  %1979 = vmatpush1.bf16.msra.mxu1 %v7827_v29 }
 0x371   :  { %1939 = vmatprep.subr.bf16.mxu0 %v7833_v33  ;;  %1980 = vmatprep.subr.bf16.mxu1 %v7835_v37 }
 0x374   :  { %1940 = vmatpush1.bf16.msra.mxu0 %v7837_v45  ;;  %1981 = vmatpush1.bf16.msra.mxu1 %v7839_v30 }
 0x375   :  { %1941 = vmatprep.subr.bf16.mxu0 %v7843_v48  ;;  %1982 = vmatprep.subr.bf16.mxu1 %v7851_v34 }
 0x378   :  { %1942 = vmatpush1.bf16.msra.mxu0 %v7847_v16  ;;  %1983 = vmatpush1.bf16.msra.mxu1 %v7849_v31 }
 0x379   :  { %1943 = vmatprep.subr.bf16.mxu0 %v7854_v56  ;;  %1984 = vmatprep.subr.bf16.mxu1 %v7856_v15 }
 0x37c   :  { %1944 = vmatpush1.bf16.msra.mxu0 %v7861_v18  ;;  %1985 = vmatpush1.bf16.msra.mxu1 %v7863_v0 }
 0x37d   :  { %1945 = vmatprep.subr.bf16.mxu0 %v7867_v44  ;;  %1986 = vmatprep.subr.bf16.mxu1 %v7869_v38 }
 0x380   :  { %1946 = vmatpush1.bf16.msra.mxu0 %v7873_v39  ;;  %1987 = vmatpush1.bf16.msra.mxu1 %v7875_v40 }
 0x381   :  { %2247 = vmatprep.subr.bf16.mxu0 %v7785_v14  ;;  %2288 = vmatprep.subr.bf16.mxu1 %v7787_v3 }
 0x435   :  { %v1649_v41 = vpop.f32.mrb[28].mxu0  ;;  %v1690_v42 = vpop.f32.mrb[28].mxu1 }
 0x436   :  { %v1697_v46 = vadd.f32 %v1649_v41, %v8813_v43  ;;  %v1699_v49 = vadd.f32 %v1690_v42, %v8814_v47  ;;  %v1651_v50 = vpop.f32.mrb[29].mxu0  ;;  %v1692_v51 = vpop.f32.mrb[29].mxu1 }
 0x437   :  { %v1698_v53 = vadd.f32 %v1651_v50, %v8815_v52  ;;  %v1700_v57 = vadd.f32 %v1692_v51, %v8816_v54  ;;  %v1653_v58 = vpop.f32.mrb[30].mxu0  ;;  %v1694_v59 = vpop.f32.mrb[30].mxu1 }
 0x438   :  { %v6133_v60 = vmul.f32 -1.442695, %v1697_v46  ;;  %v1654_v62 = vpop.f32.mrb[31].mxu0  ;;  %v1695_v63 = vpop.f32.mrb[31].mxu1 }
 0x439   :  { %v6134_v1 = vmul.f32 -1.442695, %v1698_v53  ;;  %v6135_v2 = vmul.f32 -1.442695, %v1700_v57  ;;  %v8817_v53 = vld [vmem:[#allocation21_spill] sm:$0xff]  ;;  %v8818_v57 = vld [vmem:[#allocation22_spill] sm:$0xff] }
 0x43a   :  { %6974 = vpow2.f32 %v6133_v60  ;;  %v8819_v62 = vld [vmem:[#allocation23_spill] sm:$0xff] }
 0x43b   :  { %6976 = vpow2.f32 %v6134_v1  ;;  %v8820_v1 = vld [vmem:[#allocation24_spill] sm:$0xff] }
 0x43c   :  { %6978 = vpow2.f32 %v6135_v2 }
 0x43d   :  { %6980 = vtanh.f32 %v1699_v49 }
 0x444   :  { %v6975_v5 = vpop.eup %6974 }
 0x445   :  { %v6977_v6 = vpop.eup %6976  ;;  %v1704_v7 = vadd.f32 1.0, %v6975_v5 }
 0x446   :  { %v1710_v8 = vadd.f32 1.0, %v6977_v6  ;;  %v6979_v10 = vpop.eup %6978 }
 0x447   :  { %6982 = vrcp.f32 %v1704_v7  ;;  %v6981_v12 = vpop.eup %6980  ;;  %v1717_v42 = vadd.f32 1.0, %v6979_v10 }
 0x448   :  { %6984 = vrcp.f32 %v1710_v8 }
 0x449   :  { %6986 = vrcp.f32 %v1717_v42 }
 0x451   :  { %v6983_v13 = vpop.eup %6982 }
 0x452   :  { %v6985_v4 = vpop.eup %6984  ;;  %v1722_v41 = vmul.f32 %v6983_v13, %v6981_v12 }
 0x453   :  { %v1721_v43 = vmul.f32 %v6985_v4, %v7776_v11  ;;  %v6987_v47 = vpop.eup %6986 }
 0x455   :  { %v7888_v46 = vadd.f32 %v1722_v41, %v1721_v43 }
 0x457   :  { %6988 = vtanh.f32 %v7888_v46 }
 0x461   :  { %v6989_v50 = vpop.eup %6988 }
 0x462   :  { %v7891_v51 = vmul.f32 %v6989_v50, %v6987_v47 }
 0x464   :  { %v1738_v49 = vpack.c.bf16 %v7891_v51, %v7891_v51 }
 0x466   :  { %1964 = vmatmul.mubr.bf16.vlgmr.msra.gmra.mrb[32].mxu0 %v1738_v49  ;;  %2005 = vmatmul.mubr.bf16.vlgmr.msra.gmra.mrb[32].mxu1 %v1738_v49 }
 0x467   :  { %2248 = vmatpush1.bf16.msra.mxu0 %v7789_v19  ;;  %2289 = vmatpush1.bf16.msra.mxu1 %v7791_v9 }
 0x468   :  { %2249 = vmatprep.subr.bf16.mxu0 %v7797_v24  ;;  %2290 = vmatprep.subr.bf16.mxu1 %v7799_v23 }
 0x469   :  { %2279 = vmatprep.mubr.bf16.mxu0 %v8811_v55  ;;  %2320 = vmatprep.mubr.bf16.mxu1 %v8811_v55 }
 0x46b   :  { %2250 = vmatpush1.bf16.msra.mxu0 %v7801_v25  ;;  %2291 = vmatpush1.bf16.msra.mxu1 %v7803_v27 }
 0x46c   :  { %2251 = vmatprep.subr.bf16.mxu0 %v7809_v26  ;;  %2292 = vmatprep.subr.bf16.mxu1 %v7811_v28 }
 0x46f   :  { %2252 = vmatpush1.bf16.msra.mxu0 %v7813_v17  ;;  %2293 = vmatpush1.bf16.msra.mxu1 %v7815_v22 }
 0x470   :  { %2253 = vmatprep.subr.bf16.mxu0 %v7821_v35  ;;  %2294 = vmatprep.subr.bf16.mxu1 %v7823_v36 }
 0x473   :  { %2254 = vmatpush1.bf16.msra.mxu0 %v7825_v20  ;;  %2295 = vmatpush1.bf16.msra.mxu1 %v7827_v29 }
 0x474   :  { %2255 = vmatprep.subr.bf16.mxu0 %v7833_v33  ;;  %2296 = vmatprep.subr.bf16.mxu1 %v7835_v37 }
 0x477   :  { %2256 = vmatpush1.bf16.msra.mxu0 %v7837_v45  ;;  %2297 = vmatpush1.bf16.msra.mxu1 %v7839_v30 }
 0x478   :  { %2257 = vmatprep.subr.bf16.mxu0 %v7843_v48  ;;  %2298 = vmatprep.subr.bf16.mxu1 %v7851_v34 }
 0x47b   :  { %2258 = vmatpush1.bf16.msra.mxu0 %v7847_v16  ;;  %2299 = vmatpush1.bf16.msra.mxu1 %v7849_v31 }
 0x47c   :  { %2259 = vmatprep.subr.bf16.mxu0 %v7854_v56  ;;  %2300 = vmatprep.subr.bf16.mxu1 %v7856_v15 }
 0x47f   :  { %2260 = vmatpush1.bf16.msra.mxu0 %v7861_v18  ;;  %2301 = vmatpush1.bf16.msra.mxu1 %v7863_v0 }
 0x480   :  { %2261 = vmatprep.subr.bf16.mxu0 %v7867_v44  ;;  %2302 = vmatprep.subr.bf16.mxu1 %v7869_v38 }
 0x483   :  { %2262 = vmatpush1.bf16.msra.mxu0 %v7873_v39  ;;  %2303 = vmatpush1.bf16.msra.mxu1 %v7875_v40 }
 0x484   :  { %2563 = vmatprep.subr.bf16.mxu0 %v7785_v14  ;;  %2604 = vmatprep.subr.bf16.mxu1 %v7787_v3 }
 0x539   :  { %v1965_v11 = vpop.f32.mrb[32].mxu0  ;;  %v2006_v52 = vpop.f32.mrb[32].mxu1 }
 0x53a   :  { %v2013_v54 = vadd.f32 %v1965_v11, %v8817_v53  ;;  %v2015_v58 = vadd.f32 %v2006_v52, %v8818_v57  ;;  %v1967_v59 = vpop.f32.mrb[33].mxu0  ;;  %v2008_v60 = vpop.f32.mrb[33].mxu1 }
 0x53b   :  { %v2014_v63 = vadd.f32 %v1967_v59, %v8819_v62  ;;  %v2016_v2 = vadd.f32 %v2008_v60, %v8820_v1  ;;  %v1969_v5 = vpop.f32.mrb[34].mxu0  ;;  %v2010_v6 = vpop.f32.mrb[34].mxu1  ;;  %v8821_v1 = vld [vmem:[#allocation25_spill] sm:$0xff] }
 0x53c   :  { %v6168_v7 = vmul.f32 -1.442695, %v2013_v54  ;;  %v1970_v8 = vpop.f32.mrb[35].mxu0  ;;  %v2011_v10 = vpop.f32.mrb[35].mxu1  ;;  %v8822_v5 = vld [vmem:[#allocation26_spill] sm:$0xff] }
 0x53d   :  { %v6169_v12 = vmul.f32 -1.442695, %v2014_v63  ;;  %v6170_v13 = vmul.f32 -1.442695, %v2016_v2  ;;  %v8823_v10 = vld [vmem:[#allocation27_spill] sm:$0xff] }
 0x53e   :  { %6990 = vpow2.f32 %v6168_v7 }
 0x53f   :  { %6992 = vpow2.f32 %v6169_v12 }
 0x540   :  { %6994 = vpow2.f32 %v6170_v13  ;;  %v8824_v13 = vld [vmem:[#allocation28_spill] sm:$0xff] }
 0x541   :  { %6996 = vtanh.f32 %v2015_v58 }
 0x548   :  { %v6991_v4 = vpop.eup %6990 }
 0x549   :  { %v6993_v41 = vpop.eup %6992  ;;  %v2020_v42 = vadd.f32 1.0, %v6991_v4 }
 0x54a   :  { %v2026_v43 = vadd.f32 1.0, %v6993_v41  ;;  %v6995_v47 = vpop.eup %6994 }
 0x54b   :  { %6998 = vrcp.f32 %v2020_v42  ;;  %v6997_v50 = vpop.eup %6996  ;;  %v2033_v53 = vadd.f32 1.0, %v6995_v47 }
 0x54c   :  { %7000 = vrcp.f32 %v2026_v43 }
 0x54d   :  { %7002 = vrcp.f32 %v2033_v53 }
 0x555   :  { %v6999_v49 = vpop.eup %6998 }
 0x556   :  { %v7001_v11 = vpop.eup %7000  ;;  %v2038_v52 = vmul.f32 %v6999_v49, %v6997_v50 }
 0x557   :  { %v2037_v54 = vmul.f32 %v7001_v11, %v7888_v46  ;;  %v7003_v59 = vpop.eup %7002 }
 0x559   :  { %v7934_v57 = vadd.f32 %v2038_v52, %v2037_v54 }
 0x55b   :  { %7004 = vtanh.f32 %v7934_v57 }
 0x565   :  { %v7005_v60 = vpop.eup %7004 }
 0x566   :  { %v7937_v62 = vmul.f32 %v7005_v60, %v7003_v59 }
 0x568   :  { %v2054_v58 = vpack.c.bf16 %v7937_v62, %v7937_v62 }
 0x56a   :  { %2280 = vmatmul.mubr.bf16.vlgmr.msra.gmra.mrb[36].mxu0 %v2054_v58  ;;  %2321 = vmatmul.mubr.bf16.vlgmr.msra.gmra.mrb[36].mxu1 %v2054_v58 }
 0x56b   :  { %2564 = vmatpush1.bf16.msra.mxu0 %v7789_v19  ;;  %2605 = vmatpush1.bf16.msra.mxu1 %v7791_v9 }
 0x56c   :  { %2565 = vmatprep.subr.bf16.mxu0 %v7797_v24  ;;  %2606 = vmatprep.subr.bf16.mxu1 %v7799_v23 }
 0x56d   :  { %2595 = vmatprep.mubr.bf16.mxu0 %v8811_v55  ;;  %2636 = vmatprep.mubr.bf16.mxu1 %v8811_v55 }
 0x56f   :  { %2566 = vmatpush1.bf16.msra.mxu0 %v7801_v25  ;;  %2607 = vmatpush1.bf16.msra.mxu1 %v7803_v27 }
 0x570   :  { %2567 = vmatprep.subr.bf16.mxu0 %v7809_v26  ;;  %2608 = vmatprep.subr.bf16.mxu1 %v7811_v28 }
 0x573   :  { %2568 = vmatpush1.bf16.msra.mxu0 %v7813_v17  ;;  %2609 = vmatpush1.bf16.msra.mxu1 %v7815_v22 }
 0x574   :  { %2569 = vmatprep.subr.bf16.mxu0 %v7821_v35  ;;  %2610 = vmatprep.subr.bf16.mxu1 %v7823_v36 }
 0x577   :  { %2570 = vmatpush1.bf16.msra.mxu0 %v7825_v20  ;;  %2611 = vmatpush1.bf16.msra.mxu1 %v7827_v29 }
 0x578   :  { %2571 = vmatprep.subr.bf16.mxu0 %v7833_v33  ;;  %2612 = vmatprep.subr.bf16.mxu1 %v7835_v37 }
 0x57b   :  { %2572 = vmatpush1.bf16.msra.mxu0 %v7837_v45  ;;  %2613 = vmatpush1.bf16.msra.mxu1 %v7839_v30 }
 0x57c   :  { %2573 = vmatprep.subr.bf16.mxu0 %v7843_v48  ;;  %2614 = vmatprep.subr.bf16.mxu1 %v7851_v34 }
 0x57f   :  { %2574 = vmatpush1.bf16.msra.mxu0 %v7847_v16  ;;  %2615 = vmatpush1.bf16.msra.mxu1 %v7849_v31 }
 0x580   :  { %2575 = vmatprep.subr.bf16.mxu0 %v7854_v56  ;;  %2616 = vmatprep.subr.bf16.mxu1 %v7856_v15 }
 0x583   :  { %2576 = vmatpush1.bf16.msra.mxu0 %v7861_v18  ;;  %2617 = vmatpush1.bf16.msra.mxu1 %v7863_v0 }
 0x584   :  { %2577 = vmatprep.subr.bf16.mxu0 %v7867_v44  ;;  %2618 = vmatprep.subr.bf16.mxu1 %v7869_v38 }
 0x587   :  { %2578 = vmatpush1.bf16.msra.mxu0 %v7873_v39  ;;  %2619 = vmatpush1.bf16.msra.mxu1 %v7875_v40 }
 0x588   :  { %2879 = vmatprep.subr.bf16.mxu0 %v7785_v14  ;;  %2920 = vmatprep.subr.bf16.mxu1 %v7787_v3 }
 0x63d   :  { %v2281_v46 = vpop.f32.mrb[36].mxu0  ;;  %v2322_v63 = vpop.f32.mrb[36].mxu1 }
 0x63e   :  { %v2329_v2 = vadd.f32 %v2281_v46, %v8821_v1  ;;  %v2331_v6 = vadd.f32 %v2322_v63, %v8822_v5  ;;  %v2283_v7 = vpop.f32.mrb[37].mxu0  ;;  %v2324_v8 = vpop.f32.mrb[37].mxu1 }
 0x63f   :  { %v2330_v12 = vadd.f32 %v2283_v7, %v8823_v10  ;;  %v2332_v4 = vadd.f32 %v2324_v8, %v8824_v13  ;;  %v2285_v41 = vpop.f32.mrb[38].mxu0  ;;  %v2326_v42 = vpop.f32.mrb[38].mxu1 }
 0x640   :  { %v6203_v43 = vmul.f32 -1.442695, %v2329_v2  ;;  %v2286_v47 = vpop.f32.mrb[39].mxu0  ;;  %v2327_v50 = vpop.f32.mrb[39].mxu1  ;;  %v6782_v42 = vld [vmem:[%s8775_s3 + $0x100] ss:$16 sps:$4 sm:$0xff]  }
 0x641   :  { %v6204_v14 = vmul.f32 -1.442695, %v2330_v12  ;;  %v6205_v3 = vmul.f32 -1.442695, %v2332_v4  ;;  %v6790_v50 = vld [vmem:[%s8775_s3 + $0x124] ss:$16 sps:$4 sm:$0xff]  }
 0x642   :  { %7006 = vpow2.f32 %v6203_v43  ;;  %v6785_v43 = vld [vmem:[%s8775_s3 + $0x108] ss:$16 sps:$4 sm:$0xff]  }
 0x643   :  { %7008 = vpow2.f32 %v6204_v14  ;;  %v6793_v14 = vld [vmem:[%s8775_s3 + $0x12c] ss:$16 sps:$4 sm:$0xff]  }
 0x644   :  { %7010 = vpow2.f32 %v6205_v3  ;;  %v6788_v3 = vld [vmem:[%s8775_s3 + $0x120] ss:$16 sps:$4 sm:$0xff]  }
 0x645   :  { %7012 = vtanh.f32 %v2331_v6 }
 0x64c   :  { %v7007_v49 = vpop.eup %7006 }
 0x64d   :  { %v7009_v11 = vpop.eup %7008  ;;  %v2336_v52 = vadd.f32 1.0, %v7007_v49  ;;  %v6791_v49 = vld [vmem:[%s8775_s3 + $0x128] ss:$16 sps:$4 sm:$0xff]  }
 0x64e   :  { %v2342_v53 = vadd.f32 1.0, %v7009_v11  ;;  %v7011_v54 = vpop.eup %7010  ;;  %v6796_v11 = vld [vmem:[%s8775_s3 + $0x144] ss:$16 sps:$4 sm:$0xff]  }
 0x64f   :  { %7014 = vrcp.f32 %v2336_v52  ;;  %v7013_v59 = vpop.eup %7012  ;;  %v2349_v63 = vadd.f32 1.0, %v7011_v54  ;;  %v6799_v52 = vld [vmem:[%s8775_s3 + $0x14c] ss:$16 sps:$4 sm:$0xff]   ;;  %v6797_v54 = vld [vmem:[%s8775_s3 + $0x148] ss:$16 sps:$4 sm:$0xff]  }
 0x650   :  { %7016 = vrcp.f32 %v2342_v53  ;;  %v6794_v53 = vld [vmem:[%s8775_s3 + $0x140] ss:$16 sps:$4 sm:$0xff]  }
 0x651   :  { %7018 = vrcp.f32 %v2349_v63  ;;  %v6808_v63 = vld [vmem:[%s8775_s3 + $0x184] ss:$16 sps:$4 sm:$0xff]  }
 0x659   :  { %v7015_v60 = vpop.eup %7014 }
 0x65a   :  { %v7017_v58 = vpop.eup %7016  ;;  %v2354_v46 = vmul.f32 %v7015_v60, %v7013_v59  ;;  %v6802_v59 = vld [vmem:[%s8775_s3 + $0x164] ss:$16 sps:$4 sm:$0xff]   ;;  %v6805_v60 = vld [vmem:[%s8775_s3 + $0x16c] ss:$16 sps:$4 sm:$0xff]  }
 0x65b   :  { %v2353_v1 = vmul.f32 %v7017_v58, %v7934_v57  ;;  %v7019_v5 = vpop.eup %7018  ;;  %v6800_v58 = vld [vmem:[%s8775_s3 + $0x160] ss:$16 sps:$4 sm:$0xff]  }
 0x65d   :  { %v7980_v2 = vadd.f32 %v2354_v46, %v2353_v1  ;;  %v6803_v46 = vld [vmem:[%s8775_s3 + $0x168] ss:$16 sps:$4 sm:$0xff]   ;;  %v6811_v1 = vld [vmem:[%s8775_s3 + $0x18c] ss:$16 sps:$4 sm:$0xff]  }
 0x65f   :  { %7020 = vtanh.f32 %v7980_v2 }
 0x669   :  { %v7021_v7 = vpop.eup %7020 }
 0x66a   :  { %v7983_v8 = vmul.f32 %v7021_v7, %v7019_v5  ;;  %v6809_v5 = vld [vmem:[%s8775_s3 + $0x188] ss:$16 sps:$4 sm:$0xff]   ;;  %v6814_v7 = vld [vmem:[%s8775_s3 + $0x1a4] ss:$16 sps:$4 sm:$0xff]  }
 0x66c   :  { %v2370_v6 = vpack.c.bf16 %v7983_v8, %v7983_v8 }
 0x66e   :  { %2596 = vmatmul.mubr.bf16.vlgmr.msra.gmra.mrb[40].mxu0 %v2370_v6  ;;  %2637 = vmatmul.mubr.bf16.vlgmr.msra.gmra.mrb[40].mxu1 %v2370_v6  ;;  %v6817_v6 = vld [vmem:[%s8775_s3 + $0x1ac] ss:$16 sps:$4 sm:$0xff]  }
 0x66f   :  { %2880 = vmatpush1.bf16.msra.mxu0 %v7789_v19  ;;  %2921 = vmatpush1.bf16.msra.mxu1 %v7791_v9  ;;  %v6784_v19 = vld [vmem:[%s8775_s3 + $0x104] ss:$16 sps:$4 sm:$0xff]   ;;  %v6787_v9 = vld [vmem:[%s8775_s3 + $0x10c] ss:$16 sps:$4 sm:$0xff]  }
 0x670   :  { %2881 = vmatprep.subr.bf16.mxu0 %v7797_v24  ;;  %2922 = vmatprep.subr.bf16.mxu1 %v7799_v23 }
 0x671   :  { %2911 = vmatprep.mubr.bf16.mxu0 %v8811_v55  ;;  %2952 = vmatprep.mubr.bf16.mxu1 %v8811_v55 }
 0x673   :  { %2882 = vmatpush1.bf16.msra.mxu0 %v7801_v25  ;;  %2923 = vmatpush1.bf16.msra.mxu1 %v7803_v27  ;;  %v8825_v25 = vld [vmem:[#allocation29_spill] sm:$0xff] }
 0x674   :  { %2883 = vmatprep.subr.bf16.mxu0 %v7809_v26  ;;  %2924 = vmatprep.subr.bf16.mxu1 %v7811_v28  ;;  %v8826_v26 = vld [vmem:[#allocation30_spill] sm:$0xff] }
 0x677   :  { %2884 = vmatpush1.bf16.msra.mxu0 %v7813_v17  ;;  %2925 = vmatpush1.bf16.msra.mxu1 %v7815_v22 }
 0x678   :  { %2885 = vmatprep.subr.bf16.mxu0 %v7821_v35  ;;  %2926 = vmatprep.subr.bf16.mxu1 %v7823_v36  ;;  %v8827_v35 = vld [vmem:[#allocation31_spill] sm:$0xff] }
 0x67b   :  { %2886 = vmatpush1.bf16.msra.mxu0 %v7825_v20  ;;  %2927 = vmatpush1.bf16.msra.mxu1 %v7827_v29  ;;  %v8828_v20 = vld [vmem:[#allocation32_spill] sm:$0xff] }
 0x67c   :  { %2887 = vmatprep.subr.bf16.mxu0 %v7833_v33  ;;  %2928 = vmatprep.subr.bf16.mxu1 %v7835_v37 }
 0x67f   :  { %2888 = vmatpush1.bf16.msra.mxu0 %v7837_v45  ;;  %2929 = vmatpush1.bf16.msra.mxu1 %v7839_v30 }
 0x680   :  { %2889 = vmatprep.subr.bf16.mxu0 %v7843_v48  ;;  %2930 = vmatprep.subr.bf16.mxu1 %v7851_v34 }
 0x683   :  { %2890 = vmatpush1.bf16.msra.mxu0 %v7847_v16  ;;  %2931 = vmatpush1.bf16.msra.mxu1 %v7849_v31 }
 0x684   :  { %2891 = vmatprep.subr.bf16.mxu0 %v7854_v56  ;;  %2932 = vmatprep.subr.bf16.mxu1 %v7856_v15 }
 0x687   :  { %2892 = vmatpush1.bf16.msra.mxu0 %v7861_v18  ;;  %2933 = vmatpush1.bf16.msra.mxu1 %v7863_v0 }
 0x688   :  { %2893 = vmatprep.subr.bf16.mxu0 %v7867_v44  ;;  %2934 = vmatprep.subr.bf16.mxu1 %v7869_v38 }
 0x68b   :  { %2894 = vmatpush1.bf16.msra.mxu0 %v7873_v39  ;;  %2935 = vmatpush1.bf16.msra.mxu1 %v7875_v40 }
 0x68c   :  { %3226 = vmatprep.subr.bf16.mxu0 %v6784_v19  ;;  %3299 = vmatprep.subr.bf16.mxu1 %v6787_v9  ;;  %v6812_v19 = vld [vmem:[%s8775_s3 + $0x1a0] ss:$16 sps:$4 sm:$0xff]   ;;  %v6815_v9 = vld [vmem:[%s8775_s3 + $0x1a8] ss:$16 sps:$4 sm:$0xff]  }
 0x741   :  { %v2597_v24 = vpop.f32.mrb[40].mxu0  ;;  %v2638_v23 = vpop.f32.mrb[40].mxu1 }
 0x742   :  { %v2645_v27 = vadd.f32 %v2597_v24, %v8825_v25  ;;  %v2647_v28 = vadd.f32 %v2638_v23, %v8826_v26  ;;  %v2599_v17 = vpop.f32.mrb[41].mxu0  ;;  %v2640_v22 = vpop.f32.mrb[41].mxu1  ;;  %v6820_v24 = vld [vmem:[%s8775_s3 + $0x1c4] ss:$16 sps:$4 sm:$0xff]   ;;  %v6823_v23 = vld [vmem:[%s8775_s3 + $0x1cc] ss:$16 sps:$4 sm:$0xff]  }
 0x743   :  { %v2646_v36 = vadd.f32 %v2599_v17, %v8827_v35  ;;  %v2648_v29 = vadd.f32 %v2640_v22, %v8828_v20  ;;  %v2601_v33 = vpop.f32.mrb[42].mxu0  ;;  %v2642_v37 = vpop.f32.mrb[42].mxu1  ;;  %v6818_v25 = vld [vmem:[%s8775_s3 + $0x1c0] ss:$16 sps:$4 sm:$0xff]   ;;  %v6826_v26 = vld [vmem:[%s8775_s3 + $0x1e4] ss:$16 sps:$4 sm:$0xff]   ;;  %v3006_v35 = vpack.c.bf16 %v7735_v21, %v7689_v32  ;;  %v3008_v20 = vpack.c.bf16 %v7983_v8, %v7937_v62 }
 0x744   :  { %v6238_v45 = vmul.f32 -1.442695, %v2645_v27  ;;  %v2602_v30 = vpop.f32.mrb[43].mxu0  ;;  %v2643_v48 = vpop.f32.mrb[43].mxu1  ;;  %v6821_v27 = vld [vmem:[%s8775_s3 + $0x1c8] ss:$16 sps:$4 sm:$0xff]  }
 0x745   :  { %v6239_v16 = vmul.f32 -1.442695, %v2646_v36  ;;  %v6240_v31 = vmul.f32 -1.442695, %v2648_v29  ;;  %v6824_v17 = vld [vmem:[%s8775_s3 + $0x1e0] ss:$16 sps:$4 sm:$0xff]   ;;  %v3007_v36 = vpack.c.bf16 %v7891_v51, %v7779_v61 }
 0x746   :  { %7022 = vpow2.f32 %v6238_v45  ;;  %v6827_v22 = vld [vmem:[%s8775_s3 + $0x1e8] ss:$16 sps:$4 sm:$0xff]   ;;  %v8141_v32 = vld [vmem:[#allocation6 + $0x104] ss:$16 sps:$4 sm:$0xff]   ;;  %v8143_v21 = vld [vmem:[#allocation6 + $0x10c] ss:$16 sps:$4 sm:$0xff]  }
 0x747   :  { %7024 = vpow2.f32 %v6239_v16  ;;  %v8145_v61 = vld [vmem:[#allocation6 + $0x100] ss:$16 sps:$4 sm:$0xff]   ;;  %v8147_v51 = vld [vmem:[#allocation6 + $0x108] ss:$16 sps:$4 sm:$0xff]   ;;  %v8153_v62 = vld [vmem:[#allocation6 + $0x124] ss:$16 sps:$4 sm:$0xff]  }
 0x748   :  { %7026 = vpow2.f32 %v6240_v31  ;;  %v8155_v8 = vld [vmem:[#allocation6 + $0x12c] ss:$16 sps:$4 sm:$0xff]   ;;  %v8157_v29 = vld [vmem:[#allocation6 + $0x120] ss:$16 sps:$4 sm:$0xff]   ;;  %v8159_v33 = vld [vmem:[#allocation6 + $0x128] ss:$16 sps:$4 sm:$0xff]  }
 0x749   :  { %7028 = vtanh.f32 %v2647_v28  ;;  %v6829_v28 = vld [vmem:[%s8775_s3 + $0x1ec] ss:$16 sps:$4 sm:$0xff]   ;;  %v8165_v37 = vld [vmem:[#allocation6 + $0x144] ss:$16 sps:$4 sm:$0xff]   ;;  %v8169_v30 = vld [vmem:[#allocation6 + $0x140] ss:$16 sps:$4 sm:$0xff]  }
 0x74a   :  { %v8167_v45 = vld [vmem:[#allocation6 + $0x14c] ss:$16 sps:$4 sm:$0xff]   ;;  %v8171_v48 = vld [vmem:[#allocation6 + $0x148] ss:$16 sps:$4 sm:$0xff]   ;;  %v8177_v16 = vld [vmem:[#allocation6 + $0x160] ss:$16 sps:$4 sm:$0xff]  }
 0x74b   :  { %v8179_v31 = vld [vmem:[#allocation6 + $0x164] ss:$16 sps:$4 sm:$0xff]  }
 0x750   :  { %v7023_v34 = vpop.eup %7022 }
 0x751   :  { %v7025_v56 = vpop.eup %7024  ;;  %v2652_v15 = vadd.f32 1.0, %v7023_v34  ;;  %v8181_v34 = vld [vmem:[#allocation6 + $0x168] ss:$16 sps:$4 sm:$0xff]  }
 0x752   :  { %v2658_v18 = vadd.f32 1.0, %v7025_v56  ;;  %v7027_v0 = vpop.eup %7026  ;;  %v8183_v56 = vld [vmem:[#allocation6 + $0x16c] ss:$16 sps:$4 sm:$0xff]  }
 0x753   :  { %7030 = vrcp.f32 %v2652_v15  ;;  %v7029_v44 = vpop.eup %7028  ;;  %v2665_v57 = vadd.f32 1.0, %v7027_v0  ;;  %v8189_v15 = vld [vmem:[#allocation6 + $0x184] ss:$16 sps:$4 sm:$0xff]   ;;  %v8193_v0 = vld [vmem:[#allocation6 + $0x180] ss:$16 sps:$4 sm:$0xff]  }
 0x754   :  { %7032 = vrcp.f32 %v2658_v18  ;;  %v8191_v18 = vld [vmem:[#allocation6 + $0x18c] ss:$16 sps:$4 sm:$0xff]  }
 0x755   :  { %7034 = vrcp.f32 %v2665_v57  ;;  %v8207_v57 = vld [vmem:[#allocation6 + $0x1ac] ss:$16 sps:$4 sm:$0xff]  }
 0x75d   :  { %v7031_v38 = vpop.eup %7030 }
 0x75e   :  { %v7033_v39 = vpop.eup %7032  ;;  %v2670_v40 = vmul.f32 %v7031_v38, %v7029_v44  ;;  %v8195_v44 = vld [vmem:[#allocation6 + $0x188] ss:$16 sps:$4 sm:$0xff]   ;;  %v8201_v38 = vld [vmem:[#allocation6 + $0x1a0] ss:$16 sps:$4 sm:$0xff]  }
 0x75f   :  { %v2669_v10 = vmul.f32 %v7033_v39, %v7980_v2  ;;  %v7035_v13 = vpop.eup %7034  ;;  %v6806_v2 = vld [vmem:[%s8775_s3 + $0x180] ss:$16 sps:$4 sm:$0xff]   ;;  %v8203_v39 = vld [vmem:[#allocation6 + $0x1a4] ss:$16 sps:$4 sm:$0xff]  }
 0x761   :  { %v8030_v12 = vadd.f32 %v2670_v40, %v2669_v10  ;;  %v8205_v40 = vld [vmem:[#allocation6 + $0x1a8] ss:$16 sps:$4 sm:$0xff]   ;;  %v8213_v10 = vld [vmem:[#allocation6 + $0x1c4] ss:$16 sps:$4 sm:$0xff]  }
 0x763   :  { %7036 = vtanh.f32 %v8030_v12 }
 0x76d   :  { %v7037_v4 = vpop.eup %7036 }
 0x76e   :  { %v8033_v41 = vmul.f32 %v7037_v4, %v7035_v13  ;;  %v8215_v13 = vld [vmem:[#allocation6 + $0x1cc] ss:$16 sps:$4 sm:$0xff]   ;;  %v8217_v4 = vld [vmem:[#allocation6 + $0x1c0] ss:$16 sps:$4 sm:$0xff]  }
 0x770   :  { %v2686_v47 = vpack.c.bf16 %v8033_v41, %v8033_v41 }
 0x772   :  { %2912 = vmatmul.mubr.bf16.vlgmr.msra.gmra.mrb[44].mxu0 %v2686_v47  ;;  %2953 = vmatmul.mubr.bf16.vlgmr.msra.gmra.mrb[44].mxu1 %v2686_v47  ;;  %v8227_v47 = vld [vmem:[#allocation6 + $0x1e4] ss:$16 sps:$4 sm:$0xff]  }
 0x773   :  { %3227 = vmatpush1.bf16.msra.mxu0 %v6782_v42  ;;  %3300 = vmatpush1.bf16.msra.mxu1 %v6785_v43  ;;  %v8219_v42 = vld [vmem:[#allocation6 + $0x1c8] ss:$16 sps:$4 sm:$0xff]   ;;  %v8225_v43 = vld [vmem:[#allocation6 + $0x1e0] ss:$16 sps:$4 sm:$0xff]  }
 0x774   :  { %3228 = vmatprep.subr.bf16.mxu0 %v6790_v50  ;;  %3301 = vmatprep.subr.bf16.mxu1 %v6793_v14  ;;  %v8229_v50 = vld [vmem:[#allocation6 + $0x1e8] ss:$16 sps:$4 sm:$0xff]   ;;  %v8231_v14 = vld [vmem:[#allocation6 + $0x1ec] ss:$16 sps:$4 sm:$0xff]  }
 0x775   :  { %3258 = vmatprep.mubr.bf16.mxu0 %v8811_v55  ;;  %3331 = vmatprep.mubr.bf16.mxu1 %v8811_v55 }
 0x777   :  { %3229 = vmatpush1.bf16.msra.mxu0 %v6788_v3  ;;  %3302 = vmatpush1.bf16.msra.mxu1 %v6791_v49 }
 0x778   :  { %3230 = vmatprep.subr.bf16.mxu0 %v6796_v11  ;;  %3303 = vmatprep.subr.bf16.mxu1 %v6799_v52  ;;  %v8829_v11 = vld [vmem:[#allocation33_spill] sm:$0xff] }
 0x77b   :  { %3231 = vmatpush1.bf16.msra.mxu0 %v6794_v53  ;;  %3304 = vmatpush1.bf16.msra.mxu1 %v6797_v54  ;;  %v8830_v53 = vld [vmem:[#allocation34_spill] sm:$0xff] }
 0x77c   :  { %3232 = vmatprep.subr.bf16.mxu0 %v6802_v59  ;;  %3305 = vmatprep.subr.bf16.mxu1 %v6805_v60 }
 0x77f   :  { %3233 = vmatpush1.bf16.msra.mxu0 %v6800_v58  ;;  %3306 = vmatpush1.bf16.msra.mxu1 %v6803_v46  ;;  %v8831_v58 = vld [vmem:[#allocation35_spill] sm:$0xff] }
 0x780   :  { %3234 = vmatprep.subr.bf16.mxu0 %v6808_v63  ;;  %3307 = vmatprep.subr.bf16.mxu1 %v6811_v1  ;;  %v8832_v63 = vld [vmem:[#allocation36_spill] sm:$0xff] }
 0x783   :  { %3235 = vmatpush1.bf16.msra.mxu0 %v6806_v2  ;;  %3308 = vmatpush1.bf16.msra.mxu1 %v6809_v5 }
 0x784   :  { %3236 = vmatprep.subr.bf16.mxu0 %v6814_v7  ;;  %3309 = vmatprep.subr.bf16.mxu1 %v6817_v6 }
 0x787   :  { %3237 = vmatpush1.bf16.msra.mxu0 %v6812_v19  ;;  %3310 = vmatpush1.bf16.msra.mxu1 %v6815_v9 }
 0x788   :  { %3238 = vmatprep.subr.bf16.mxu0 %v6820_v24  ;;  %3311 = vmatprep.subr.bf16.mxu1 %v6823_v23 }
 0x78b   :  { %3239 = vmatpush1.bf16.msra.mxu0 %v6818_v25  ;;  %3312 = vmatpush1.bf16.msra.mxu1 %v6821_v27 }
 0x78c   :  { %3240 = vmatprep.subr.bf16.mxu0 %v6826_v26  ;;  %3313 = vmatprep.subr.bf16.mxu1 %v6829_v28 }
 0x78f   :  { %3241 = vmatpush1.bf16.msra.mxu0 %v6824_v17  ;;  %3314 = vmatpush1.bf16.msra.mxu1 %v6827_v22 }
 0x790   :  { %3609 = vmatprep.subr.bf16.mxu0 %v8141_v32  ;;  %3650 = vmatprep.subr.bf16.mxu1 %v8143_v21 }
 0x792   :  { %3259 = vmatmul.mubr.bf16.vlgmr.msra.gmra.mrb[48].mxu0 %v3006_v35  ;;  %3332 = vmatmul.mubr.bf16.vlgmr.msra.gmra.mrb[48].mxu1 %v3006_v35 }
 0x793   :  { %3268 = vmatprep.mubr.bf16.mxu0 %v8811_v55  ;;  %3341 = vmatprep.mubr.bf16.mxu1 %v8811_v55 }
 0x794   :  { %3610 = vmatpush1.bf16.msra.mxu0 %v8145_v61  ;;  %3651 = vmatpush1.bf16.msra.mxu1 %v8147_v51 }
 0x795   :  { %3611 = vmatprep.subr.bf16.mxu0 %v8153_v62  ;;  %3652 = vmatprep.subr.bf16.mxu1 %v8155_v8 }
 0x798   :  { %3612 = vmatpush1.bf16.msra.mxu0 %v8157_v29  ;;  %3653 = vmatpush1.bf16.msra.mxu1 %v8159_v33 }
 0x799   :  { %3613 = vmatprep.subr.bf16.mxu0 %v8165_v37  ;;  %3654 = vmatprep.subr.bf16.mxu1 %v8167_v45 }
 0x79a   :  { %3269 = vmatmul.mubr.bf16.gmra.mrb[52].mxu0 %v3007_v36  ;;  %3342 = vmatmul.mubr.bf16.gmra.mrb[52].mxu1 %v3007_v36 }
 0x79b   :  { %3278 = vmatprep.mubr.bf16.mxu0 %v8811_v55  ;;  %3351 = vmatprep.mubr.bf16.mxu1 %v8811_v55 }
 0x79c   :  { %3614 = vmatpush1.bf16.msra.mxu0 %v8169_v30  ;;  %3655 = vmatpush1.bf16.msra.mxu1 %v8171_v48 }
 0x79d   :  { %3615 = vmatprep.subr.bf16.mxu0 %v8179_v31  ;;  %3656 = vmatprep.subr.bf16.mxu1 %v8183_v56 }
 0x7a0   :  { %3616 = vmatpush1.bf16.msra.mxu0 %v8177_v16  ;;  %3657 = vmatpush1.bf16.msra.mxu1 %v8181_v34 }
 0x7a1   :  { %3617 = vmatprep.subr.bf16.mxu0 %v8189_v15  ;;  %3658 = vmatprep.subr.bf16.mxu1 %v8191_v18 }
 0x7a2   :  { %3279 = vmatmul.mubr.bf16.gmra.mrb[56].mxu0 %v3008_v20  ;;  %3352 = vmatmul.mubr.bf16.gmra.mrb[56].mxu1 %v3008_v20 }
 0x7a3   :  { %3288 = vmatprep.mubr.bf16.mxu0 %v8811_v55  ;;  %3361 = vmatprep.mubr.bf16.mxu1 %v8811_v55 }
 0x7a4   :  { %3618 = vmatpush1.bf16.msra.mxu0 %v8193_v0  ;;  %3659 = vmatpush1.bf16.msra.mxu1 %v8195_v44 }
 0x7a5   :  { %3619 = vmatprep.subr.bf16.mxu0 %v8203_v39  ;;  %3660 = vmatprep.subr.bf16.mxu1 %v8207_v57 }
 0x7a8   :  { %3620 = vmatpush1.bf16.msra.mxu0 %v8201_v38  ;;  %3661 = vmatpush1.bf16.msra.mxu1 %v8205_v40 }
 0x7a9   :  { %3621 = vmatprep.subr.bf16.mxu0 %v8213_v10  ;;  %3662 = vmatprep.subr.bf16.mxu1 %v8215_v13 }
 0x7ac   :  { %3622 = vmatpush1.bf16.msra.mxu0 %v8217_v4  ;;  %3663 = vmatpush1.bf16.msra.mxu1 %v8219_v42 }
 0x7ad   :  { %3623 = vmatprep.subr.bf16.mxu0 %v8227_v47  ;;  %3664 = vmatprep.subr.bf16.mxu1 %v8231_v14 }
 0x7b0   :  { %3624 = vmatpush1.bf16.msra.mxu0 %v8225_v43  ;;  %3665 = vmatpush1.bf16.msra.mxu1 %v8229_v50 }
 0x7b1   :  { %3921 = vmatprep.subr.bf16.mxu0 %v8141_v32  ;;  %3962 = vmatprep.subr.bf16.mxu1 %v8143_v21 }
 0x845   :  { %v2913_v3 = vpop.f32.mrb[44].mxu0  ;;  %v2954_v49 = vpop.f32.mrb[44].mxu1 }
 0x846   :  { %v2961_v52 = vadd.f32 %v2913_v3, %v8829_v11  ;;  %v2963_v54 = vadd.f32 %v2954_v49, %v8830_v53  ;;  %v2915_v59 = vpop.f32.mrb[45].mxu0  ;;  %v2956_v60 = vpop.f32.mrb[45].mxu1 }
 0x847   :  { %v2962_v46 = vadd.f32 %v2915_v59, %v8831_v58  ;;  %v2964_v1 = vadd.f32 %v2956_v60, %v8832_v63  ;;  %v2917_v2 = vpop.f32.mrb[46].mxu0  ;;  %v2958_v5 = vpop.f32.mrb[46].mxu1 }
 0x848   :  { %v6273_v7 = vmul.f32 -1.442695, %v2961_v52  ;;  %v2918_v6 = vpop.f32.mrb[47].mxu0  ;;  %v2959_v19 = vpop.f32.mrb[47].mxu1 }
 0x849   :  { %v6274_v9 = vmul.f32 -1.442695, %v2962_v46  ;;  %v6275_v24 = vmul.f32 -1.442695, %v2964_v1 }
 0x84a   :  { %7038 = vpow2.f32 %v6273_v7 }
 0x84b   :  { %7040 = vpow2.f32 %v6274_v9 }
 0x84c   :  { %7042 = vpow2.f32 %v6275_v24 }
 0x84d   :  { %7044 = vtanh.f32 %v2963_v54 }
 0x854   :  { %v7039_v23 = vpop.eup %7038 }
 0x855   :  { %v7041_v25 = vpop.eup %7040  ;;  %v2968_v27 = vadd.f32 1.0, %v7039_v23 }
 0x856   :  { %v2974_v26 = vadd.f32 1.0, %v7041_v25  ;;  %v7043_v28 = vpop.eup %7042 }
 0x857   :  { %7046 = vrcp.f32 %v2968_v27  ;;  %v7045_v17 = vpop.eup %7044  ;;  %v2981_v20 = vadd.f32 1.0, %v7043_v28 }
 0x858   :  { %7048 = vrcp.f32 %v2974_v26 }
 0x859   :  { %7050 = vrcp.f32 %v2981_v20 }
 0x861   :  { %v7047_v22 = vpop.eup %7046 }
 0x862   :  { %v7049_v35 = vpop.eup %7048  ;;  %v2986_v36 = vmul.f32 %v7047_v22, %v7045_v17 }
 0x863   :  { %v2985_v3 = vmul.f32 %v7049_v35, %v8030_v12  ;;  %v7051_v6 = vpop.eup %7050 }
 0x865   :  { %v2987_v49 = vadd.f32 %v2986_v36, %v2985_v3  ;;  %v8244_v11 = vpop.f32.mrb[48].mxu0  ;;  %v8246_v52 = vpop.f32.mrb[48].mxu1 }
 0x866   :  { %v8248_v53 = vpop.f32.mrb[49].mxu0  ;;  %v8250_v54 = vpop.f32.mrb[49].mxu1 }
 0x867   :  { %2997 = vst [vmem:[#allocation10] sm:$0xff] %v2987_v49  ;;  %v8252_v59 = vpop.f32.mrb[50].mxu0  ;;  %v8254_v60 = vpop.f32.mrb[50].mxu1  ;;  %7052 = vtanh.f32 %v2987_v49  ;;  %v6308_v49 = vld [vmem:[%s8777_s5 + $0x4] sm:$0xf] }
 0x868   :  { %v8256_v58 = vpop.f32.mrb[51].mxu0  ;;  %v8258_v46 = vpop.f32.mrb[51].mxu1 }
 0x86d   :  { %v8260_v12 = vpop.f32.mrb[52].mxu0  ;;  %v8262_v63 = vpop.f32.mrb[52].mxu1 }
 0x86e   :  { %8833 = vst [vmem:[#allocation16_spill] sm:$0xff] %v8262_v63  ;;  %v8264_v1 = vpop.f32.mrb[53].mxu0  ;;  %v8266_v2 = vpop.f32.mrb[53].mxu1 }
 0x86f   :  { %8834 = vst [vmem:[#allocation17_spill] sm:$0xff] %v8264_v1  ;;  %8835 = vst [vmem:[#allocation18_spill] sm:$0xff] %v8266_v2  ;;  %v8268_v5 = vpop.f32.mrb[54].mxu0  ;;  %v8270_v7 = vpop.f32.mrb[54].mxu1 }
 0x870   :  { %8836 = vst [vmem:[#allocation19_spill] sm:$0xff] %v8268_v5  ;;  %8837 = vst [vmem:[#allocation20_spill] sm:$0xff] %v8270_v7  ;;  %v8272_v19 = vpop.f32.mrb[55].mxu0  ;;  %v8274_v9 = vpop.f32.mrb[55].mxu1 }
 0x871   :  { %8838 = vst [vmem:[#allocation21_spill] sm:$0xff] %v8272_v19  ;;  %8839 = vst [vmem:[#allocation22_spill] sm:$0xff] %v8274_v9  ;;  %v7053_v24 = vpop.eup %7052 }
 0x872   :  { %v2989_v23 = vmul.f32 %v7053_v24, %v7051_v6 }
 0x874   :  { %2995 = vst [vmem:[#allocation9] sm:$0xff] %v2989_v23  ;;  %v3009_v25 = vpack.c.bf16 %v2989_v23, %v8033_v41  ;;  %v6341_v41 = vld [vmem:[%s8773_s1 + $0x8] sm:$0xff] }
 0x875   :  { %v8277_v27 = vpop.f32.mrb[56].mxu0  ;;  %v8279_v26 = vpop.f32.mrb[56].mxu1  ;;  %v3415_v3 = vpack.c.bf16 %v6341_v41, %v6341_v41 }
 0x876   :  { %8840 = vst [vmem:[#allocation23_spill] sm:$0xff] %v8277_v27  ;;  %8841 = vst [vmem:[#allocation24_spill] sm:$0xff] %v8279_v26  ;;  %v8281_v28 = vpop.f32.mrb[57].mxu0  ;;  %v8283_v17 = vpop.f32.mrb[57].mxu1  ;;  %3289 = vmatmul.mubr.bf16.gmra.mrb[60].mxu0 %v3009_v25  ;;  %3362 = vmatmul.mubr.bf16.gmra.mrb[60].mxu1 %v3009_v25 }
 0x877   :  { %8842 = vst [vmem:[#allocation25_spill] sm:$0xff] %v8281_v28  ;;  %8843 = vst [vmem:[#allocation26_spill] sm:$0xff] %v8283_v17  ;;  %v8285_v22 = vpop.f32.mrb[58].mxu0  ;;  %v8287_v35 = vpop.f32.mrb[58].mxu1  ;;  %3641 = vmatprep.mubr.bf16.mxu0 %v8811_v55  ;;  %3682 = vmatprep.mubr.bf16.mxu1 %v8811_v55 }
 0x878   :  { %8844 = vst [vmem:[#allocation27_spill] sm:$0xff] %v8285_v22  ;;  %8845 = vst [vmem:[#allocation28_spill] sm:$0xff] %v8287_v35  ;;  %v8294_v36 = vpop.f32.mrb[59].mxu0  ;;  %v8296_v20 = vpop.f32.mrb[59].mxu1 }
 0x879   :  { %8846 = vst [vmem:[#allocation29_spill] sm:$0xff] %v8294_v36  ;;  %8847 = vst [vmem:[#allocation30_spill] sm:$0xff] %v8296_v20  ;;  %v8854_v20 = vld [vmem:[#allocation15_spill] sm:$0xff] }
 0x87a   :  { %v8855_v36 = vsub.s32 0, %v8854_v20  ;;  %v8856_v22 = vsub.s32 2, %v8854_v20 }
 0x87c   :  { %v8349_v35 = vrot.slane %v6308_v49, %v8855_v36  ;;  %v8353_v17 = vrot.slane %v6308_v49, %v8856_v22 }
 0x87e   :  { %3642 = vmatmul.mubr.bf16.vlgmr.msra.gmra.mrb[64].mxu0 %v3415_v3  ;;  %3683 = vmatmul.mubr.bf16.vlgmr.msra.gmra.mrb[64].mxu1 %v3415_v3  ;;  %v3261_v36 = vadd.f32 %v8244_v11, %v8349_v35 }
 0x87f   :  { %3922 = vmatpush1.bf16.msra.mxu0 %v8145_v61  ;;  %3963 = vmatpush1.bf16.msra.mxu1 %v8147_v51 }
 0x880   :  { %3923 = vmatprep.subr.bf16.mxu0 %v8153_v62  ;;  %3964 = vmatprep.subr.bf16.mxu1 %v8155_v8 }
 0x881   :  { %3953 = vmatprep.mubr.bf16.mxu0 %v8811_v55  ;;  %3994 = vmatprep.mubr.bf16.mxu1 %v8811_v55 }
 0x883   :  { %3924 = vmatpush1.bf16.msra.mxu0 %v8157_v29  ;;  %3965 = vmatpush1.bf16.msra.mxu1 %v8159_v33 }
 0x884   :  { %3925 = vmatprep.subr.bf16.mxu0 %v8165_v37  ;;  %3966 = vmatprep.subr.bf16.mxu1 %v8167_v45 }
 0x887   :  { %3926 = vmatpush1.bf16.msra.mxu0 %v8169_v30  ;;  %3967 = vmatpush1.bf16.msra.mxu1 %v8171_v48 }
 0x888   :  { %3927 = vmatprep.subr.bf16.mxu0 %v8179_v31  ;;  %3968 = vmatprep.subr.bf16.mxu1 %v8183_v56 }
 0x88b   :  { %3928 = vmatpush1.bf16.msra.mxu0 %v8177_v16  ;;  %3969 = vmatpush1.bf16.msra.mxu1 %v8181_v34 }
 0x88c   :  { %3929 = vmatprep.subr.bf16.mxu0 %v8189_v15  ;;  %3970 = vmatprep.subr.bf16.mxu1 %v8191_v18 }
 0x88f   :  { %3930 = vmatpush1.bf16.msra.mxu0 %v8193_v0  ;;  %3971 = vmatpush1.bf16.msra.mxu1 %v8195_v44 }
 0x890   :  { %3931 = vmatprep.subr.bf16.mxu0 %v8203_v39  ;;  %3972 = vmatprep.subr.bf16.mxu1 %v8207_v57 }
 0x893   :  { %3932 = vmatpush1.bf16.msra.mxu0 %v8201_v38  ;;  %3973 = vmatpush1.bf16.msra.mxu1 %v8205_v40 }
 0x894   :  { %3933 = vmatprep.subr.bf16.mxu0 %v8213_v10  ;;  %3974 = vmatprep.subr.bf16.mxu1 %v8215_v13 }
 0x897   :  { %3934 = vmatpush1.bf16.msra.mxu0 %v8217_v4  ;;  %3975 = vmatpush1.bf16.msra.mxu1 %v8219_v42 }
 0x898   :  { %3935 = vmatprep.subr.bf16.mxu0 %v8227_v47  ;;  %3976 = vmatprep.subr.bf16.mxu1 %v8231_v14 }
 0x89b   :  { %3936 = vmatpush1.bf16.msra.mxu0 %v8225_v43  ;;  %3977 = vmatpush1.bf16.msra.mxu1 %v8229_v50 }
 0x89c   :  { %4234 = vmatprep.subr.bf16.mxu0 %v8141_v32  ;;  %4275 = vmatprep.subr.bf16.mxu1 %v8143_v21 }
 0x949   :  { %v8335_v6 = vpop.f32.mrb[60].mxu0  ;;  %v8337_v24 = vpop.f32.mrb[60].mxu1 }
 0x94a   :  { %8848 = vst [vmem:[#allocation31_spill] sm:$0xff] %v8335_v6  ;;  %8849 = vst [vmem:[#allocation32_spill] sm:$0xff] %v8337_v24  ;;  %v8339_v23 = vpop.f32.mrb[61].mxu0  ;;  %v8341_v25 = vpop.f32.mrb[61].mxu1 }
 0x94b   :  { %8850 = vst [vmem:[#allocation33_spill] sm:$0xff] %v8339_v23  ;;  %8851 = vst [vmem:[#allocation34_spill] sm:$0xff] %v8341_v25  ;;  %v8343_v41 = vpop.f32.mrb[62].mxu0  ;;  %v8345_v3 = vpop.f32.mrb[62].mxu1  ;;  %v8859_v23 = vsub.s32 1, %v8854_v20 }
 0x94c   :  { %8852 = vst [vmem:[#allocation35_spill] sm:$0xff] %v8343_v41  ;;  %8853 = vst [vmem:[#allocation36_spill] sm:$0xff] %v8345_v3  ;;  %v8355_v28 = vpop.f32.mrb[63].mxu0  ;;  %v8357_v6 = vpop.f32.mrb[63].mxu1  ;;  %v8860_v41 = vsub.s32 3, %v8854_v20  ;;  %v3334_v3 = vadd.f32 %v8246_v52, %v8353_v17 }
 0x94d   :  { %8857 = vst [vmem:[#allocation15_spill] sm:$0xff] %v8355_v28  ;;  %8858 = vst [vmem:[#allocation37_spill] sm:$0xff] %v8357_v6  ;;  %v8361_v24 = vrot.slane %v6308_v49, %v8859_v23 }
 0x94e   :  { %v8365_v25 = vrot.slane %v6308_v49, %v8860_v41 }
 0x94f   :  { %v3263_v22 = vadd.f32 %v8248_v53, %v8361_v24 }
 0x950   :  { %v3336_v6 = vadd.f32 %v8250_v54, %v8365_v25 }
 0x951   :  { %v3643_v28 = vpop.f32.mrb[64].mxu0  ;;  %v3684_v26 = vpop.f32.mrb[64].mxu1 }
 0x952   :  { %v3691_v23 = vadd.f32 %v3643_v28, %v3261_v36  ;;  %v3693_v27 = vadd.f32 %v3684_v26, %v3334_v3  ;;  %v3645_v9 = vpop.f32.mrb[65].mxu0  ;;  %v3686_v20 = vpop.f32.mrb[65].mxu1 }
 0x953   :  { %v3692_v49 = vadd.f32 %v3645_v9, %v3263_v22  ;;  %v3694_v41 = vadd.f32 %v3686_v20, %v3336_v6  ;;  %v3647_v19 = vpop.f32.mrb[66].mxu0  ;;  %v3688_v7 = vpop.f32.mrb[66].mxu1  ;;  %v3338_v20 = vadd.f32 %v8254_v60, %v8353_v17 }
 0x954   :  { %v6375_v11 = vmul.f32 -1.442695, %v3691_v23  ;;  %v3648_v5 = vpop.f32.mrb[67].mxu0  ;;  %v3689_v2 = vpop.f32.mrb[67].mxu1  ;;  %v6342_v7 = vld [vmem:[%s8774_s2 + $0x8] sm:$0xff]  ;;  %v3265_v23 = vadd.f32 %v8252_v59, %v8349_v35 }
 0x955   :  { %v6376_v52 = vmul.f32 -1.442695, %v3692_v49  ;;  %v6377_v53 = vmul.f32 -1.442695, %v3694_v41  ;;  %v3267_v49 = vadd.f32 %v8256_v58, %v8361_v24  ;;  %v3340_v41 = vadd.f32 %v8258_v46, %v8365_v25 }
 0x956   :  { %7054 = vpow2.f32 %v6375_v11 }
 0x957   :  { %7056 = vpow2.f32 %v6376_v52 }
 0x958   :  { %7058 = vpow2.f32 %v6377_v53 }
 0x959   :  { %7060 = vtanh.f32 %v3693_v27 }
 0x960   :  { %v7055_v1 = vpop.eup %7054 }
 0x961   :  { %v7057_v63 = vpop.eup %7056  ;;  %v3698_v54 = vadd.f32 1.0, %v7055_v1 }
 0x962   :  { %v3704_v28 = vadd.f32 1.0, %v7057_v63  ;;  %v7059_v26 = vpop.eup %7058 }
 0x963   :  { %7062 = vrcp.f32 %v3698_v54  ;;  %v7061_v9 = vpop.eup %7060  ;;  %v3711_v6 = vadd.f32 1.0, %v7059_v26 }
 0x964   :  { %7064 = vrcp.f32 %v3704_v28 }
 0x965   :  { %7066 = vrcp.f32 %v3711_v6 }
 0x96d   :  { %v7063_v5 = vpop.eup %7062 }
 0x96e   :  { %v7065_v2 = vpop.eup %7064  ;;  %v3716_v19 = vmul.f32 %v7063_v5, %v7061_v9 }
 0x96f   :  { %v3715_v3 = vmul.f32 %v7065_v2, %v6342_v7  ;;  %v7067_v1 = vpop.eup %7066 }
 0x971   :  { %v8378_v36 = vadd.f32 %v3716_v19, %v3715_v3 }
 0x973   :  { %7068 = vtanh.f32 %v8378_v36 }
 0x97d   :  { %v7069_v63 = vpop.eup %7068 }
 0x97e   :  { %v3719_v27 = vmul.f32 %v7069_v63, %v7067_v1 }
 0x980   :  { %3722 = vst [vmem:[%s8778_s6] sm:$0xff] %v3719_v27  ;;  %v3728_v22 = vpack.c.bf16 %v3719_v27, %v3719_v27 }
 0x982   :  { %3954 = vmatmul.mubr.bf16.vlgmr.msra.gmra.mrb[68].mxu0 %v3728_v22  ;;  %3995 = vmatmul.mubr.bf16.vlgmr.msra.gmra.mrb[68].mxu1 %v3728_v22 }
 0x983   :  { %4235 = vmatpush1.bf16.msra.mxu0 %v8145_v61  ;;  %4276 = vmatpush1.bf16.msra.mxu1 %v8147_v51 }
 0x984   :  { %4236 = vmatprep.subr.bf16.mxu0 %v8153_v62  ;;  %4277 = vmatprep.subr.bf16.mxu1 %v8155_v8 }
 0x985   :  { %4266 = vmatprep.mubr.bf16.mxu0 %v8811_v55  ;;  %4307 = vmatprep.mubr.bf16.mxu1 %v8811_v55 }
 0x987   :  { %4237 = vmatpush1.bf16.msra.mxu0 %v8157_v29  ;;  %4278 = vmatpush1.bf16.msra.mxu1 %v8159_v33 }
 0x988   :  { %4238 = vmatprep.subr.bf16.mxu0 %v8165_v37  ;;  %4279 = vmatprep.subr.bf16.mxu1 %v8167_v45 }
 0x98b   :  { %4239 = vmatpush1.bf16.msra.mxu0 %v8169_v30  ;;  %4280 = vmatpush1.bf16.msra.mxu1 %v8171_v48 }
 0x98c   :  { %4240 = vmatprep.subr.bf16.mxu0 %v8179_v31  ;;  %4281 = vmatprep.subr.bf16.mxu1 %v8183_v56 }
 0x98f   :  { %4241 = vmatpush1.bf16.msra.mxu0 %v8177_v16  ;;  %4282 = vmatpush1.bf16.msra.mxu1 %v8181_v34 }
 0x990   :  { %4242 = vmatprep.subr.bf16.mxu0 %v8189_v15  ;;  %4283 = vmatprep.subr.bf16.mxu1 %v8191_v18 }
 0x993   :  { %4243 = vmatpush1.bf16.msra.mxu0 %v8193_v0  ;;  %4284 = vmatpush1.bf16.msra.mxu1 %v8195_v44 }
 0x994   :  { %4244 = vmatprep.subr.bf16.mxu0 %v8203_v39  ;;  %4285 = vmatprep.subr.bf16.mxu1 %v8207_v57 }
 0x997   :  { %4245 = vmatpush1.bf16.msra.mxu0 %v8201_v38  ;;  %4286 = vmatpush1.bf16.msra.mxu1 %v8205_v40 }
 0x998   :  { %4246 = vmatprep.subr.bf16.mxu0 %v8213_v10  ;;  %4287 = vmatprep.subr.bf16.mxu1 %v8215_v13 }
 0x99b   :  { %4247 = vmatpush1.bf16.msra.mxu0 %v8217_v4  ;;  %4288 = vmatpush1.bf16.msra.mxu1 %v8219_v42 }
 0x99c   :  { %4248 = vmatprep.subr.bf16.mxu0 %v8227_v47  ;;  %4289 = vmatprep.subr.bf16.mxu1 %v8231_v14 }
 0x99f   :  { %4249 = vmatpush1.bf16.msra.mxu0 %v8225_v43  ;;  %4290 = vmatpush1.bf16.msra.mxu1 %v8229_v50 }
 0x9a0   :  { %4547 = vmatprep.subr.bf16.mxu0 %v8141_v32  ;;  %4588 = vmatprep.subr.bf16.mxu1 %v8143_v21 }
 0xa55   :  { %v3955_v11 = vpop.f32.mrb[68].mxu0  ;;  %v3996_v52 = vpop.f32.mrb[68].mxu1 }
 0xa56   :  { %v4003_v53 = vadd.f32 %v3955_v11, %v3265_v23  ;;  %v4005_v54 = vadd.f32 %v3996_v52, %v3338_v20  ;;  %v3957_v28 = vpop.f32.mrb[69].mxu0  ;;  %v3998_v32 = vpop.f32.mrb[69].mxu1 }
 0xa57   :  { %v4004_v26 = vadd.f32 %v3957_v28, %v3267_v49  ;;  %v4006_v21 = vadd.f32 %v3998_v32, %v3340_v41  ;;  %v3959_v9 = vpop.f32.mrb[70].mxu0  ;;  %v4000_v7 = vpop.f32.mrb[70].mxu1 }
 0xa58   :  { %v6410_v59 = vmul.f32 -1.442695, %v4003_v53  ;;  %v3960_v5 = vpop.f32.mrb[71].mxu0  ;;  %v4001_v2 = vpop.f32.mrb[71].mxu1 }
 0xa59   :  { %v6411_v60 = vmul.f32 -1.442695, %v4004_v26  ;;  %v6412_v58 = vmul.f32 -1.442695, %v4006_v21  ;;  %v8484_v5 = vld [vmem:[#allocation6 + $0x10c] ss:$16 sps:$4 sm:$0xff]  }
 0xa5a   :  { %7070 = vpow2.f32 %v6410_v59  ;;  %v8482_v59 = vld [vmem:[#allocation6 + $0x104] ss:$16 sps:$4 sm:$0xff]   ;;  %v8486_v2 = vld [vmem:[#allocation6 + $0x100] ss:$16 sps:$4 sm:$0xff]  }
 0xa5b   :  { %7072 = vpow2.f32 %v6411_v60  ;;  %v8488_v60 = vld [vmem:[#allocation6 + $0x108] ss:$16 sps:$4 sm:$0xff]  }
 0xa5c   :  { %7074 = vpow2.f32 %v6412_v58  ;;  %v8494_v58 = vld [vmem:[#allocation6 + $0x124] ss:$16 sps:$4 sm:$0xff]  }
 0xa5d   :  { %7076 = vtanh.f32 %v4005_v54 }
 0xa64   :  { %v7071_v19 = vpop.eup %7070 }
 0xa65   :  { %v7073_v6 = vpop.eup %7072  ;;  %v4010_v46 = vadd.f32 1.0, %v7071_v19  ;;  %v8496_v19 = vld [vmem:[#allocation6 + $0x12c] ss:$16 sps:$4 sm:$0xff]  }
 0xa66   :  { %v4016_v3 = vadd.f32 1.0, %v7073_v6  ;;  %v7075_v1 = vpop.eup %7074  ;;  %v8498_v6 = vld [vmem:[#allocation6 + $0x120] ss:$16 sps:$4 sm:$0xff]  }
 0xa67   :  { %7078 = vrcp.f32 %v4010_v46  ;;  %v7077_v63 = vpop.eup %7076  ;;  %v4023_v20 = vadd.f32 1.0, %v7075_v1  ;;  %v8500_v46 = vld [vmem:[#allocation6 + $0x128] ss:$16 sps:$4 sm:$0xff]   ;;  %v8508_v1 = vld [vmem:[#allocation6 + $0x14c] ss:$16 sps:$4 sm:$0xff]  }
 0xa68   :  { %7080 = vrcp.f32 %v4016_v3  ;;  %v8506_v3 = vld [vmem:[#allocation6 + $0x144] ss:$16 sps:$4 sm:$0xff]  }
 0xa69   :  { %7082 = vrcp.f32 %v4023_v20  ;;  %v8522_v20 = vld [vmem:[#allocation6 + $0x160] ss:$16 sps:$4 sm:$0xff]  }
 0xa71   :  { %v7079_v27 = vpop.eup %7078 }
 0xa72   :  { %v7081_v22 = vpop.eup %7080  ;;  %v4028_v23 = vmul.f32 %v7079_v27, %v7077_v63  ;;  %v8510_v63 = vld [vmem:[#allocation6 + $0x140] ss:$16 sps:$4 sm:$0xff]   ;;  %v8512_v27 = vld [vmem:[#allocation6 + $0x148] ss:$16 sps:$4 sm:$0xff]  }
 0xa73   :  { %v4027_v49 = vmul.f32 %v7081_v22, %v8378_v36  ;;  %v7083_v11 = vpop.eup %7082  ;;  %v8518_v22 = vld [vmem:[#allocation6 + $0x164] ss:$16 sps:$4 sm:$0xff]  }
 0xa75   :  { %v8427_v41 = vadd.f32 %v4028_v23, %v4027_v49  ;;  %v8520_v23 = vld [vmem:[#allocation6 + $0x16c] ss:$16 sps:$4 sm:$0xff]   ;;  %v8524_v49 = vld [vmem:[#allocation6 + $0x168] ss:$16 sps:$4 sm:$0xff]  }
 0xa77   :  { %7084 = vtanh.f32 %v8427_v41 }
 0xa81   :  { %v7085_v52 = vpop.eup %7084 }
 0xa82   :  { %v4031_v53 = vmul.f32 %v7085_v52, %v7083_v11  ;;  %v8532_v11 = vld [vmem:[#allocation6 + $0x18c] ss:$16 sps:$4 sm:$0xff]   ;;  %v8534_v52 = vld [vmem:[#allocation6 + $0x180] ss:$16 sps:$4 sm:$0xff]  }
 0xa84   :  { %6413 = vst [vmem:[%s8778_s6 + $0x8] sm:$0xff] %v4031_v53  ;;  %v4041_v54 = vpack.c.bf16 %v4031_v53, %v4031_v53  ;;  %v8536_v53 = vld [vmem:[#allocation6 + $0x188] ss:$16 sps:$4 sm:$0xff]  }
 0xa86   :  { %4267 = vmatmul.mubr.bf16.vlgmr.msra.gmra.mrb[72].mxu0 %v4041_v54  ;;  %4308 = vmatmul.mubr.bf16.vlgmr.msra.gmra.mrb[72].mxu1 %v4041_v54  ;;  %v8540_v54 = vld [vmem:[#allocation6 + $0x1a4] ss:$16 sps:$4 sm:$0xff]  }
 0xa87   :  { %4548 = vmatpush1.bf16.msra.mxu0 %v8145_v61  ;;  %4589 = vmatpush1.bf16.msra.mxu1 %v8147_v51  ;;  %v3271_v61 = vadd.f32 %v8260_v12, %v8349_v35  ;;  %v8861_v51 = vld [vmem:[#allocation16_spill] sm:$0xff] }
 0xa88   :  { %4549 = vmatprep.subr.bf16.mxu0 %v8153_v62  ;;  %4590 = vmatprep.subr.bf16.mxu1 %v8155_v8  ;;  %v3344_v62 = vadd.f32 %v8861_v51, %v8353_v17  ;;  %v8862_v8 = vld [vmem:[#allocation17_spill] sm:$0xff]  ;;  %v8546_v51 = vld [vmem:[#allocation6 + $0x1a8] ss:$16 sps:$4 sm:$0xff]  }
 0xa89   :  { %4579 = vmatprep.mubr.bf16.mxu0 %v8811_v55  ;;  %4620 = vmatprep.mubr.bf16.mxu1 %v8811_v55 }
 0xa8b   :  { %4550 = vmatpush1.bf16.msra.mxu0 %v8157_v29  ;;  %4591 = vmatpush1.bf16.msra.mxu1 %v8159_v33  ;;  %v3273_v29 = vadd.f32 %v8862_v8, %v8361_v24  ;;  %v8863_v33 = vld [vmem:[#allocation18_spill] sm:$0xff]  ;;  %v8551_v8 = vld [vmem:[#allocation6 + $0x1c4] ss:$16 sps:$4 sm:$0xff]  }
 0xa8c   :  { %4551 = vmatprep.subr.bf16.mxu0 %v8165_v37  ;;  %4592 = vmatprep.subr.bf16.mxu1 %v8167_v45  ;;  %v3346_v37 = vadd.f32 %v8863_v33, %v8365_v25  ;;  %v8558_v33 = vld [vmem:[#allocation6 + $0x1c0] ss:$16 sps:$4 sm:$0xff]  }
 0xa8f   :  { %4552 = vmatpush1.bf16.msra.mxu0 %v8169_v30  ;;  %4593 = vmatpush1.bf16.msra.mxu1 %v8171_v48 }
 0xa90   :  { %4553 = vmatprep.subr.bf16.mxu0 %v8179_v31  ;;  %4594 = vmatprep.subr.bf16.mxu1 %v8183_v56 }
 0xa93   :  { %4554 = vmatpush1.bf16.msra.mxu0 %v8177_v16  ;;  %4595 = vmatpush1.bf16.msra.mxu1 %v8181_v34 }
 0xa94   :  { %4555 = vmatprep.subr.bf16.mxu0 %v8189_v15  ;;  %4596 = vmatprep.subr.bf16.mxu1 %v8191_v18 }
 0xa97   :  { %4556 = vmatpush1.bf16.msra.mxu0 %v8193_v0  ;;  %4597 = vmatpush1.bf16.msra.mxu1 %v8195_v44 }
 0xa98   :  { %4557 = vmatprep.subr.bf16.mxu0 %v8203_v39  ;;  %4598 = vmatprep.subr.bf16.mxu1 %v8207_v57 }
 0xa9b   :  { %4558 = vmatpush1.bf16.msra.mxu0 %v8201_v38  ;;  %4599 = vmatpush1.bf16.msra.mxu1 %v8205_v40 }
 0xa9c   :  { %4559 = vmatprep.subr.bf16.mxu0 %v8213_v10  ;;  %4600 = vmatprep.subr.bf16.mxu1 %v8215_v13 }
 0xa9f   :  { %4560 = vmatpush1.bf16.msra.mxu0 %v8217_v4  ;;  %4601 = vmatpush1.bf16.msra.mxu1 %v8219_v42 }
 0xaa0   :  { %4561 = vmatprep.subr.bf16.mxu0 %v8227_v47  ;;  %4602 = vmatprep.subr.bf16.mxu1 %v8231_v14 }
 0xaa3   :  { %4562 = vmatpush1.bf16.msra.mxu0 %v8225_v43  ;;  %4603 = vmatpush1.bf16.msra.mxu1 %v8229_v50 }
 0xaa4   :  { %4860 = vmatprep.subr.bf16.mxu0 %v8482_v59  ;;  %4901 = vmatprep.subr.bf16.mxu1 %v8484_v5 }
 0xb59   :  { %v4268_v45 = vpop.f32.mrb[72].mxu0  ;;  %v4309_v30 = vpop.f32.mrb[72].mxu1 }
 0xb5a   :  { %v4316_v48 = vadd.f32 %v4268_v45, %v3271_v61  ;;  %v4318_v16 = vadd.f32 %v4309_v30, %v3344_v62  ;;  %v4270_v31 = vpop.f32.mrb[73].mxu0  ;;  %v4311_v34 = vpop.f32.mrb[73].mxu1  ;;  %v8544_v61 = vld [vmem:[#allocation6 + $0x1a0] ss:$16 sps:$4 sm:$0xff]   ;;  %v8548_v62 = vld [vmem:[#allocation6 + $0x1ac] ss:$16 sps:$4 sm:$0xff]  }
 0xb5b   :  { %v4317_v56 = vadd.f32 %v4270_v31, %v3273_v29  ;;  %v4319_v15 = vadd.f32 %v4311_v34, %v3346_v37  ;;  %v4272_v18 = vpop.f32.mrb[74].mxu0  ;;  %v4313_v0 = vpop.f32.mrb[74].mxu1  ;;  %v8553_v29 = vld [vmem:[#allocation6 + $0x1cc] ss:$16 sps:$4 sm:$0xff]   ;;  %v8560_v37 = vld [vmem:[#allocation6 + $0x1c8] ss:$16 sps:$4 sm:$0xff]  }
 0xb5c   :  { %v6446_v44 = vmul.f32 -1.442695, %v4316_v48  ;;  %v4273_v38 = vpop.f32.mrb[75].mxu0  ;;  %v4314_v39 = vpop.f32.mrb[75].mxu1  ;;  %v8564_v45 = vld [vmem:[#allocation6 + $0x1e4] ss:$16 sps:$4 sm:$0xff]  }
 0xb5d   :  { %v6447_v40 = vmul.f32 -1.442695, %v4317_v56  ;;  %v6448_v57 = vmul.f32 -1.442695, %v4319_v15  ;;  %v8566_v30 = vld [vmem:[#allocation6 + $0x1ec] ss:$16 sps:$4 sm:$0xff]  }
 0xb5e   :  { %7086 = vpow2.f32 %v6446_v44  ;;  %v8570_v48 = vld [vmem:[#allocation6 + $0x1e0] ss:$16 sps:$4 sm:$0xff]   ;;  %v8865_v56 = vld [vmem:[#allocation20_spill] sm:$0xff]  ;;  %v8867_v44 = vld [vmem:[#allocation22_spill] sm:$0xff] }
 0xb5f   :  { %7088 = vpow2.f32 %v6447_v40  ;;  %v8864_v31 = vld [vmem:[#allocation19_spill] sm:$0xff]  ;;  %v3348_v15 = vadd.f32 %v8865_v56, %v8353_v17  ;;  %v8866_v18 = vld [vmem:[#allocation21_spill] sm:$0xff]  ;;  %v3350_v38 = vadd.f32 %v8867_v44, %v8365_v25 }
 0xb60   :  { %7090 = vpow2.f32 %v6448_v57  ;;  %v3275_v34 = vadd.f32 %v8864_v31, %v8349_v35  ;;  %v3277_v0 = vadd.f32 %v8866_v18, %v8361_v24 }
 0xb61   :  { %7092 = vtanh.f32 %v4318_v16  ;;  %v8572_v16 = vld [vmem:[#allocation6 + $0x1e8] ss:$16 sps:$4 sm:$0xff]  }
 0xb68   :  { %v7087_v10 = vpop.eup %7086 }
 0xb69   :  { %v7089_v13 = vpop.eup %7088  ;;  %v4323_v4 = vadd.f32 1.0, %v7087_v10 }
 0xb6a   :  { %v4329_v42 = vadd.f32 1.0, %v7089_v13  ;;  %v7091_v43 = vpop.eup %7090 }
 0xb6b   :  { %7094 = vrcp.f32 %v4323_v4  ;;  %v7093_v47 = vpop.eup %7092  ;;  %v4336_v36 = vadd.f32 1.0, %v7091_v43 }
 0xb6c   :  { %7096 = vrcp.f32 %v4329_v42 }
 0xb6d   :  { %7098 = vrcp.f32 %v4336_v36 }
 0xb75   :  { %v7095_v50 = vpop.eup %7094 }
 0xb76   :  { %v7097_v14 = vpop.eup %7096  ;;  %v4341_v12 = vmul.f32 %v7095_v50, %v7093_v47 }
 0xb77   :  { %v4340_v28 = vmul.f32 %v7097_v14, %v8427_v41  ;;  %v7099_v26 = vpop.eup %7098  ;;  %v8530_v41 = vld [vmem:[#allocation6 + $0x184] ss:$16 sps:$4 sm:$0xff]  }
 0xb79   :  { %v8474_v32 = vadd.f32 %v4341_v12, %v4340_v28 }
 0xb7b   :  { %7100 = vtanh.f32 %v8474_v32 }
 0xb85   :  { %v7101_v21 = vpop.eup %7100 }
 0xb86   :  { %v4344_v9 = vmul.f32 %v7101_v21, %v7099_v26 }
 0xb88   :  { %6449 = vst [vmem:[%s8778_s6 + $0x10] sm:$0xff] %v4344_v9  ;;  %v4354_v7 = vpack.c.bf16 %v4344_v9, %v4344_v9 }
 0xb8a   :  { %4580 = vmatmul.mubr.bf16.vlgmr.msra.gmra.mrb[76].mxu0 %v4354_v7  ;;  %4621 = vmatmul.mubr.bf16.vlgmr.msra.gmra.mrb[76].mxu1 %v4354_v7 }
 0xb8b   :  { %4892 = vmatprep.mubr.bf16.mxu0 %v8811_v55  ;;  %4933 = vmatprep.mubr.bf16.mxu1 %v8811_v55 }
 0xb8c   :  { %4861 = vmatpush1.bf16.msra.mxu0 %v8486_v2  ;;  %4902 = vmatpush1.bf16.msra.mxu1 %v8488_v60 }
 0xb8d   :  { %4862 = vmatprep.subr.bf16.mxu0 %v8494_v58  ;;  %4903 = vmatprep.subr.bf16.mxu1 %v8496_v19 }
 0xb90   :  { %4863 = vmatpush1.bf16.msra.mxu0 %v8498_v6  ;;  %4904 = vmatpush1.bf16.msra.mxu1 %v8500_v46 }
 0xb91   :  { %4864 = vmatprep.subr.bf16.mxu0 %v8506_v3  ;;  %4905 = vmatprep.subr.bf16.mxu1 %v8508_v1 }
 0xb94   :  { %4865 = vmatpush1.bf16.msra.mxu0 %v8510_v63  ;;  %4906 = vmatpush1.bf16.msra.mxu1 %v8512_v27 }
 0xb95   :  { %4866 = vmatprep.subr.bf16.mxu0 %v8518_v22  ;;  %4907 = vmatprep.subr.bf16.mxu1 %v8520_v23 }
 0xb98   :  { %4867 = vmatpush1.bf16.msra.mxu0 %v8522_v20  ;;  %4908 = vmatpush1.bf16.msra.mxu1 %v8524_v49 }
 0xb99   :  { %4868 = vmatprep.subr.bf16.mxu0 %v8530_v41  ;;  %4909 = vmatprep.subr.bf16.mxu1 %v8532_v11 }
 0xb9c   :  { %4869 = vmatpush1.bf16.msra.mxu0 %v8534_v52  ;;  %4910 = vmatpush1.bf16.msra.mxu1 %v8536_v53 }
 0xb9d   :  { %4870 = vmatprep.subr.bf16.mxu0 %v8540_v54  ;;  %4911 = vmatprep.subr.bf16.mxu1 %v8548_v62 }
 0xba0   :  { %4871 = vmatpush1.bf16.msra.mxu0 %v8544_v61  ;;  %4912 = vmatpush1.bf16.msra.mxu1 %v8546_v51 }
 0xba1   :  { %4872 = vmatprep.subr.bf16.mxu0 %v8551_v8  ;;  %4913 = vmatprep.subr.bf16.mxu1 %v8553_v29 }
 0xba4   :  { %4873 = vmatpush1.bf16.msra.mxu0 %v8558_v33  ;;  %4914 = vmatpush1.bf16.msra.mxu1 %v8560_v37 }
 0xba5   :  { %4874 = vmatprep.subr.bf16.mxu0 %v8564_v45  ;;  %4915 = vmatprep.subr.bf16.mxu1 %v8566_v30 }
 0xba8   :  { %4875 = vmatpush1.bf16.msra.mxu0 %v8570_v48  ;;  %4916 = vmatpush1.bf16.msra.mxu1 %v8572_v16 }
 0xba9   :  { %5173 = vmatprep.subr.bf16.mxu0 %v8482_v59  ;;  %5214 = vmatprep.subr.bf16.mxu1 %v8484_v5 }
 0xc5d   :  { %v4581_v39 = vpop.f32.mrb[76].mxu0  ;;  %v4622_v40 = vpop.f32.mrb[76].mxu1 }
 0xc5e   :  { %v4629_v57 = vadd.f32 %v4581_v39, %v3275_v34  ;;  %v4631_v10 = vadd.f32 %v4622_v40, %v3348_v15  ;;  %v4583_v13 = vpop.f32.mrb[77].mxu0  ;;  %v4624_v4 = vpop.f32.mrb[77].mxu1 }
 0xc5f   :  { %v4630_v42 = vadd.f32 %v4583_v13, %v3277_v0  ;;  %v4632_v43 = vadd.f32 %v4624_v4, %v3350_v38  ;;  %v4585_v47 = vpop.f32.mrb[78].mxu0  ;;  %v4626_v50 = vpop.f32.mrb[78].mxu1 }
 0xc60   :  { %v6482_v14 = vmul.f32 -1.442695, %v4629_v57  ;;  %v4586_v12 = vpop.f32.mrb[79].mxu0  ;;  %v4627_v36 = vpop.f32.mrb[79].mxu1  ;;  %v8870_v47 = vld [vmem:[#allocation25_spill] sm:$0xff] }
 0xc61   :  { %v6483_v28 = vmul.f32 -1.442695, %v4630_v42  ;;  %v6484_v26 = vmul.f32 -1.442695, %v4632_v43  ;;  %v8869_v42 = vld [vmem:[#allocation24_spill] sm:$0xff]  ;;  %v3283_v50 = vadd.f32 %v8870_v47, %v8361_v24 }
 0xc62   :  { %7102 = vpow2.f32 %v6482_v14  ;;  %v3354_v43 = vadd.f32 %v8869_v42, %v8353_v17  ;;  %v8871_v14 = vld [vmem:[#allocation26_spill] sm:$0xff] }
 0xc63   :  { %7104 = vpow2.f32 %v6483_v28  ;;  %v3356_v12 = vadd.f32 %v8871_v14, %v8365_v25 }
 0xc64   :  { %7106 = vpow2.f32 %v6484_v26 }
 0xc65   :  { %7108 = vtanh.f32 %v4631_v10 }
 0xc6c   :  { %v7103_v21 = vpop.eup %7102 }
 0xc6d   :  { %v7105_v9 = vpop.eup %7104  ;;  %v4636_v7 = vadd.f32 1.0, %v7103_v21 }
 0xc6e   :  { %v4642_v31 = vadd.f32 1.0, %v7105_v9  ;;  %v7107_v34 = vpop.eup %7106 }
 0xc6f   :  { %7110 = vrcp.f32 %v4636_v7  ;;  %v7109_v56 = vpop.eup %7108  ;;  %v4649_v44 = vadd.f32 1.0, %v7107_v34 }
 0xc70   :  { %7112 = vrcp.f32 %v4642_v31 }
 0xc71   :  { %7114 = vrcp.f32 %v4649_v44 }
 0xc79   :  { %v7111_v15 = vpop.eup %7110 }
 0xc7a   :  { %v7113_v18 = vpop.eup %7112  ;;  %v4654_v0 = vmul.f32 %v7111_v15, %v7109_v56 }
 0xc7b   :  { %v4653_v38 = vmul.f32 %v7113_v18, %v8474_v32  ;;  %v7115_v40 = vpop.eup %7114  ;;  %v8868_v32 = vld [vmem:[#allocation23_spill] sm:$0xff] }
 0xc7c   :  { %v3281_v4 = vadd.f32 %v8868_v32, %v8349_v35 }
 0xc7d   :  { %v8589_v39 = vadd.f32 %v4654_v0, %v4653_v38 }
 0xc7f   :  { %7116 = vtanh.f32 %v8589_v39 }
 0xc89   :  { %v7117_v57 = vpop.eup %7116 }
 0xc8a   :  { %v4657_v13 = vmul.f32 %v7117_v57, %v7115_v40 }
 0xc8c   :  { %6485 = vst [vmem:[%s8778_s6 + $0x18] sm:$0xff] %v4657_v13  ;;  %v4667_v10 = vpack.c.bf16 %v4657_v13, %v4657_v13 }
 0xc8e   :  { %4893 = vmatmul.mubr.bf16.vlgmr.msra.gmra.mrb[80].mxu0 %v4667_v10  ;;  %4934 = vmatmul.mubr.bf16.vlgmr.msra.gmra.mrb[80].mxu1 %v4667_v10 }
 0xc8f   :  { %5174 = vmatpush1.bf16.msra.mxu0 %v8486_v2  ;;  %5215 = vmatpush1.bf16.msra.mxu1 %v8488_v60 }
 0xc90   :  { %5175 = vmatprep.subr.bf16.mxu0 %v8494_v58  ;;  %5216 = vmatprep.subr.bf16.mxu1 %v8496_v19 }
 0xc91   :  { %5205 = vmatprep.mubr.bf16.mxu0 %v8811_v55  ;;  %5246 = vmatprep.mubr.bf16.mxu1 %v8811_v55 }
 0xc93   :  { %5176 = vmatpush1.bf16.msra.mxu0 %v8498_v6  ;;  %5217 = vmatpush1.bf16.msra.mxu1 %v8500_v46 }
 0xc94   :  { %5177 = vmatprep.subr.bf16.mxu0 %v8506_v3  ;;  %5218 = vmatprep.subr.bf16.mxu1 %v8508_v1 }
 0xc97   :  { %5178 = vmatpush1.bf16.msra.mxu0 %v8510_v63  ;;  %5219 = vmatpush1.bf16.msra.mxu1 %v8512_v27 }
 0xc98   :  { %5179 = vmatprep.subr.bf16.mxu0 %v8518_v22  ;;  %5220 = vmatprep.subr.bf16.mxu1 %v8520_v23 }
 0xc9b   :  { %5180 = vmatpush1.bf16.msra.mxu0 %v8522_v20  ;;  %5221 = vmatpush1.bf16.msra.mxu1 %v8524_v49 }
 0xc9c   :  { %5181 = vmatprep.subr.bf16.mxu0 %v8530_v41  ;;  %5222 = vmatprep.subr.bf16.mxu1 %v8532_v11 }
 0xc9f   :  { %5182 = vmatpush1.bf16.msra.mxu0 %v8534_v52  ;;  %5223 = vmatpush1.bf16.msra.mxu1 %v8536_v53 }
 0xca0   :  { %5183 = vmatprep.subr.bf16.mxu0 %v8540_v54  ;;  %5224 = vmatprep.subr.bf16.mxu1 %v8548_v62 }
 0xca3   :  { %5184 = vmatpush1.bf16.msra.mxu0 %v8544_v61  ;;  %5225 = vmatpush1.bf16.msra.mxu1 %v8546_v51 }
 0xca4   :  { %5185 = vmatprep.subr.bf16.mxu0 %v8551_v8  ;;  %5226 = vmatprep.subr.bf16.mxu1 %v8553_v29 }
 0xca7   :  { %5186 = vmatpush1.bf16.msra.mxu0 %v8558_v33  ;;  %5227 = vmatpush1.bf16.msra.mxu1 %v8560_v37 }
 0xca8   :  { %5187 = vmatprep.subr.bf16.mxu0 %v8564_v45  ;;  %5228 = vmatprep.subr.bf16.mxu1 %v8566_v30 }
 0xcab   :  { %5188 = vmatpush1.bf16.msra.mxu0 %v8570_v48  ;;  %5229 = vmatpush1.bf16.msra.mxu1 %v8572_v16 }
 0xcac   :  { %5486 = vmatprep.subr.bf16.mxu0 %v8482_v59  ;;  %5527 = vmatprep.subr.bf16.mxu1 %v8484_v5 }
 0xd61   :  { %v4894_v36 = vpop.f32.mrb[80].mxu0  ;;  %v4935_v28 = vpop.f32.mrb[80].mxu1 }
 0xd62   :  { %v4942_v26 = vadd.f32 %v4894_v36, %v3281_v4  ;;  %v4944_v21 = vadd.f32 %v4935_v28, %v3354_v43  ;;  %v4896_v9 = vpop.f32.mrb[81].mxu0  ;;  %v4937_v7 = vpop.f32.mrb[81].mxu1 }
 0xd63   :  { %v4943_v31 = vadd.f32 %v4896_v9, %v3283_v50  ;;  %v4945_v34 = vadd.f32 %v4937_v7, %v3356_v12  ;;  %v4898_v56 = vpop.f32.mrb[82].mxu0  ;;  %v4939_v15 = vpop.f32.mrb[82].mxu1 }
 0xd64   :  { %v6518_v18 = vmul.f32 -1.442695, %v4942_v26  ;;  %v4899_v0 = vpop.f32.mrb[83].mxu0  ;;  %v4940_v44 = vpop.f32.mrb[83].mxu1  ;;  %v8874_v56 = vld [vmem:[#allocation29_spill] sm:$0xff] }
 0xd65   :  { %v6519_v38 = vmul.f32 -1.442695, %v4943_v31  ;;  %v6520_v40 = vmul.f32 -1.442695, %v4945_v34  ;;  %v8873_v31 = vld [vmem:[#allocation28_spill] sm:$0xff]  ;;  %v3287_v15 = vadd.f32 %v8874_v56, %v8361_v24 }
 0xd66   :  { %7118 = vpow2.f32 %v6518_v18  ;;  %v3358_v34 = vadd.f32 %v8873_v31, %v8353_v17  ;;  %v8875_v18 = vld [vmem:[#allocation30_spill] sm:$0xff] }
 0xd67   :  { %7120 = vpow2.f32 %v6519_v38  ;;  %v3360_v0 = vadd.f32 %v8875_v18, %v8365_v25 }
 0xd68   :  { %7122 = vpow2.f32 %v6520_v40 }
 0xd69   :  { %7124 = vtanh.f32 %v4944_v21 }
 0xd70   :  { %v7119_v57 = vpop.eup %7118 }
 0xd71   :  { %v7121_v13 = vpop.eup %7120  ;;  %v4949_v10 = vadd.f32 1.0, %v7119_v57 }
 0xd72   :  { %v4955_v32 = vadd.f32 1.0, %v7121_v13  ;;  %v7123_v4 = vpop.eup %7122 }
 0xd73   :  { %7126 = vrcp.f32 %v4949_v10  ;;  %v7125_v42 = vpop.eup %7124  ;;  %v4962_v14 = vadd.f32 1.0, %v7123_v4 }
 0xd74   :  { %7128 = vrcp.f32 %v4955_v32 }
 0xd75   :  { %7130 = vrcp.f32 %v4962_v14 }
 0xd7d   :  { %v7127_v43 = vpop.eup %7126 }
 0xd7e   :  { %v7129_v47 = vpop.eup %7128  ;;  %v4967_v50 = vmul.f32 %v7127_v43, %v7125_v42 }
 0xd7f   :  { %v4966_v12 = vmul.f32 %v7129_v47, %v8589_v39  ;;  %v7131_v28 = vpop.eup %7130  ;;  %v8872_v39 = vld [vmem:[#allocation27_spill] sm:$0xff] }
 0xd80   :  { %v3285_v7 = vadd.f32 %v8872_v39, %v8349_v35 }
 0xd81   :  { %v8638_v36 = vadd.f32 %v4967_v50, %v4966_v12 }
 0xd83   :  { %7132 = vtanh.f32 %v8638_v36 }
 0xd8d   :  { %v7133_v26 = vpop.eup %7132 }
 0xd8e   :  { %v4970_v9 = vmul.f32 %v7133_v26, %v7131_v28 }
 0xd90   :  { %6521 = vst [vmem:[%s8778_s6 + $0x20] sm:$0xff] %v4970_v9  ;;  %v4980_v21 = vpack.c.bf16 %v4970_v9, %v4970_v9 }
 0xd92   :  { %5206 = vmatmul.mubr.bf16.vlgmr.msra.gmra.mrb[84].mxu0 %v4980_v21  ;;  %5247 = vmatmul.mubr.bf16.vlgmr.msra.gmra.mrb[84].mxu1 %v4980_v21 }
 0xd93   :  { %5487 = vmatpush1.bf16.msra.mxu0 %v8486_v2  ;;  %5528 = vmatpush1.bf16.msra.mxu1 %v8488_v60 }
 0xd94   :  { %5488 = vmatprep.subr.bf16.mxu0 %v8494_v58  ;;  %5529 = vmatprep.subr.bf16.mxu1 %v8496_v19 }
 0xd95   :  { %5518 = vmatprep.mubr.bf16.mxu0 %v8811_v55  ;;  %5559 = vmatprep.mubr.bf16.mxu1 %v8811_v55 }
 0xd97   :  { %5489 = vmatpush1.bf16.msra.mxu0 %v8498_v6  ;;  %5530 = vmatpush1.bf16.msra.mxu1 %v8500_v46 }
 0xd98   :  { %5490 = vmatprep.subr.bf16.mxu0 %v8506_v3  ;;  %5531 = vmatprep.subr.bf16.mxu1 %v8508_v1 }
 0xd9b   :  { %5491 = vmatpush1.bf16.msra.mxu0 %v8510_v63  ;;  %5532 = vmatpush1.bf16.msra.mxu1 %v8512_v27 }
 0xd9c   :  { %5492 = vmatprep.subr.bf16.mxu0 %v8518_v22  ;;  %5533 = vmatprep.subr.bf16.mxu1 %v8520_v23 }
 0xd9f   :  { %5493 = vmatpush1.bf16.msra.mxu0 %v8522_v20  ;;  %5534 = vmatpush1.bf16.msra.mxu1 %v8524_v49 }
 0xda0   :  { %5494 = vmatprep.subr.bf16.mxu0 %v8530_v41  ;;  %5535 = vmatprep.subr.bf16.mxu1 %v8532_v11 }
 0xda3   :  { %5495 = vmatpush1.bf16.msra.mxu0 %v8534_v52  ;;  %5536 = vmatpush1.bf16.msra.mxu1 %v8536_v53 }
 0xda4   :  { %5496 = vmatprep.subr.bf16.mxu0 %v8540_v54  ;;  %5537 = vmatprep.subr.bf16.mxu1 %v8548_v62 }
 0xda7   :  { %5497 = vmatpush1.bf16.msra.mxu0 %v8544_v61  ;;  %5538 = vmatpush1.bf16.msra.mxu1 %v8546_v51 }
 0xda8   :  { %5498 = vmatprep.subr.bf16.mxu0 %v8551_v8  ;;  %5539 = vmatprep.subr.bf16.mxu1 %v8553_v29 }
 0xdab   :  { %5499 = vmatpush1.bf16.msra.mxu0 %v8558_v33  ;;  %5540 = vmatpush1.bf16.msra.mxu1 %v8560_v37 }
 0xdac   :  { %5500 = vmatprep.subr.bf16.mxu0 %v8564_v45  ;;  %5541 = vmatprep.subr.bf16.mxu1 %v8566_v30 }
 0xdaf   :  { %5501 = vmatpush1.bf16.msra.mxu0 %v8570_v48  ;;  %5542 = vmatpush1.bf16.msra.mxu1 %v8572_v16 }
 0xdb0   :  { %5799 = vmatprep.subr.bf16.mxu0 %v8482_v59  ;;  %5840 = vmatprep.subr.bf16.mxu1 %v8484_v5 }
 0xe65   :  { %v5207_v44 = vpop.f32.mrb[84].mxu0  ;;  %v5248_v38 = vpop.f32.mrb[84].mxu1 }
 0xe66   :  { %v5255_v40 = vadd.f32 %v5207_v44, %v3285_v7  ;;  %v5257_v57 = vadd.f32 %v5248_v38, %v3358_v34  ;;  %v5209_v13 = vpop.f32.mrb[85].mxu0  ;;  %v5250_v59 = vpop.f32.mrb[85].mxu1 }
 0xe67   :  { %v5256_v10 = vadd.f32 %v5209_v13, %v3287_v15  ;;  %v5258_v5 = vadd.f32 %v5250_v59, %v3360_v0  ;;  %v5211_v32 = vpop.f32.mrb[86].mxu0  ;;  %v5252_v4 = vpop.f32.mrb[86].mxu1 }
 0xe68   :  { %v6554_v42 = vmul.f32 -1.442695, %v5255_v40  ;;  %v5212_v43 = vpop.f32.mrb[87].mxu0  ;;  %v5253_v47 = vpop.f32.mrb[87].mxu1 }
 0xe69   :  { %v6555_v50 = vmul.f32 -1.442695, %v5256_v10  ;;  %v6556_v14 = vmul.f32 -1.442695, %v5258_v5  ;;  %v8881_v47 = vld [vmem:[#allocation36_spill] sm:$0xff] }
 0xe6a   :  { %7134 = vpow2.f32 %v6554_v42  ;;  %v8880_v42 = vld [vmem:[#allocation35_spill] sm:$0xff] }
 0xe6b   :  { %7136 = vpow2.f32 %v6555_v50  ;;  %v3295_v43 = vadd.f32 %v8880_v42, %v8349_v35  ;;  %v3368_v50 = vadd.f32 %v8881_v47, %v8353_v17 }
 0xe6c   :  { %7138 = vpow2.f32 %v6556_v14  ;;  %v8882_v14 = vld [vmem:[#allocation15_spill] sm:$0xff] }
 0xe6d   :  { %7140 = vtanh.f32 %v5257_v57 }
 0xe74   :  { %v7135_v12 = vpop.eup %7134 }
 0xe75   :  { %v7137_v28 = vpop.eup %7136  ;;  %v5262_v26 = vadd.f32 1.0, %v7135_v12  ;;  %v3297_v12 = vadd.f32 %v8882_v14, %v8361_v24 }
 0xe76   :  { %v5268_v9 = vadd.f32 1.0, %v7137_v28  ;;  %v7139_v21 = vpop.eup %7138  ;;  %v8883_v28 = vld [vmem:[#allocation37_spill] sm:$0xff] }
 0xe77   :  { %7142 = vrcp.f32 %v5262_v26  ;;  %v7141_v39 = vpop.eup %7140  ;;  %v5275_v56 = vadd.f32 1.0, %v7139_v21  ;;  %v3370_v26 = vadd.f32 %v8883_v28, %v8365_v25 }
 0xe78   :  { %7144 = vrcp.f32 %v5268_v9 }
 0xe79   :  { %7146 = vrcp.f32 %v5275_v56 }
 0xe81   :  { %v7143_v7 = vpop.eup %7142 }
 0xe82   :  { %v7145_v31 = vpop.eup %7144  ;;  %v5280_v34 = vmul.f32 %v7143_v7, %v7141_v39 }
 0xe83   :  { %v5279_v15 = vmul.f32 %v7145_v31, %v8638_v36  ;;  %v7147_v0 = vpop.eup %7146 }
 0xe85   :  { %v8687_v18 = vadd.f32 %v5280_v34, %v5279_v15 }
 0xe87   :  { %7148 = vtanh.f32 %v8687_v18 }
 0xe91   :  { %v7149_v44 = vpop.eup %7148 }
 0xe92   :  { %v5283_v38 = vmul.f32 %v7149_v44, %v7147_v0 }
 0xe94   :  { %6557 = vst [vmem:[%s8778_s6 + $0x28] sm:$0xff] %v5283_v38  ;;  %v5293_v40 = vpack.c.bf16 %v5283_v38, %v5283_v38 }
 0xe96   :  { %5519 = vmatmul.mubr.bf16.vlgmr.msra.gmra.mrb[88].mxu0 %v5293_v40  ;;  %5560 = vmatmul.mubr.bf16.vlgmr.msra.gmra.mrb[88].mxu1 %v5293_v40 }
 0xe97   :  { %5800 = vmatpush1.bf16.msra.mxu0 %v8486_v2  ;;  %5841 = vmatpush1.bf16.msra.mxu1 %v8488_v60  ;;  %v8877_v60 = vld [vmem:[#allocation32_spill] sm:$0xff] }
 0xe98   :  { %5801 = vmatprep.subr.bf16.mxu0 %v8494_v58  ;;  %5842 = vmatprep.subr.bf16.mxu1 %v8496_v19  ;;  %v3364_v58 = vadd.f32 %v8877_v60, %v8353_v17  ;;  %v8878_v19 = vld [vmem:[#allocation33_spill] sm:$0xff] }
 0xe99   :  { %5831 = vmatprep.mubr.bf16.mxu0 %v8811_v55  ;;  %5872 = vmatprep.mubr.bf16.mxu1 %v8811_v55  ;;  %v8876_v55 = vld [vmem:[#allocation31_spill] sm:$0xff] }
 0xe9a   :  { %v3291_v2 = vadd.f32 %v8876_v55, %v8349_v35 }
 0xe9b   :  { %5802 = vmatpush1.bf16.msra.mxu0 %v8498_v6  ;;  %5843 = vmatpush1.bf16.msra.mxu1 %v8500_v46  ;;  %v3293_v6 = vadd.f32 %v8878_v19, %v8361_v24  ;;  %v8879_v46 = vld [vmem:[#allocation34_spill] sm:$0xff] }
 0xe9c   :  { %5803 = vmatprep.subr.bf16.mxu0 %v8506_v3  ;;  %5844 = vmatprep.subr.bf16.mxu1 %v8508_v1  ;;  %v3366_v3 = vadd.f32 %v8879_v46, %v8365_v25 }
 0xe9f   :  { %5804 = vmatpush1.bf16.msra.mxu0 %v8510_v63  ;;  %5845 = vmatpush1.bf16.msra.mxu1 %v8512_v27 }
 0xea0   :  { %5805 = vmatprep.subr.bf16.mxu0 %v8518_v22  ;;  %5846 = vmatprep.subr.bf16.mxu1 %v8520_v23 }
 0xea3   :  { %5806 = vmatpush1.bf16.msra.mxu0 %v8522_v20  ;;  %5847 = vmatpush1.bf16.msra.mxu1 %v8524_v49 }
 0xea4   :  { %5807 = vmatprep.subr.bf16.mxu0 %v8530_v41  ;;  %5848 = vmatprep.subr.bf16.mxu1 %v8532_v11 }
 0xea7   :  { %5808 = vmatpush1.bf16.msra.mxu0 %v8534_v52  ;;  %5849 = vmatpush1.bf16.msra.mxu1 %v8536_v53 }
 0xea8   :  { %5809 = vmatprep.subr.bf16.mxu0 %v8540_v54  ;;  %5850 = vmatprep.subr.bf16.mxu1 %v8548_v62 }
 0xeab   :  { %5810 = vmatpush1.bf16.msra.mxu0 %v8544_v61  ;;  %5851 = vmatpush1.bf16.msra.mxu1 %v8546_v51 }
 0xeac   :  { %5811 = vmatprep.subr.bf16.mxu0 %v8551_v8  ;;  %5852 = vmatprep.subr.bf16.mxu1 %v8553_v29 }
 0xeaf   :  { %5812 = vmatpush1.bf16.msra.mxu0 %v8558_v33  ;;  %5853 = vmatpush1.bf16.msra.mxu1 %v8560_v37 }
 0xeb0   :  { %5813 = vmatprep.subr.bf16.mxu0 %v8564_v45  ;;  %5854 = vmatprep.subr.bf16.mxu1 %v8566_v30 }
 0xeb3   :  { %5814 = vmatpush1.bf16.msra.mxu0 %v8570_v48  ;;  %5855 = vmatpush1.bf16.msra.mxu1 %v8572_v16 }
 0xf69   :  { %v5520_v1 = vpop.f32.mrb[88].mxu0  ;;  %v5561_v63 = vpop.f32.mrb[88].mxu1 }
 0xf6a   :  { %v5568_v27 = vadd.f32 %v5520_v1, %v3291_v2  ;;  %v5570_v22 = vadd.f32 %v5561_v63, %v3364_v58  ;;  %v5522_v23 = vpop.f32.mrb[89].mxu0  ;;  %v5563_v20 = vpop.f32.mrb[89].mxu1 }
 0xf6b   :  { %v5569_v49 = vadd.f32 %v5522_v23, %v3293_v6  ;;  %v5571_v41 = vadd.f32 %v5563_v20, %v3366_v3  ;;  %v5524_v11 = vpop.f32.mrb[90].mxu0  ;;  %v5565_v52 = vpop.f32.mrb[90].mxu1 }
 0xf6c   :  { %v6590_v53 = vmul.f32 -1.442695, %v5568_v27  ;;  %v5525_v54 = vpop.f32.mrb[91].mxu0  ;;  %v5566_v61 = vpop.f32.mrb[91].mxu1 }
 0xf6d   :  { %v6591_v51 = vmul.f32 -1.442695, %v5569_v49  ;;  %v6592_v62 = vmul.f32 -1.442695, %v5571_v41 }
 0xf6e   :  { %7150 = vpow2.f32 %v6590_v53 }
 0xf6f   :  { %7152 = vpow2.f32 %v6591_v51 }
 0xf70   :  { %7154 = vpow2.f32 %v6592_v62 }
 0xf71   :  { %7156 = vtanh.f32 %v5570_v22 }
 0xf78   :  { %v7151_v8 = vpop.eup %7150 }
 0xf79   :  { %v7153_v29 = vpop.eup %7152  ;;  %v5575_v33 = vadd.f32 1.0, %v7151_v8 }
 0xf7a   :  { %v5581_v37 = vadd.f32 1.0, %v7153_v29  ;;  %v7155_v45 = vpop.eup %7154 }
 0xf7b   :  { %7158 = vrcp.f32 %v5575_v33  ;;  %v7157_v30 = vpop.eup %7156  ;;  %v5588_v57 = vadd.f32 1.0, %v7155_v45 }
 0xf7c   :  { %7160 = vrcp.f32 %v5581_v37 }
 0xf7d   :  { %7162 = vrcp.f32 %v5588_v57 }
 0xf85   :  { %v7159_v48 = vpop.eup %7158 }
 0xf86   :  { %v7161_v16 = vpop.eup %7160  ;;  %v5593_v36 = vmul.f32 %v7159_v48, %v7157_v30 }
 0xf87   :  { %v5592_v13 = vmul.f32 %v7161_v16, %v8687_v18  ;;  %v7163_v10 = vpop.eup %7162 }
 0xf89   :  { %v5594_v59 = vadd.f32 %v5593_v36, %v5592_v13 }
 0xf8b   :  { %7164 = vtanh.f32 %v5594_v59 }
 0xf95   :  { %v7165_v5 = vpop.eup %7164 }
 0xf96   :  { %v5596_v32 = vmul.f32 %v7165_v5, %v7163_v10 }
 0xf98   :  { %6593 = vst [vmem:[%s8778_s6 + $0x30] sm:$0xff] %v5596_v32  ;;  %v5606_v4 = vpack.c.bf16 %v5596_v32, %v5596_v32 }
 0xf9a   :  { %5832 = vmatmul.mubr.bf16.vlgmr.msra.gmra.mrb[92].mxu0 %v5606_v4  ;;  %5873 = vmatmul.mubr.bf16.vlgmr.msra.gmra.mrb[92].mxu1 %v5606_v4 }
0x106d   :  { %v5833_v9 = vpop.f32.mrb[92].mxu0  ;;  %v5874_v21 = vpop.f32.mrb[92].mxu1 }
0x106e   :  { %v5881_v39 = vadd.f32 %v5833_v9, %v3295_v43  ;;  %v5883_v7 = vadd.f32 %v5874_v21, %v3368_v50  ;;  %v5835_v31 = vpop.f32.mrb[93].mxu0  ;;  %v5876_v34 = vpop.f32.mrb[93].mxu1 }
0x106f   :  { %v5882_v56 = vadd.f32 %v5835_v31, %v3297_v12  ;;  %v5884_v15 = vadd.f32 %v5876_v34, %v3370_v26  ;;  %v5837_v18 = vpop.f32.mrb[94].mxu0  ;;  %v5878_v0 = vpop.f32.mrb[94].mxu1 }
0x1070   :  { %v6626_v35 = vmul.f32 -1.442695, %v5881_v39  ;;  %v5838_v44 = vpop.f32.mrb[95].mxu0  ;;  %v5879_v38 = vpop.f32.mrb[95].mxu1 }
0x1071   :  { %v6627_v17 = vmul.f32 -1.442695, %v5882_v56  ;;  %v6628_v24 = vmul.f32 -1.442695, %v5884_v15 }
0x1072   :  { %7166 = vpow2.f32 %v6626_v35 }
0x1073   :  { %7168 = vpow2.f32 %v6627_v17 }
0x1074   :  { %7170 = vpow2.f32 %v6628_v24 }
0x1075   :  { %7172 = vtanh.f32 %v5883_v7 }
0x107c   :  { %v7167_v40 = vpop.eup %7166 }
0x107d   :  { %v7169_v55 = vpop.eup %7168  ;;  %v5888_v25 = vadd.f32 1.0, %v7167_v40 }
0x107e   :  { %v5894_v2 = vadd.f32 1.0, %v7169_v55  ;;  %v7171_v60 = vpop.eup %7170 }
0x107f   :  { %7174 = vrcp.f32 %v5888_v25  ;;  %v7173_v58 = vpop.eup %7172  ;;  %v5901_v3 = vadd.f32 1.0, %v7171_v60 }
0x1080   :  { %7176 = vrcp.f32 %v5894_v2 }
0x1081   :  { %7178 = vrcp.f32 %v5901_v3 }
0x1089   :  { %v7175_v19 = vpop.eup %7174 }
0x108a   :  { %v7177_v6 = vpop.eup %7176  ;;  %v5906_v46 = vmul.f32 %v7175_v19, %v7173_v58 }
0x108b   :  { %v5905_v1 = vmul.f32 %v7177_v6, %v5594_v59 }
0x108d   :  { %v5907_v63 = vadd.f32 %v5906_v46, %v5905_v1 }
0x108f   :  { %7180 = vtanh.f32 %v5907_v63  ;;  %5919 = vst [vmem:[#allocation10 + $0x8] sm:$0xff] %v5907_v63 }
0x1090   :  { %7215 = shalt.err (!%p7212_p12)
}
0x1091   :  { %s7216_s4 = scalar_lea.hbm %s8780_s8, 256 }
0x1092   :  { %p7217_p13 = scmp.ne.s32.totalorder %s8780_s8, %s7216_s4  ;;  %p7220_p0 = scmp.lt.u32.totalorder %s7216_s4, %s8780_s8 }
0x1094   :  { %p7222_p1 = pnand %p7220_p0, %p7217_p13 }
0x1096   :  { %7225 = shalt.err (!%p7222_p1)
}
0x1097   :  { %s7259_s1 = smov 128   ;;  %s7260_s28 = smov 8   ;;  %v7179_v27 = vpop.eup %7178 }
0x1098   :  { %5945 = dma.vmem_to_hbm [thread:$0]  %s5940_s21, 256, %s8780_s8, [#allocation11], %s7259_s1, %s7259_s1, %s7260_s28  }
0x1099   :  { %s7261_s29 = smov [#allocation9]   ;;  %v7181_v22 = vpop.eup %7180 }
0x109a   :  { %s5927_s30 = sshll.u32 %s7261_s29, 4  ;;  %v5909_v23 = vmul.f32 %v7181_v22, %v7179_v27  ;;  %s5928_s30 = int_to_ptr.vmem [resolvable:$true] %s5927_s30 }
0x109b   :  { %s7226_s10 = scalar_lea.vmem %s5928_s30, 256  ;;  %p7231_p3 = scmp.lt.s32.totalorder %s5928_s30, %s5928_s30 }
0x109c   :  { %6629 = vst [vmem:[%s8778_s6 + $0x38] sm:$0xff] %v5909_v23  ;;  %5916 = vst [vmem:[#allocation9 + $0x8] sm:$0xff] %v5909_v23  ;;  %p7227_p2 = scmp.ne.s32.totalorder %s5928_s30, %s7226_s10  ;;  %p7232_p4 = scmp.lt.s32.totalorder %s7226_s10, %s7226_s10 }
0x109e   :  { %p7233_p5 = por %p7232_p4, %p7231_p3 }
0x10a0   :  { %p7234_p6 = pnand %p7233_p5, %p7227_p2 }
0x10a2   :  { %7237 = shalt.err (!%p7234_p6)
}
0x10a3   :  { %s7238_s12 = scalar_lea.hbm %s8779_s7, 256 }
0x10a4   :  { %p7239_p7 = scmp.ne.s32.totalorder %s8779_s7, %s7238_s12  ;;  %p7242_p8 = scmp.lt.u32.totalorder %s7238_s12, %s8779_s7 }
0x10a6   :  { %p7244_p9 = pnand %p7242_p8, %p7239_p7 }
0x10a8   :  { %7247 = shalt.err (!%p7244_p9)
}
0x10a9   :  { %5933 = dma.vmem_to_hbm [thread:$0]  %s5928_s30, 256, %s8779_s7, [#allocation8], %s7259_s1, %s7259_s1, %s7260_s28  }
0x10aa   :  { %7250 = dma.done.wait [#allocation8], 256  }
0x10ab   :  { %7251 = vsyncadd [#allocation8], 4294967040 }
0x10ac   :  { %7252 = dma.done.wait [#allocation11], 256  }
0x10ad   :  { %7253 = vsyncadd [#allocation11], 4294967040 }
0x10ae   :  { %5954 = vsyncpa [#allocation7], 1 }
0x10af   :  { %5955 = vsyncpa [#allocation8], 1 }
0x10b0   :  { %5956 = vsyncpa [#allocation11], 1 }

</bundles_post_ra>
